<compile_context>
chip_gen: v7x
topology: tpu7x:2x2x1
jax: 0.10.0
libtpu: 0.0.40
codegen_flags: <defaults>
</compile_context>

<pallas_src>
import functools

import numpy as np
import jax
import jax.numpy as jnp
from jax.experimental import pallas as pl
from jax.experimental.pallas import tpu as pltpu

DIM = 8            # module default is 24; small dim for the test run
IMG = 28           # fixed by the module (MNIST)
KS = 3             # conv kernel size

# Spatial bookkeeping: stride-2, pad-1, k=3 convs: 28 -> 14 -> 7 -> 4.
OH1, OH2, OH3 = 14, 7, 4
PITCH = 16                       # row pitch of every VMEM activation slab (>= 14+2, mult. of 8)
J1 = OH1 * PITCH                 # 224 layer-1 output slab rows (incl. junk cols)
J2 = (OH2 - 1) * PITCH + OH2     # 103 layer-2 output slab rows
J3 = (OH3 - 1) * PITCH + OH3     # 52  layer-3 output slab rows
OFF = PITCH + 1                  # write offset == padded position (1, 1)
A1_ROWS = 16 * PITCH             # padded 16x16 grid for layer-2 input
A2_ROWS = 9 * PITCH              # padded 9x9  grid for layer-3 input


# ----------------------------------------------------------------------------
# Fully fused kernel: conv1 -> conv2 -> conv3 -> fused mu|logvar head.
# One grid step == one image.  All activations stay in VMEM scratch.
# ----------------------------------------------------------------------------
def _encoder_kernel(p1_ref, w1_ref, b1_ref, m1_ref,
                    w2_ref, b2_ref, m2_ref,
                    w3_ref, b3_ref,
                    hw_ref, hb_ref,
                    out_ref, a1_ref, a2_ref, *, dim):
    # Zero the activation scratch: the untouched rows are the zero padding
    # border (and bottom slack) of the next layer's padded grid.
    a1_ref[...] = jnp.zeros_like(a1_ref)
    a2_ref[...] = jnp.zeros_like(a2_ref)

    # ---- layer 1: im2col patches (built once in the wrapper, Cin=1) ---------
    # (J1, 9) @ (9, dim); dropout = identity (eval); ReLU; mask junk columns so
    # they become the zero padding of the 16x16 pitch-16 grid in a1.
    y1 = jnp.dot(p1_ref[...], w1_ref[...], preferred_element_type=jnp.float32)
    y1 = jnp.maximum(y1 + b1_ref[...], 0.0) * m1_ref[...]
    a1_ref[pl.ds(OFF, J1), :] = y1                       # padded pos (1,1) onward

    # ---- layer 2: dim -> 2*dim, 9 taps via strided sublane reads ------------
    acc = jnp.zeros((J2, 2 * dim), jnp.float32)
    for t in range(9):
        kh, kw = t // 3, t % 3
        tap = a1_ref[pl.ds(kh * PITCH + kw, J2, 2), :]   # (J2, dim) stride-2 read
        acc = acc + jnp.dot(tap, w2_ref[t], preferred_element_type=jnp.float32)
    y2 = jnp.maximum(acc + b2_ref[...], 0.0) * m2_ref[...]
    a2_ref[pl.ds(OFF, J2), :] = y2

    # ---- layer 3: 2*dim -> 4*dim --------------------------------------------
    acc = jnp.zeros((J3, 4 * dim), jnp.float32)
    for t in range(9):
        kh, kw = t // 3, t % 3
        tap = a2_ref[pl.ds(kh * PITCH + kw, J3, 2), :]   # (J3, 2*dim)
        acc = acc + jnp.dot(tap, w3_ref[t], preferred_element_type=jnp.float32)
    y3 = jnp.maximum(acc + b3_ref[...], 0.0)             # (J3, 4*dim); junk rows unused

    # ---- fused mu|logvar head ------------------------------------------------
    # hw[p] is the (4*dim, 2*dim) weight block for spatial tap p = h*4 + w,
    # already permuted at init to match torch's NCHW flatten.  Only the 16
    # valid slab rows are read, so no mask is needed here.
    head = hb_ref[...]                                   # (1, 2*dim)
    for p in range(16):
        oh, ow = p // 4, p % 4
        row = y3[oh * PITCH + ow: oh * PITCH + ow + 1, :]    # (1, 4*dim)
        head = head + jnp.dot(row, hw_ref[p], preferred_element_type=jnp.float32)
    out_ref[0] = head


def _encoder_pallas(p1, params, batch):
    dim = params["b1"].shape[1]
    kernel = functools.partial(_encoder_kernel, dim=dim)

    nil2 = lambda b: (0, 0)
    nil3 = lambda b: (0, 0, 0)

    flops = 2 * batch * (J1 * 9 * dim + J2 * dim * 2 * dim
                         + J3 * 2 * dim * 4 * dim + 16 * 4 * dim * 2 * dim)
    bytes_accessed = 4 * (batch * J1 * 9 + batch * 2 * dim
                          + 9 * dim + dim + J1 * dim
                          + 9 * dim * 2 * dim + 2 * dim + J2 * 2 * dim
                          + 9 * 2 * dim * 4 * dim + 4 * dim
                          + 16 * 4 * dim * 2 * dim + 2 * dim)

    out = pl.pallas_call(
        kernel,
        out_shape=jax.ShapeDtypeStruct((batch, 1, 2 * dim), jnp.float32),
        grid=(batch,),
        in_specs=[
            pl.BlockSpec((J1, 9), lambda b: (b, 0)),              # layer-1 patches
            pl.BlockSpec((9, dim), nil2),                          # w1
            pl.BlockSpec((1, dim), nil2),                          # b1
            pl.BlockSpec((J1, dim), nil2),                         # mask1
            pl.BlockSpec((9, dim, 2 * dim), nil3),                 # w2
            pl.BlockSpec((1, 2 * dim), nil2),                      # b2
            pl.BlockSpec((J2, 2 * dim), nil2),                     # mask2
            pl.BlockSpec((9, 2 * dim, 4 * dim), nil3),             # w3
            pl.BlockSpec((1, 4 * dim), nil2),                      # b3
            pl.BlockSpec((16, 4 * dim, 2 * dim), nil3),            # fused head W
            pl.BlockSpec((1, 2 * dim), nil2),                      # fused head b
        ],
        out_specs=pl.BlockSpec((1, 1, 2 * dim), lambda b: (b, 0, 0)),
        scratch_shapes=[
            pltpu.VMEM((A1_ROWS, dim), jnp.float32),               # padded layer-2 input
            pltpu.VMEM((A2_ROWS, 2 * dim), jnp.float32),           # padded layer-3 input
        ],
        compiler_params=pltpu.CompilerParams(
            dimension_semantics=("parallel",)),                    # v7x: image per TC
        cost_estimate=pl.CostEstimate(flops=flops, transcendentals=0,
                                      bytes_accessed=bytes_accessed),
    )(p1, params["w1"], params["b1"], params["m1"],
      params["w2"], params["b2"], params["m2"],
      params["w3"], params["b3"],
      params["head_w"], params["head_b"])
    return out.reshape(batch, 2 * dim)


# ----------------------------------------------------------------------------
# Weight-norm folding (done ONCE at init; eval-mode constants)
# ----------------------------------------------------------------------------
def fold_weight_norm_conv(v, g):
    """v:(Cout,Cin,KH,KW), g:(Cout,) -> matmul weight (KH*KW*Cin, Cout)."""
    norm = jnp.sqrt(jnp.sum(v * v, axis=(1, 2, 3), keepdims=True))
    w = v * (g.reshape(-1, 1, 1, 1) / norm)
    return jnp.transpose(w, (2, 3, 1, 0)).reshape(-1, v.shape[0])


def fold_weight_norm_linear(v, g):
    """v:(out,in), g:(out,) -> matmul weight (in, out)."""
    norm = jnp.sqrt(jnp.sum(v * v, axis=1, keepdims=True))
    w = v * (g.reshape(-1, 1) / norm)
    return w.T


# ----------------------------------------------------------------------------
# Deterministic synthetic parameter init (shapes from VariationalEncoder)
# ----------------------------------------------------------------------------
def init_params(key, dim=DIM):
    params = {}
    conv_dims = [(1, dim), (dim, 2 * dim), (2 * dim, 4 * dim)]
    for li, (cin, cout) in enumerate(conv_dims, start=1):
        key, k1, k2, k3 = jax.random.split(key, 4)
        v = 0.1 * jax.random.normal(k1, (cout, cin, 3, 3), jnp.float32)
        g = 0.5 + jax.random.uniform(k2, (cout,), jnp.float32)
        b = 0.1 * jax.random.normal(k3, (cout,), jnp.float32)
        w = fold_weight_norm_conv(v, g)                   # (9*cin, cout)
        params[f"w{li}"] = w if cin == 1 else w.reshape(9, cin, cout)
        params[f"b{li}"] = b.reshape(1, cout)

    feat = 4 * 4 * 4 * dim
    head_ws, head_bs = [], []
    for _ in ("mu", "logvar"):
        key, k1, k2, k3 = jax.random.split(key, 4)
        v = 0.05 * jax.random.normal(k1, (dim, feat), jnp.float32)
        g = 0.5 + jax.random.uniform(k2, (dim,), jnp.float32)
        b = 0.1 * jax.random.normal(k3, (dim,), jnp.float32)
        head_ws.append(fold_weight_norm_linear(v, g))     # (feat, dim)
        head_bs.append(b)
    hw = jnp.concatenate(head_ws, axis=1)                 # (feat, 2*dim)
    # Permute rows from torch's NCHW flatten order f = c*16 + h*4 + w to the
    # kernel's (spatial tap p = h*4+w, channel c) layout -> no runtime transpose.
    params["head_w"] = hw.reshape(4 * dim, 16, 2 * dim).transpose(1, 0, 2)
    params["head_b"] = jnp.concatenate(head_bs, axis=0).reshape(1, 2 * dim)

    # Junk-column masks: slab row j holds output col (j % PITCH); cols >= valid
    # width are zeroed so they double as the next layer's zero padding border.
    m1 = (np.arange(J1) % PITCH < OH1).astype(np.float32)
    m2 = (np.arange(J2) % PITCH < OH2).astype(np.float32)
    params["m1"] = jnp.asarray(np.ascontiguousarray(
        np.broadcast_to(m1[:, None], (J1, dim))))
    params["m2"] = jnp.asarray(np.ascontiguousarray(
        np.broadcast_to(m2[:, None], (J2, 2 * dim))))
    return params


# ----------------------------------------------------------------------------
# Forward pass: tiny input prep (pad + layer-1 im2col) + ONE fused pallas_call
# ----------------------------------------------------------------------------
@jax.jit
def encoder_forward(params, x_nchw):
    dim = params["b1"].shape[1]
    B = x_nchw.shape[0]
    img = x_nchw.reshape(B, 1, IMG, IMG)[:, 0]            # (B, 28, 28)
    xpad = jnp.pad(img, ((0, 0), (1, 1), (1, 1)))         # (B, 30, 30)
    # Layer-1 im2col (Cin=1): 9 shifted stride-2 views of the padded image,
    # laid out with row pitch 16 to match the kernel's slab indexing.
    taps = [xpad[:, kh:kh + 2 * OH1:2, kw:kw + 2 * OH1:2]
            for kh in range(KS) for kw in range(KS)]
    p1 = jnp.stack(taps, axis=-1)                         # (B, 14, 14, 9)
    p1 = jnp.pad(p1, ((0, 0), (0, 0), (0, PITCH - OH1), (0, 0)))   # (B, 14, 16, 9)
    p1 = p1.reshape(B * J1, 9)

    out = _encoder_pallas(p1, params, B)                  # (B, 2*dim)
    mu, logvar = out[:, :dim], out[:, dim:]
    z = mu          # eval-mode reparameterize (self.training == False)
    return z.reshape(B, -1), logvar


# ----------------------------------------------------------------------------
if __name__ == "__main__":
    key = jax.random.PRNGKey(0)
    kp, kx = jax.random.split(key)
    params = init_params(kp, DIM)
    x = jax.random.normal(kx, (2, 1, IMG, IMG), jnp.float32)

    z, logvar = encoder_forward(params, x)
    jax.block_until_ready((z, logvar))

    assert z.shape == (2, DIM), z.shape
    assert logvar.shape == (2, DIM), logvar.shape
    assert bool(jnp.all(jnp.isfinite(z))) and bool(jnp.all(jnp.isfinite(logvar)))
    print("KERNEL_OK")
</pallas_src>

<mosaic_0001>
module attributes {stable_mosaic.version = 11 : i64} {
  func.func @_encoder_kernel(%arg0: i32, %arg1: memref<224x9xf32, #tpu.memory_space<vmem>>, %arg2: memref<9x8xf32, #tpu.memory_space<vmem>>, %arg3: memref<1x8xf32, #tpu.memory_space<vmem>>, %arg4: memref<224x8xf32, #tpu.memory_space<vmem>>, %arg5: memref<9x8x16xf32, #tpu.memory_space<vmem>>, %arg6: memref<1x16xf32, #tpu.memory_space<vmem>>, %arg7: memref<103x16xf32, #tpu.memory_space<vmem>>, %arg8: memref<9x16x32xf32, #tpu.memory_space<vmem>>, %arg9: memref<1x32xf32, #tpu.memory_space<vmem>>, %arg10: memref<16x32x16xf32, #tpu.memory_space<vmem>>, %arg11: memref<1x16xf32, #tpu.memory_space<vmem>>, %arg12: memref<1x1x16xf32, #tpu.memory_space<vmem>>, %arg13: memref<256x8xf32, #tpu.memory_space<vmem>>, %arg14: memref<144x16xf32, #tpu.memory_space<vmem>>) attributes {dimension_semantics = [#tpu.dimension_semantics<parallel>], iteration_bounds = array<i64: 2>, scalar_prefetch = 0 : i64, scratch_operands = 2 : i64, tpu.core_type = #tpu.core_type<tc>, window_params = [{transform_indices = @transform_0, window_bounds = array<i64: 224, 9>}, {pipeline_mode = #tpu.pipeline_mode<synchronous>, transform_indices = @transform_1, window_bounds = array<i64: 9, 8>}, {pipeline_mode = #tpu.pipeline_mode<synchronous>, transform_indices = @transform_2, window_bounds = array<i64: 1, 8>}, {pipeline_mode = #tpu.pipeline_mode<synchronous>, transform_indices = @transform_3, window_bounds = array<i64: 224, 8>}, {pipeline_mode = #tpu.pipeline_mode<synchronous>, transform_indices = @transform_4, window_bounds = array<i64: 9, 8, 16>}, {pipeline_mode = #tpu.pipeline_mode<synchronous>, transform_indices = @transform_5, window_bounds = array<i64: 1, 16>}, {pipeline_mode = #tpu.pipeline_mode<synchronous>, transform_indices = @transform_6, window_bounds = array<i64: 103, 16>}, {pipeline_mode = #tpu.pipeline_mode<synchronous>, transform_indices = @transform_7, window_bounds = array<i64: 9, 16, 32>}, {pipeline_mode = #tpu.pipeline_mode<synchronous>, transform_indices = @transform_8, window_bounds = array<i64: 1, 32>}, {pipeline_mode = #tpu.pipeline_mode<synchronous>, transform_indices = @transform_9, window_bounds = array<i64: 16, 32, 16>}, {pipeline_mode = #tpu.pipeline_mode<synchronous>, transform_indices = @transform_10, window_bounds = array<i64: 1, 16>}, {transform_indices = @transform_11, window_bounds = array<i64: 1, 1, 16>}]} {
    %cst = arith.constant 0.000000e+00 : f32
    %0 = vector.broadcast %cst : f32 to vector<256x8xf32>
    %c0 = arith.constant 0 : index
    %c0_0 = arith.constant 0 : index
    %1 = vector.load %arg13[%c0, %c0_0] : memref<256x8xf32, #tpu.memory_space<vmem>>, vector<256x8xf32>
    tpu.vector_store %arg13[%c0, %c0_0], %0 {strides = array<i32>} : memref<256x8xf32, #tpu.memory_space<vmem>>, vector<256x8xf32>,
    %cst_1 = arith.constant 0.000000e+00 : f32
    %2 = vector.broadcast %cst_1 : f32 to vector<144x16xf32>
    %c0_2 = arith.constant 0 : index
    %c0_3 = arith.constant 0 : index
    %3 = vector.load %arg14[%c0_2, %c0_3] : memref<144x16xf32, #tpu.memory_space<vmem>>, vector<144x16xf32>
    tpu.vector_store %arg14[%c0_2, %c0_3], %2 {strides = array<i32>} : memref<144x16xf32, #tpu.memory_space<vmem>>, vector<144x16xf32>,
    %c0_4 = arith.constant 0 : index
    %c0_5 = arith.constant 0 : index
    %4 = vector.load %arg1[%c0_4, %c0_5] : memref<224x9xf32, #tpu.memory_space<vmem>>, vector<224x9xf32>
    %c0_6 = arith.constant 0 : index
    %c0_7 = arith.constant 0 : index
    %5 = vector.load %arg2[%c0_6, %c0_7] : memref<9x8xf32, #tpu.memory_space<vmem>>, vector<9x8xf32>
    %cst_8 = arith.constant dense<0.000000e+00> : vector<224x8xf32>
    %6 = tpu.matmul %4, %5, %cst_8 {dimension_numbers = #tpu.dot_dimension_numbers<[1], [0], [0], [1], [0, 0, 1, 1], [], []>} : vector<224x9xf32>, vector<9x8xf32>, vector<224x8xf32> -> vector<224x8xf32>
    %c0_9 = arith.constant 0 : index
    %c0_10 = arith.constant 0 : index
    %7 = vector.load %arg3[%c0_9, %c0_10] : memref<1x8xf32, #tpu.memory_space<vmem>>, vector<1x8xf32>
    %8 = vector.broadcast %7 : vector<1x8xf32> to vector<224x8xf32>
    %9 = arith.addf %6, %8 : vector<224x8xf32>
    %cst_11 = arith.constant 0.000000e+00 : f32
    %10 = vector.broadcast %cst_11 : f32 to vector<224x8xf32>
    %11 = arith.maximumf %9, %10 : vector<224x8xf32>
    %c0_12 = arith.constant 0 : index
    %c0_13 = arith.constant 0 : index
    %12 = vector.load %arg4[%c0_12, %c0_13] : memref<224x8xf32, #tpu.memory_space<vmem>>, vector<224x8xf32>
    %13 = arith.mulf %11, %12 : vector<224x8xf32>
    %c17 = arith.constant 17 : index
    %c0_14 = arith.constant 0 : index
    %14 = vector.load %arg13[%c17, %c0_14] : memref<256x8xf32, #tpu.memory_space<vmem>>, vector<224x8xf32>
    tpu.vector_store %arg13[%c17, %c0_14], %13 {strides = array<i32>} : memref<256x8xf32, #tpu.memory_space<vmem>>, vector<224x8xf32>,
    %cst_15 = arith.constant 0.000000e+00 : f32
    %15 = vector.broadcast %cst_15 : f32 to vector<103x16xf32>
    %c0_16 = arith.constant 0 : index
    %c0_17 = arith.constant 0 : index
    %16 = tpu.strided_load %arg13[%c0_16, %c0_17] {strides = array<i32: 2, 1>} : memref<256x8xf32, #tpu.memory_space<vmem>>, vector<103x8xf32>
    %c0_18 = arith.constant 0 : index
    %c0_19 = arith.constant 0 : index
    %c0_20 = arith.constant 0 : index
    %17 = vector.load %arg5[%c0_18, %c0_19, %c0_20] : memref<9x8x16xf32, #tpu.memory_space<vmem>>, vector<1x8x16xf32>
    %18 = vector.shape_cast %17 : vector<1x8x16xf32> to vector<8x16xf32>
    %cst_21 = arith.constant dense<0.000000e+00> : vector<103x16xf32>
    %19 = tpu.matmul %16, %18, %cst_21 {dimension_numbers = #tpu.dot_dimension_numbers<[1], [0], [0], [1], [0, 0, 1, 1], [], []>} : vector<103x8xf32>, vector<8x16xf32>, vector<103x16xf32> -> vector<103x16xf32>
    %20 = arith.addf %15, %19 : vector<103x16xf32>
    %c1 = arith.constant 1 : index
    %c0_22 = arith.constant 0 : index
    %21 = tpu.strided_load %arg13[%c1, %c0_22] {strides = array<i32: 2, 1>} : memref<256x8xf32, #tpu.memory_space<vmem>>, vector<103x8xf32>
    %c1_23 = arith.constant 1 : index
    %c0_24 = arith.constant 0 : index
    %c0_25 = arith.constant 0 : index
    %22 = vector.load %arg5[%c1_23, %c0_24, %c0_25] : memref<9x8x16xf32, #tpu.memory_space<vmem>>, vector<1x8x16xf32>
    %23 = vector.shape_cast %22 : vector<1x8x16xf32> to vector<8x16xf32>
    %cst_26 = arith.constant dense<0.000000e+00> : vector<103x16xf32>
    %24 = tpu.matmul %21, %23, %cst_26 {dimension_numbers = #tpu.dot_dimension_numbers<[1], [0], [0], [1], [0, 0, 1, 1], [], []>} : vector<103x8xf32>, vector<8x16xf32>, vector<103x16xf32> -> vector<103x16xf32>
    %25 = arith.addf %20, %24 : vector<103x16xf32>
    %c2 = arith.constant 2 : index
    %c0_27 = arith.constant 0 : index
    %26 = tpu.strided_load %arg13[%c2, %c0_27] {strides = array<i32: 2, 1>} : memref<256x8xf32, #tpu.memory_space<vmem>>, vector<103x8xf32>
    %c2_28 = arith.constant 2 : index
    %c0_29 = arith.constant 0 : index
    %c0_30 = arith.constant 0 : index
    %27 = vector.load %arg5[%c2_28, %c0_29, %c0_30] : memref<9x8x16xf32, #tpu.memory_space<vmem>>, vector<1x8x16xf32>
    %28 = vector.shape_cast %27 : vector<1x8x16xf32> to vector<8x16xf32>
    %cst_31 = arith.constant dense<0.000000e+00> : vector<103x16xf32>
    %29 = tpu.matmul %26, %28, %cst_31 {dimension_numbers = #tpu.dot_dimension_numbers<[1], [0], [0], [1], [0, 0, 1, 1], [], []>} : vector<103x8xf32>, vector<8x16xf32>, vector<103x16xf32> -> vector<103x16xf32>
    %30 = arith.addf %25, %29 : vector<103x16xf32>
    %c16 = arith.constant 16 : index
    %c0_32 = arith.constant 0 : index
    %31 = tpu.strided_load %arg13[%c16, %c0_32] {strides = array<i32: 2, 1>} : memref<256x8xf32, #tpu.memory_space<vmem>>, vector<103x8xf32>
    %c3 = arith.constant 3 : index
    %c0_33 = arith.constant 0 : index
    %c0_34 = arith.constant 0 : index
    %32 = vector.load %arg5[%c3, %c0_33, %c0_34] : memref<9x8x16xf32, #tpu.memory_space<vmem>>, vector<1x8x16xf32>
    %33 = vector.shape_cast %32 : vector<1x8x16xf32> to vector<8x16xf32>
    %cst_35 = arith.constant dense<0.000000e+00> : vector<103x16xf32>
    %34 = tpu.matmul %31, %33, %cst_35 {dimension_numbers = #tpu.dot_dimension_numbers<[1], [0], [0], [1], [0, 0, 1, 1], [], []>} : vector<103x8xf32>, vector<8x16xf32>, vector<103x16xf32> -> vector<103x16xf32>
    %35 = arith.addf %30, %34 : vector<103x16xf32>
    %c17_36 = arith.constant 17 : index
    %c0_37 = arith.constant 0 : index
    %36 = tpu.strided_load %arg13[%c17_36, %c0_37] {strides = array<i32: 2, 1>} : memref<256x8xf32, #tpu.memory_space<vmem>>, vector<103x8xf32>
    %c4 = arith.constant 4 : index
    %c0_38 = arith.constant 0 : index
    %c0_39 = arith.constant 0 : index
    %37 = vector.load %arg5[%c4, %c0_38, %c0_39] : memref<9x8x16xf32, #tpu.memory_space<vmem>>, vector<1x8x16xf32>
    %38 = vector.shape_cast %37 : vector<1x8x16xf32> to vector<8x16xf32>
    %cst_40 = arith.constant dense<0.000000e+00> : vector<103x16xf32>
    %39 = tpu.matmul %36, %38, %cst_40 {dimension_numbers = #tpu.dot_dimension_numbers<[1], [0], [0], [1], [0, 0, 1, 1], [], []>} : vector<103x8xf32>, vector<8x16xf32>, vector<103x16xf32> -> vector<103x16xf32>
    %40 = arith.addf %35, %39 : vector<103x16xf32>
    %c18 = arith.constant 18 : index
    %c0_41 = arith.constant 0 : index
    %41 = tpu.strided_load %arg13[%c18, %c0_41] {strides = array<i32: 2, 1>} : memref<256x8xf32, #tpu.memory_space<vmem>>, vector<103x8xf32>
    %c5 = arith.constant 5 : index
    %c0_42 = arith.constant 0 : index
    %c0_43 = arith.constant 0 : index
    %42 = vector.load %arg5[%c5, %c0_42, %c0_43] : memref<9x8x16xf32, #tpu.memory_space<vmem>>, vector<1x8x16xf32>
    %43 = vector.shape_cast %42 : vector<1x8x16xf32> to vector<8x16xf32>
    %cst_44 = arith.constant dense<0.000000e+00> : vector<103x16xf32>
    %44 = tpu.matmul %41, %43, %cst_44 {dimension_numbers = #tpu.dot_dimension_numbers<[1], [0], [0], [1], [0, 0, 1, 1], [], []>} : vector<103x8xf32>, vector<8x16xf32>, vector<103x16xf32> -> vector<103x16xf32>
    %45 = arith.addf %40, %44 : vector<103x16xf32>
    %c32 = arith.constant 32 : index
    %c0_45 = arith.constant 0 : index
    %46 = tpu.strided_load %arg13[%c32, %c0_45] {strides = array<i32: 2, 1>} : memref<256x8xf32, #tpu.memory_space<vmem>>, vector<103x8xf32>
    %c6 = arith.constant 6 : index
    %c0_46 = arith.constant 0 : index
    %c0_47 = arith.constant 0 : index
    %47 = vector.load %arg5[%c6, %c0_46, %c0_47] : memref<9x8x16xf32, #tpu.memory_space<vmem>>, vector<1x8x16xf32>
    %48 = vector.shape_cast %47 : vector<1x8x16xf32> to vector<8x16xf32>
    %cst_48 = arith.constant dense<0.000000e+00> : vector<103x16xf32>
    %49 = tpu.matmul %46, %48, %cst_48 {dimension_numbers = #tpu.dot_dimension_numbers<[1], [0], [0], [1], [0, 0, 1, 1], [], []>} : vector<103x8xf32>, vector<8x16xf32>, vector<103x16xf32> -> vector<103x16xf32>
    %50 = arith.addf %45, %49 : vector<103x16xf32>
    %c33 = arith.constant 33 : index
    %c0_49 = arith.constant 0 : index
    %51 = tpu.strided_load %arg13[%c33, %c0_49] {strides = array<i32: 2, 1>} : memref<256x8xf32, #tpu.memory_space<vmem>>, vector<103x8xf32>
    %c7 = arith.constant 7 : index
    %c0_50 = arith.constant 0 : index
    %c0_51 = arith.constant 0 : index
    %52 = vector.load %arg5[%c7, %c0_50, %c0_51] : memref<9x8x16xf32, #tpu.memory_space<vmem>>, vector<1x8x16xf32>
    %53 = vector.shape_cast %52 : vector<1x8x16xf32> to vector<8x16xf32>
    %cst_52 = arith.constant dense<0.000000e+00> : vector<103x16xf32>
    %54 = tpu.matmul %51, %53, %cst_52 {dimension_numbers = #tpu.dot_dimension_numbers<[1], [0], [0], [1], [0, 0, 1, 1], [], []>} : vector<103x8xf32>, vector<8x16xf32>, vector<103x16xf32> -> vector<103x16xf32>
    %55 = arith.addf %50, %54 : vector<103x16xf32>
    %c34 = arith.constant 34 : index
    %c0_53 = arith.constant 0 : index
    %56 = tpu.strided_load %arg13[%c34, %c0_53] {strides = array<i32: 2, 1>} : memref<256x8xf32, #tpu.memory_space<vmem>>, vector<103x8xf32>
    %c8 = arith.constant 8 : index
    %c0_54 = arith.constant 0 : index
    %c0_55 = arith.constant 0 : index
    %57 = vector.load %arg5[%c8, %c0_54, %c0_55] : memref<9x8x16xf32, #tpu.memory_space<vmem>>, vector<1x8x16xf32>
    %58 = vector.shape_cast %57 : vector<1x8x16xf32> to vector<8x16xf32>
    %cst_56 = arith.constant dense<0.000000e+00> : vector<103x16xf32>
    %59 = tpu.matmul %56, %58, %cst_56 {dimension_numbers = #tpu.dot_dimension_numbers<[1], [0], [0], [1], [0, 0, 1, 1], [], []>} : vector<103x8xf32>, vector<8x16xf32>, vector<103x16xf32> -> vector<103x16xf32>
    %60 = arith.addf %55, %59 : vector<103x16xf32>
    %c0_57 = arith.constant 0 : index
    %c0_58 = arith.constant 0 : index
    %61 = vector.load %arg6[%c0_57, %c0_58] : memref<1x16xf32, #tpu.memory_space<vmem>>, vector<1x16xf32>
    %62 = vector.broadcast %61 : vector<1x16xf32> to vector<103x16xf32>
    %63 = arith.addf %60, %62 : vector<103x16xf32>
    %cst_59 = arith.constant 0.000000e+00 : f32
    %64 = vector.broadcast %cst_59 : f32 to vector<103x16xf32>
    %65 = arith.maximumf %63, %64 : vector<103x16xf32>
    %c0_60 = arith.constant 0 : index
    %c0_61 = arith.constant 0 : index
    %66 = vector.load %arg7[%c0_60, %c0_61] : memref<103x16xf32, #tpu.memory_space<vmem>>, vector<103x16xf32>
    %67 = arith.mulf %65, %66 : vector<103x16xf32>
    %c17_62 = arith.constant 17 : index
    %c0_63 = arith.constant 0 : index
    %68 = vector.load %arg14[%c17_62, %c0_63] : memref<144x16xf32, #tpu.memory_space<vmem>>, vector<103x16xf32>
    tpu.vector_store %arg14[%c17_62, %c0_63], %67 {strides = array<i32>} : memref<144x16xf32, #tpu.memory_space<vmem>>, vector<103x16xf32>,
    %cst_64 = arith.constant 0.000000e+00 : f32
    %69 = vector.broadcast %cst_64 : f32 to vector<52x32xf32>
    %c0_65 = arith.constant 0 : index
    %c0_66 = arith.constant 0 : index
    %70 = tpu.strided_load %arg14[%c0_65, %c0_66] {strides = array<i32: 2, 1>} : memref<144x16xf32, #tpu.memory_space<vmem>>, vector<52x16xf32>
    %c0_67 = arith.constant 0 : index
    %c0_68 = arith.constant 0 : index
    %c0_69 = arith.constant 0 : index
    %71 = vector.load %arg8[%c0_67, %c0_68, %c0_69] : memref<9x16x32xf32, #tpu.memory_space<vmem>>, vector<1x16x32xf32>
    %72 = vector.shape_cast %71 : vector<1x16x32xf32> to vector<16x32xf32>
    %cst_70 = arith.constant dense<0.000000e+00> : vector<52x32xf32>
    %73 = tpu.matmul %70, %72, %cst_70 {dimension_numbers = #tpu.dot_dimension_numbers<[1], [0], [0], [1], [0, 0, 1, 1], [], []>} : vector<52x16xf32>, vector<16x32xf32>, vector<52x32xf32> -> vector<52x32xf32>
    %74 = arith.addf %69, %73 : vector<52x32xf32>
    %c1_71 = arith.constant 1 : index
    %c0_72 = arith.constant 0 : index
    %75 = tpu.strided_load %arg14[%c1_71, %c0_72] {strides = array<i32: 2, 1>} : memref<144x16xf32, #tpu.memory_space<vmem>>, vector<52x16xf32>
    %c1_73 = arith.constant 1 : index
    %c0_74 = arith.constant 0 : index
    %c0_75 = arith.constant 0 : index
    %76 = vector.load %arg8[%c1_73, %c0_74, %c0_75] : memref<9x16x32xf32, #tpu.memory_space<vmem>>, vector<1x16x32xf32>
    %77 = vector.shape_cast %76 : vector<1x16x32xf32> to vector<16x32xf32>
    %cst_76 = arith.constant dense<0.000000e+00> : vector<52x32xf32>
    %78 = tpu.matmul %75, %77, %cst_76 {dimension_numbers = #tpu.dot_dimension_numbers<[1], [0], [0], [1], [0, 0, 1, 1], [], []>} : vector<52x16xf32>, vector<16x32xf32>, vector<52x32xf32> -> vector<52x32xf32>
    %79 = arith.addf %74, %78 : vector<52x32xf32>
    %c2_77 = arith.constant 2 : index
    %c0_78 = arith.constant 0 : index
    %80 = tpu.strided_load %arg14[%c2_77, %c0_78] {strides = array<i32: 2, 1>} : memref<144x16xf32, #tpu.memory_space<vmem>>, vector<52x16xf32>
    %c2_79 = arith.constant 2 : index
    %c0_80 = arith.constant 0 : index
    %c0_81 = arith.constant 0 : index
    %81 = vector.load %arg8[%c2_79, %c0_80, %c0_81] : memref<9x16x32xf32, #tpu.memory_space<vmem>>, vector<1x16x32xf32>
    %82 = vector.shape_cast %81 : vector<1x16x32xf32> to vector<16x32xf32>
    %cst_82 = arith.constant dense<0.000000e+00> : vector<52x32xf32>
    %83 = tpu.matmul %80, %82, %cst_82 {dimension_numbers = #tpu.dot_dimension_numbers<[1], [0], [0], [1], [0, 0, 1, 1], [], []>} : vector<52x16xf32>, vector<16x32xf32>, vector<52x32xf32> -> vector<52x32xf32>
    %84 = arith.addf %79, %83 : vector<52x32xf32>
    %c16_83 = arith.constant 16 : index
    %c0_84 = arith.constant 0 : index
    %85 = tpu.strided_load %arg14[%c16_83, %c0_84] {strides = array<i32: 2, 1>} : memref<144x16xf32, #tpu.memory_space<vmem>>, vector<52x16xf32>
    %c3_85 = arith.constant 3 : index
    %c0_86 = arith.constant 0 : index
    %c0_87 = arith.constant 0 : index
    %86 = vector.load %arg8[%c3_85, %c0_86, %c0_87] : memref<9x16x32xf32, #tpu.memory_space<vmem>>, vector<1x16x32xf32>
    %87 = vector.shape_cast %86 : vector<1x16x32xf32> to vector<16x32xf32>
    %cst_88 = arith.constant dense<0.000000e+00> : vector<52x32xf32>
    %88 = tpu.matmul %85, %87, %cst_88 {dimension_numbers = #tpu.dot_dimension_numbers<[1], [0], [0], [1], [0, 0, 1, 1], [], []>} : vector<52x16xf32>, vector<16x32xf32>, vector<52x32xf32> -> vector<52x32xf32>
    %89 = arith.addf %84, %88 : vector<52x32xf32>
    %c17_89 = arith.constant 17 : index
    %c0_90 = arith.constant 0 : index
    %90 = tpu.strided_load %arg14[%c17_89, %c0_90] {strides = array<i32: 2, 1>} : memref<144x16xf32, #tpu.memory_space<vmem>>, vector<52x16xf32>
    %c4_91 = arith.constant 4 : index
    %c0_92 = arith.constant 0 : index
    %c0_93 = arith.constant 0 : index
    %91 = vector.load %arg8[%c4_91, %c0_92, %c0_93] : memref<9x16x32xf32, #tpu.memory_space<vmem>>, vector<1x16x32xf32>
    %92 = vector.shape_cast %91 : vector<1x16x32xf32> to vector<16x32xf32>
    %cst_94 = arith.constant dense<0.000000e+00> : vector<52x32xf32>
    %93 = tpu.matmul %90, %92, %cst_94 {dimension_numbers = #tpu.dot_dimension_numbers<[1], [0], [0], [1], [0, 0, 1, 1], [], []>} : vector<52x16xf32>, vector<16x32xf32>, vector<52x32xf32> -> vector<52x32xf32>
    %94 = arith.addf %89, %93 : vector<52x32xf32>
    %c18_95 = arith.constant 18 : index
    %c0_96 = arith.constant 0 : index
    %95 = tpu.strided_load %arg14[%c18_95, %c0_96] {strides = array<i32: 2, 1>} : memref<144x16xf32, #tpu.memory_space<vmem>>, vector<52x16xf32>
    %c5_97 = arith.constant 5 : index
    %c0_98 = arith.constant 0 : index
    %c0_99 = arith.constant 0 : index
    %96 = vector.load %arg8[%c5_97, %c0_98, %c0_99] : memref<9x16x32xf32, #tpu.memory_space<vmem>>, vector<1x16x32xf32>
    %97 = vector.shape_cast %96 : vector<1x16x32xf32> to vector<16x32xf32>
    %cst_100 = arith.constant dense<0.000000e+00> : vector<52x32xf32>
    %98 = tpu.matmul %95, %97, %cst_100 {dimension_numbers = #tpu.dot_dimension_numbers<[1], [0], [0], [1], [0, 0, 1, 1], [], []>} : vector<52x16xf32>, vector<16x32xf32>, vector<52x32xf32> -> vector<52x32xf32>
    %99 = arith.addf %94, %98 : vector<52x32xf32>
    %c32_101 = arith.constant 32 : index
    %c0_102 = arith.constant 0 : index
    %100 = tpu.strided_load %arg14[%c32_101, %c0_102] {strides = array<i32: 2, 1>} : memref<144x16xf32, #tpu.memory_space<vmem>>, vector<52x16xf32>
    %c6_103 = arith.constant 6 : index
    %c0_104 = arith.constant 0 : index
    %c0_105 = arith.constant 0 : index
    %101 = vector.load %arg8[%c6_103, %c0_104, %c0_105] : memref<9x16x32xf32, #tpu.memory_space<vmem>>, vector<1x16x32xf32>
    %102 = vector.shape_cast %101 : vector<1x16x32xf32> to vector<16x32xf32>
    %cst_106 = arith.constant dense<0.000000e+00> : vector<52x32xf32>
    %103 = tpu.matmul %100, %102, %cst_106 {dimension_numbers = #tpu.dot_dimension_numbers<[1], [0], [0], [1], [0, 0, 1, 1], [], []>} : vector<52x16xf32>, vector<16x32xf32>, vector<52x32xf32> -> vector<52x32xf32>
    %104 = arith.addf %99, %103 : vector<52x32xf32>
    %c33_107 = arith.constant 33 : index
    %c0_108 = arith.constant 0 : index
    %105 = tpu.strided_load %arg14[%c33_107, %c0_108] {strides = array<i32: 2, 1>} : memref<144x16xf32, #tpu.memory_space<vmem>>, vector<52x16xf32>
    %c7_109 = arith.constant 7 : index
    %c0_110 = arith.constant 0 : index
    %c0_111 = arith.constant 0 : index
    %106 = vector.load %arg8[%c7_109, %c0_110, %c0_111] : memref<9x16x32xf32, #tpu.memory_space<vmem>>, vector<1x16x32xf32>
    %107 = vector.shape_cast %106 : vector<1x16x32xf32> to vector<16x32xf32>
    %cst_112 = arith.constant dense<0.000000e+00> : vector<52x32xf32>
    %108 = tpu.matmul %105, %107, %cst_112 {dimension_numbers = #tpu.dot_dimension_numbers<[1], [0], [0], [1], [0, 0, 1, 1], [], []>} : vector<52x16xf32>, vector<16x32xf32>, vector<52x32xf32> -> vector<52x32xf32>
    %109 = arith.addf %104, %108 : vector<52x32xf32>
    %c34_113 = arith.constant 34 : index
    %c0_114 = arith.constant 0 : index
    %110 = tpu.strided_load %arg14[%c34_113, %c0_114] {strides = array<i32: 2, 1>} : memref<144x16xf32, #tpu.memory_space<vmem>>, vector<52x16xf32>
    %c8_115 = arith.constant 8 : index
    %c0_116 = arith.constant 0 : index
    %c0_117 = arith.constant 0 : index
    %111 = vector.load %arg8[%c8_115, %c0_116, %c0_117] : memref<9x16x32xf32, #tpu.memory_space<vmem>>, vector<1x16x32xf32>
    %112 = vector.shape_cast %111 : vector<1x16x32xf32> to vector<16x32xf32>
    %cst_118 = arith.constant dense<0.000000e+00> : vector<52x32xf32>
    %113 = tpu.matmul %110, %112, %cst_118 {dimension_numbers = #tpu.dot_dimension_numbers<[1], [0], [0], [1], [0, 0, 1, 1], [], []>} : vector<52x16xf32>, vector<16x32xf32>, vector<52x32xf32> -> vector<52x32xf32>
    %114 = arith.addf %109, %113 : vector<52x32xf32>
    %c0_119 = arith.constant 0 : index
    %c0_120 = arith.constant 0 : index
    %115 = vector.load %arg9[%c0_119, %c0_120] : memref<1x32xf32, #tpu.memory_space<vmem>>, vector<1x32xf32>
    %116 = vector.broadcast %115 : vector<1x32xf32> to vector<52x32xf32>
    %117 = arith.addf %114, %116 : vector<52x32xf32>
    %cst_121 = arith.constant 0.000000e+00 : f32
    %118 = vector.broadcast %cst_121 : f32 to vector<52x32xf32>
    %119 = arith.maximumf %117, %118 : vector<52x32xf32>
    %c0_122 = arith.constant 0 : index
    %c0_123 = arith.constant 0 : index
    %120 = vector.load %arg11[%c0_122, %c0_123] : memref<1x16xf32, #tpu.memory_space<vmem>>, vector<1x16xf32>
    %121 = vector.extract_strided_slice %119 {offsets = [0, 0], sizes = [1, 32], strides = [1, 1]} : vector<52x32xf32> to vector<1x32xf32>
    %c0_124 = arith.constant 0 : index
    %c0_125 = arith.constant 0 : index
    %c0_126 = arith.constant 0 : index
    %122 = vector.load %arg10[%c0_124, %c0_125, %c0_126] : memref<16x32x16xf32, #tpu.memory_space<vmem>>, vector<1x32x16xf32>
    %123 = vector.shape_cast %122 : vector<1x32x16xf32> to vector<32x16xf32>
    %cst_127 = arith.constant dense<0.000000e+00> : vector<1x16xf32>
    %124 = tpu.matmul %121, %123, %cst_127 {dimension_numbers = #tpu.dot_dimension_numbers<[1], [0], [0], [1], [0, 0, 1, 1], [], []>} : vector<1x32xf32>, vector<32x16xf32>, vector<1x16xf32> -> vector<1x16xf32>
    %125 = arith.addf %120, %124 : vector<1x16xf32>
    %126 = vector.extract_strided_slice %119 {offsets = [1, 0], sizes = [1, 32], strides = [1, 1]} : vector<52x32xf32> to vector<1x32xf32>
    %c1_128 = arith.constant 1 : index
    %c0_129 = arith.constant 0 : index
    %c0_130 = arith.constant 0 : index
    %127 = vector.load %arg10[%c1_128, %c0_129, %c0_130] : memref<16x32x16xf32, #tpu.memory_space<vmem>>, vector<1x32x16xf32>
    %128 = vector.shape_cast %127 : vector<1x32x16xf32> to vector<32x16xf32>
    %cst_131 = arith.constant dense<0.000000e+00> : vector<1x16xf32>
    %129 = tpu.matmul %126, %128, %cst_131 {dimension_numbers = #tpu.dot_dimension_numbers<[1], [0], [0], [1], [0, 0, 1, 1], [], []>} : vector<1x32xf32>, vector<32x16xf32>, vector<1x16xf32> -> vector<1x16xf32>
    %130 = arith.addf %125, %129 : vector<1x16xf32>
    %131 = vector.extract_strided_slice %119 {offsets = [2, 0], sizes = [1, 32], strides = [1, 1]} : vector<52x32xf32> to vector<1x32xf32>
    %c2_132 = arith.constant 2 : index
    %c0_133 = arith.constant 0 : index
    %c0_134 = arith.constant 0 : index
    %132 = vector.load %arg10[%c2_132, %c0_133, %c0_134] : memref<16x32x16xf32, #tpu.memory_space<vmem>>, vector<1x32x16xf32>
    %133 = vector.shape_cast %132 : vector<1x32x16xf32> to vector<32x16xf32>
    %cst_135 = arith.constant dense<0.000000e+00> : vector<1x16xf32>
    %134 = tpu.matmul %131, %133, %cst_135 {dimension_numbers = #tpu.dot_dimension_numbers<[1], [0], [0], [1], [0, 0, 1, 1], [], []>} : vector<1x32xf32>, vector<32x16xf32>, vector<1x16xf32> -> vector<1x16xf32>
    %135 = arith.addf %130, %134 : vector<1x16xf32>
    %136 = vector.extract_strided_slice %119 {offsets = [3, 0], sizes = [1, 32], strides = [1, 1]} : vector<52x32xf32> to vector<1x32xf32>
    %c3_136 = arith.constant 3 : index
    %c0_137 = arith.constant 0 : index
    %c0_138 = arith.constant 0 : index
    %137 = vector.load %arg10[%c3_136, %c0_137, %c0_138] : memref<16x32x16xf32, #tpu.memory_space<vmem>>, vector<1x32x16xf32>
    %138 = vector.shape_cast %137 : vector<1x32x16xf32> to vector<32x16xf32>
    %cst_139 = arith.constant dense<0.000000e+00> : vector<1x16xf32>
    %139 = tpu.matmul %136, %138, %cst_139 {dimension_numbers = #tpu.dot_dimension_numbers<[1], [0], [0], [1], [0, 0, 1, 1], [], []>} : vector<1x32xf32>, vector<32x16xf32>, vector<1x16xf32> -> vector<1x16xf32>
    %140 = arith.addf %135, %139 : vector<1x16xf32>
    %141 = vector.extract_strided_slice %119 {offsets = [16, 0], sizes = [1, 32], strides = [1, 1]} : vector<52x32xf32> to vector<1x32xf32>
    %c4_140 = arith.constant 4 : index
    %c0_141 = arith.constant 0 : index
    %c0_142 = arith.constant 0 : index
    %142 = vector.load %arg10[%c4_140, %c0_141, %c0_142] : memref<16x32x16xf32, #tpu.memory_space<vmem>>, vector<1x32x16xf32>
    %143 = vector.shape_cast %142 : vector<1x32x16xf32> to vector<32x16xf32>
    %cst_143 = arith.constant dense<0.000000e+00> : vector<1x16xf32>
    %144 = tpu.matmul %141, %143, %cst_143 {dimension_numbers = #tpu.dot_dimension_numbers<[1], [0], [0], [1], [0, 0, 1, 1], [], []>} : vector<1x32xf32>, vector<32x16xf32>, vector<1x16xf32> -> vector<1x16xf32>
    %145 = arith.addf %140, %144 : vector<1x16xf32>
    %146 = vector.extract_strided_slice %119 {offsets = [17, 0], sizes = [1, 32], strides = [1, 1]} : vector<52x32xf32> to vector<1x32xf32>
    %c5_144 = arith.constant 5 : index
    %c0_145 = arith.constant 0 : index
    %c0_146 = arith.constant 0 : index
    %147 = vector.load %arg10[%c5_144, %c0_145, %c0_146] : memref<16x32x16xf32, #tpu.memory_space<vmem>>, vector<1x32x16xf32>
    %148 = vector.shape_cast %147 : vector<1x32x16xf32> to vector<32x16xf32>
    %cst_147 = arith.constant dense<0.000000e+00> : vector<1x16xf32>
    %149 = tpu.matmul %146, %148, %cst_147 {dimension_numbers = #tpu.dot_dimension_numbers<[1], [0], [0], [1], [0, 0, 1, 1], [], []>} : vector<1x32xf32>, vector<32x16xf32>, vector<1x16xf32> -> vector<1x16xf32>
    %150 = arith.addf %145, %149 : vector<1x16xf32>
    %151 = vector.extract_strided_slice %119 {offsets = [18, 0], sizes = [1, 32], strides = [1, 1]} : vector<52x32xf32> to vector<1x32xf32>
    %c6_148 = arith.constant 6 : index
    %c0_149 = arith.constant 0 : index
    %c0_150 = arith.constant 0 : index
    %152 = vector.load %arg10[%c6_148, %c0_149, %c0_150] : memref<16x32x16xf32, #tpu.memory_space<vmem>>, vector<1x32x16xf32>
    %153 = vector.shape_cast %152 : vector<1x32x16xf32> to vector<32x16xf32>
    %cst_151 = arith.constant dense<0.000000e+00> : vector<1x16xf32>
    %154 = tpu.matmul %151, %153, %cst_151 {dimension_numbers = #tpu.dot_dimension_numbers<[1], [0], [0], [1], [0, 0, 1, 1], [], []>} : vector<1x32xf32>, vector<32x16xf32>, vector<1x16xf32> -> vector<1x16xf32>
    %155 = arith.addf %150, %154 : vector<1x16xf32>
    %156 = vector.extract_strided_slice %119 {offsets = [19, 0], sizes = [1, 32], strides = [1, 1]} : vector<52x32xf32> to vector<1x32xf32>
    %c7_152 = arith.constant 7 : index
    %c0_153 = arith.constant 0 : index
    %c0_154 = arith.constant 0 : index
    %157 = vector.load %arg10[%c7_152, %c0_153, %c0_154] : memref<16x32x16xf32, #tpu.memory_space<vmem>>, vector<1x32x16xf32>
    %158 = vector.shape_cast %157 : vector<1x32x16xf32> to vector<32x16xf32>
    %cst_155 = arith.constant dense<0.000000e+00> : vector<1x16xf32>
    %159 = tpu.matmul %156, %158, %cst_155 {dimension_numbers = #tpu.dot_dimension_numbers<[1], [0], [0], [1], [0, 0, 1, 1], [], []>} : vector<1x32xf32>, vector<32x16xf32>, vector<1x16xf32> -> vector<1x16xf32>
    %160 = arith.addf %155, %159 : vector<1x16xf32>
    %161 = vector.extract_strided_slice %119 {offsets = [32, 0], sizes = [1, 32], strides = [1, 1]} : vector<52x32xf32> to vector<1x32xf32>
    %c8_156 = arith.constant 8 : index
    %c0_157 = arith.constant 0 : index
    %c0_158 = arith.constant 0 : index
    %162 = vector.load %arg10[%c8_156, %c0_157, %c0_158] : memref<16x32x16xf32, #tpu.memory_space<vmem>>, vector<1x32x16xf32>
    %163 = vector.shape_cast %162 : vector<1x32x16xf32> to vector<32x16xf32>
    %cst_159 = arith.constant dense<0.000000e+00> : vector<1x16xf32>
    %164 = tpu.matmul %161, %163, %cst_159 {dimension_numbers = #tpu.dot_dimension_numbers<[1], [0], [0], [1], [0, 0, 1, 1], [], []>} : vector<1x32xf32>, vector<32x16xf32>, vector<1x16xf32> -> vector<1x16xf32>
    %165 = arith.addf %160, %164 : vector<1x16xf32>
    %166 = vector.extract_strided_slice %119 {offsets = [33, 0], sizes = [1, 32], strides = [1, 1]} : vector<52x32xf32> to vector<1x32xf32>
    %c9 = arith.constant 9 : index
    %c0_160 = arith.constant 0 : index
    %c0_161 = arith.constant 0 : index
    %167 = vector.load %arg10[%c9, %c0_160, %c0_161] : memref<16x32x16xf32, #tpu.memory_space<vmem>>, vector<1x32x16xf32>
    %168 = vector.shape_cast %167 : vector<1x32x16xf32> to vector<32x16xf32>
    %cst_162 = arith.constant dense<0.000000e+00> : vector<1x16xf32>
    %169 = tpu.matmul %166, %168, %cst_162 {dimension_numbers = #tpu.dot_dimension_numbers<[1], [0], [0], [1], [0, 0, 1, 1], [], []>} : vector<1x32xf32>, vector<32x16xf32>, vector<1x16xf32> -> vector<1x16xf32>
    %170 = arith.addf %165, %169 : vector<1x16xf32>
    %171 = vector.extract_strided_slice %119 {offsets = [34, 0], sizes = [1, 32], strides = [1, 1]} : vector<52x32xf32> to vector<1x32xf32>
    %c10 = arith.constant 10 : index
    %c0_163 = arith.constant 0 : index
    %c0_164 = arith.constant 0 : index
    %172 = vector.load %arg10[%c10, %c0_163, %c0_164] : memref<16x32x16xf32, #tpu.memory_space<vmem>>, vector<1x32x16xf32>
    %173 = vector.shape_cast %172 : vector<1x32x16xf32> to vector<32x16xf32>
    %cst_165 = arith.constant dense<0.000000e+00> : vector<1x16xf32>
    %174 = tpu.matmul %171, %173, %cst_165 {dimension_numbers = #tpu.dot_dimension_numbers<[1], [0], [0], [1], [0, 0, 1, 1], [], []>} : vector<1x32xf32>, vector<32x16xf32>, vector<1x16xf32> -> vector<1x16xf32>
    %175 = arith.addf %170, %174 : vector<1x16xf32>
    %176 = vector.extract_strided_slice %119 {offsets = [35, 0], sizes = [1, 32], strides = [1, 1]} : vector<52x32xf32> to vector<1x32xf32>
    %c11 = arith.constant 11 : index
    %c0_166 = arith.constant 0 : index
    %c0_167 = arith.constant 0 : index
    %177 = vector.load %arg10[%c11, %c0_166, %c0_167] : memref<16x32x16xf32, #tpu.memory_space<vmem>>, vector<1x32x16xf32>
    %178 = vector.shape_cast %177 : vector<1x32x16xf32> to vector<32x16xf32>
    %cst_168 = arith.constant dense<0.000000e+00> : vector<1x16xf32>
    %179 = tpu.matmul %176, %178, %cst_168 {dimension_numbers = #tpu.dot_dimension_numbers<[1], [0], [0], [1], [0, 0, 1, 1], [], []>} : vector<1x32xf32>, vector<32x16xf32>, vector<1x16xf32> -> vector<1x16xf32>
    %180 = arith.addf %175, %179 : vector<1x16xf32>
    %181 = vector.extract_strided_slice %119 {offsets = [48, 0], sizes = [1, 32], strides = [1, 1]} : vector<52x32xf32> to vector<1x32xf32>
    %c12 = arith.constant 12 : index
    %c0_169 = arith.constant 0 : index
    %c0_170 = arith.constant 0 : index
    %182 = vector.load %arg10[%c12, %c0_169, %c0_170] : memref<16x32x16xf32, #tpu.memory_space<vmem>>, vector<1x32x16xf32>
    %183 = vector.shape_cast %182 : vector<1x32x16xf32> to vector<32x16xf32>
    %cst_171 = arith.constant dense<0.000000e+00> : vector<1x16xf32>
    %184 = tpu.matmul %181, %183, %cst_171 {dimension_numbers = #tpu.dot_dimension_numbers<[1], [0], [0], [1], [0, 0, 1, 1], [], []>} : vector<1x32xf32>, vector<32x16xf32>, vector<1x16xf32> -> vector<1x16xf32>
    %185 = arith.addf %180, %184 : vector<1x16xf32>
    %186 = vector.extract_strided_slice %119 {offsets = [49, 0], sizes = [1, 32], strides = [1, 1]} : vector<52x32xf32> to vector<1x32xf32>
    %c13 = arith.constant 13 : index
    %c0_172 = arith.constant 0 : index
    %c0_173 = arith.constant 0 : index
    %187 = vector.load %arg10[%c13, %c0_172, %c0_173] : memref<16x32x16xf32, #tpu.memory_space<vmem>>, vector<1x32x16xf32>
    %188 = vector.shape_cast %187 : vector<1x32x16xf32> to vector<32x16xf32>
    %cst_174 = arith.constant dense<0.000000e+00> : vector<1x16xf32>
    %189 = tpu.matmul %186, %188, %cst_174 {dimension_numbers = #tpu.dot_dimension_numbers<[1], [0], [0], [1], [0, 0, 1, 1], [], []>} : vector<1x32xf32>, vector<32x16xf32>, vector<1x16xf32> -> vector<1x16xf32>
    %190 = arith.addf %185, %189 : vector<1x16xf32>
    %191 = vector.extract_strided_slice %119 {offsets = [50, 0], sizes = [1, 32], strides = [1, 1]} : vector<52x32xf32> to vector<1x32xf32>
    %c14 = arith.constant 14 : index
    %c0_175 = arith.constant 0 : index
    %c0_176 = arith.constant 0 : index
    %192 = vector.load %arg10[%c14, %c0_175, %c0_176] : memref<16x32x16xf32, #tpu.memory_space<vmem>>, vector<1x32x16xf32>
    %193 = vector.shape_cast %192 : vector<1x32x16xf32> to vector<32x16xf32>
    %cst_177 = arith.constant dense<0.000000e+00> : vector<1x16xf32>
    %194 = tpu.matmul %191, %193, %cst_177 {dimension_numbers = #tpu.dot_dimension_numbers<[1], [0], [0], [1], [0, 0, 1, 1], [], []>} : vector<1x32xf32>, vector<32x16xf32>, vector<1x16xf32> -> vector<1x16xf32>
    %195 = arith.addf %190, %194 : vector<1x16xf32>
    %196 = vector.extract_strided_slice %119 {offsets = [51, 0], sizes = [1, 32], strides = [1, 1]} : vector<52x32xf32> to vector<1x32xf32>
    %c15 = arith.constant 15 : index
    %c0_178 = arith.constant 0 : index
    %c0_179 = arith.constant 0 : index
    %197 = vector.load %arg10[%c15, %c0_178, %c0_179] : memref<16x32x16xf32, #tpu.memory_space<vmem>>, vector<1x32x16xf32>
    %198 = vector.shape_cast %197 : vector<1x32x16xf32> to vector<32x16xf32>
    %cst_180 = arith.constant dense<0.000000e+00> : vector<1x16xf32>
    %199 = tpu.matmul %196, %198, %cst_180 {dimension_numbers = #tpu.dot_dimension_numbers<[1], [0], [0], [1], [0, 0, 1, 1], [], []>} : vector<1x32xf32>, vector<32x16xf32>, vector<1x16xf32> -> vector<1x16xf32>
    %200 = arith.addf %195, %199 : vector<1x16xf32>
    %c0_181 = arith.constant 0 : index
    %c0_182 = arith.constant 0 : index
    %c0_183 = arith.constant 0 : index
    %201 = vector.load %arg12[%c0_181, %c0_182, %c0_183] : memref<1x1x16xf32, #tpu.memory_space<vmem>>, vector<1x1x16xf32>
    %202 = vector.shape_cast %201 : vector<1x1x16xf32> to vector<1x16xf32>
    %203 = vector.shape_cast %200 : vector<1x16xf32> to vector<1x1x16xf32>
    tpu.vector_store %arg12[%c0_181, %c0_182, %c0_183], %203 {strides = array<i32>} : memref<1x1x16xf32, #tpu.memory_space<vmem>>, vector<1x1x16xf32>,
    return
  }
  func.func @transform_0(%arg0: i32) -> (i32, i32) {
    %c0_i32 = arith.constant 0 : i32
    %c0_i32_0 = arith.constant 0 : i32
    return %arg0, %c0_i32 : i32, i32
  }
  func.func @transform_1(%arg0: i32) -> (i32, i32) {
    %c0_i32 = arith.constant 0 : i32
    %c0_i32_0 = arith.constant 0 : i32
    %c0_i32_1 = arith.constant 0 : i32
    return %c0_i32, %c0_i32_0 : i32, i32
  }
  func.func @transform_2(%arg0: i32) -> (i32, i32) {
    %c0_i32 = arith.constant 0 : i32
    %c0_i32_0 = arith.constant 0 : i32
    %c0_i32_1 = arith.constant 0 : i32
    return %c0_i32, %c0_i32_0 : i32, i32
  }
  func.func @transform_3(%arg0: i32) -> (i32, i32) {
    %c0_i32 = arith.constant 0 : i32
    %c0_i32_0 = arith.constant 0 : i32
    %c0_i32_1 = arith.constant 0 : i32
    return %c0_i32, %c0_i32_0 : i32, i32
  }
  func.func @transform_4(%arg0: i32) -> (i32, i32, i32) {
    %c0_i32 = arith.constant 0 : i32
    %c0_i32_0 = arith.constant 0 : i32
    %c0_i32_1 = arith.constant 0 : i32
    %c0_i32_2 = arith.constant 0 : i32
    return %c0_i32, %c0_i32_0, %c0_i32_1 : i32, i32, i32
  }
  func.func @transform_5(%arg0: i32) -> (i32, i32) {
    %c0_i32 = arith.constant 0 : i32
    %c0_i32_0 = arith.constant 0 : i32
    %c0_i32_1 = arith.constant 0 : i32
    return %c0_i32, %c0_i32_0 : i32, i32
  }
  func.func @transform_6(%arg0: i32) -> (i32, i32) {
    %c0_i32 = arith.constant 0 : i32
    %c0_i32_0 = arith.constant 0 : i32
    %c0_i32_1 = arith.constant 0 : i32
    return %c0_i32, %c0_i32_0 : i32, i32
  }
  func.func @transform_7(%arg0: i32) -> (i32, i32, i32) {
    %c0_i32 = arith.constant 0 : i32
    %c0_i32_0 = arith.constant 0 : i32
    %c0_i32_1 = arith.constant 0 : i32
    %c0_i32_2 = arith.constant 0 : i32
    return %c0_i32, %c0_i32_0, %c0_i32_1 : i32, i32, i32
  }
  func.func @transform_8(%arg0: i32) -> (i32, i32) {
    %c0_i32 = arith.constant 0 : i32
    %c0_i32_0 = arith.constant 0 : i32
    %c0_i32_1 = arith.constant 0 : i32
    return %c0_i32, %c0_i32_0 : i32, i32
  }
  func.func @transform_9(%arg0: i32) -> (i32, i32, i32) {
    %c0_i32 = arith.constant 0 : i32
    %c0_i32_0 = arith.constant 0 : i32
    %c0_i32_1 = arith.constant 0 : i32
    %c0_i32_2 = arith.constant 0 : i32
    return %c0_i32, %c0_i32_0, %c0_i32_1 : i32, i32, i32
  }
  func.func @transform_10(%arg0: i32) -> (i32, i32) {
    %c0_i32 = arith.constant 0 : i32
    %c0_i32_0 = arith.constant 0 : i32
    %c0_i32_1 = arith.constant 0 : i32
    return %c0_i32, %c0_i32_0 : i32, i32
  }
  func.func @transform_11(%arg0: i32) -> (i32, i32, i32) {
    %c0_i32 = arith.constant 0 : i32
    %c0_i32_0 = arith.constant 0 : i32
    %c0_i32_1 = arith.constant 0 : i32
    return %arg0, %c0_i32, %c0_i32_0 : i32, i32, i32
  }
}

</mosaic_0001>

<bundles_post_ra>
// kernel: encoder_forward.1
= control target key start
LH: loop header
LB: loop body
LE: loop exit
PB: predicated region body
PF: predicated region fallthrough
CT: control target
= control target key end

     0   :  { %s6974_s17 = smov 0   ;;  %s8581_s0 = inlined_call_operand.vmem [shape: f32[448,9], index: 0, kind: input, shape index: {}]   ;;  %s8582_s1 = inlined_call_operand.vmem [shape: f32[9,8], index: 1, kind: input, shape index: {}]   ;;  %s8583_s2 = inlined_call_operand.vmem [shape: f32[1,8], index: 2, kind: input, shape index: {}]   ;;  %s8584_s3 = inlined_call_operand.vmem [shape: f32[224,8], index: 3, kind: input, shape index: {}]   ;;  %s8585_s4 = inlined_call_operand.vmem [shape: f32[9,8,16], index: 4, kind: input, shape index: {}]   ;;  %s8586_s5 = inlined_call_operand.vmem [shape: f32[1,16], index: 5, kind: input, shape index: {}]   ;;  %s8587_s6 = inlined_call_operand.vmem [shape: f32[103,16], index: 6, kind: input, shape index: {}]   ;;  %s8588_s7 = inlined_call_operand.vmem [shape: f32[9,16,32], index: 7, kind: input, shape index: {}]   ;;  %s8589_s8 = inlined_call_operand.vmem [shape: f32[1,32], index: 8, kind: input, shape index: {}]   ;;  %s8590_s9 = inlined_call_operand.vmem [shape: f32[16,32,16], index: 9, kind: input, shape index: {}]   ;;  %s8591_s10 = inlined_call_operand.vmem [shape: f32[1,16], index: 10, kind: input, shape index: {}]   ;;  %s8592_s11 = inlined_call_operand.vmem [shape: f32[2,1,16], index: 11, kind: output, shape index: {}]  }
   0x1 LB: > { %s6980_s18 = sadd.s32 4294967295, %s6908_s17   ;;  %p5281_p0 = scmp.ge.s32.totalorder %s6908_s17, 1  ;;  %s6908_s17 = sphi %s6974_s17, %s21_s17  }
   0x2   : > { %p338_p1 = scmp.lt.s32.totalorder %s6908_s17, 3 }
   0x4   : > { %p339_p2 = pnand %p5281_p0, %p338_p1 }
   0x6   : > { %342 = sbr.rel (%p339_p2) target bundleno = 1416 (0x588), region = 64 }
   0xd   : > { %v465_v0 = vld [vmem:[%s8582_s1] sm:$0xff]  ;;  %v466_v1 = vld [vmem:[%s8582_s1 + $0x8] sm:$0x1]  ;;  %vm559_vm0 = vcmask 1040384   ;;  %s376_s23 = smul.u32 28, %s6980_s18  ;;  %vm6910_vm1 = vmmov 1  }
   0xe   : > { %v6730_v2 = vpack.c.bf16 %v466_v1, %v465_v0  ;;  %vm6991_vm2 = vmpackc.low %vm559_vm0, %vm6910_vm1  ;;  %vm385_vm3 = vcmask 64512   ;;  %v8593_v4 = vmov 0.0   ;;  %vm474_vm4 = vcmask 72704   ;;  %v5313_v33 = vld [vmem:[%s8585_s4 + $0x8] sm:$0xff]  ;;  %v5368_v35 = vld [vmem:[%s8585_s4 + $0x20] sm:$0xff]  ;;  %p382_p4 = scmp.lt.s32.totalorder %s6980_s18, 1 }
   0xf   : > { %p6997_p3 = scmp.lt.s32.totalorder %s376_s23, 55  ;;  %389 = vst.msk [vmem:[#allocation2 + $0x18] sm:$0xff] %vm385_vm3, %v8593_v4  ;;  %390 = vst.msk [vmem:[#allocation2 + $0x20] sm:$0xff] %vm385_vm3, %v8593_v4  ;;  %5960 = vmatprep.subr.mxu1 %v8593_v4  ;;  %vm6912_vm5 = vmmov 0   ;;  %v905_v36 = vld [vmem:[%s8585_s4] sm:$0xff]  ;;  %v797_v41 = vld [vmem:[%s8584_s3 + $0x8] sm:$0xff] }
  0x10   : > { %386 = vst.msk [vmem:[#allocation2] sm:$0xff] %vm385_vm3, %v8593_v4  ;;  %387 = vst.msk [vmem:[#allocation2 + $0x8] sm:$0xff] %vm385_vm3, %v8593_v4  ;;  %6732 = vmatprep.subr.msk.bf16.mxu0 %vm6991_vm2, %v6730_v2  ;;  %5961 = vmatpush3.msra.mxu1 %v5313_v33  ;;  %v7154_v37 = vld [vmem:[%s8583_s2] ss:$0 sm:$0xff]  ;;  %v799_v51 = vld [vmem:[%s8584_s3 + $0x18] sm:$0xff]  ;;  %vm418_vm6 = vcmask 130048  }
  0x11   : > { %388 = vst.msk [vmem:[#allocation2 + $0x10] sm:$0xff] %vm385_vm3, %v8593_v4  ;;  %391 = vst.msk [vmem:[#allocation2 + $0x28] sm:$0xff] %vm385_vm3, %v8593_v4  ;;  %6735 = vmatpush3.bf16.msk.msra.mxu0 %vm6991_vm2, %v6730_v2  ;;  %s8611_s23 = smov (!%p6997_p3, %s376_s23), 55  ;;  %5962 = vmatprep.mubr.msk.f32.mxu1 %vm6912_vm5, %v8593_v4  ;;  %v796_v44 = vld [vmem:[%s8584_s3] sm:$0xff]  ;;  %v798_v54 = vld [vmem:[%s8584_s3 + $0x10] sm:$0xff]  ;;  %vm2741_vm7 = vcmask 129024  }
  0x12   : > { %392 = vst.msk [vmem:[#allocation2 + $0x30] sm:$0xff] %vm385_vm3, %v8593_v4  ;;  %393 = vst.msk [vmem:[#allocation2 + $0x38] sm:$0xff] %vm385_vm3, %v8593_v4  ;;  %6124 = vmatprep.subr.mxu0 %v8593_v4  ;;  %s5282_s25 = sshll.u32 %s8611_s23, 3  ;;  %6001 = vmatprep.subr.mxu1 %v8593_v4  ;;  %v801_v61 = vld [vmem:[%s8584_s3 + $0x28] sm:$0xff]  ;;  %v800_v0 = vld [vmem:[%s8584_s3 + $0x20] sm:$0xff]  ;;  %vm3968_vm8 = vcmask 261120  }
  0x13   : > { %394 = vst.msk [vmem:[#allocation2 + $0x40] sm:$0xff] %vm385_vm3, %v8593_v4  ;;  %395 = vst.msk [vmem:[#allocation2 + $0x48] sm:$0xff] %vm385_vm3, %v8593_v4  ;;  %s7074_s28 = scalar_lea.vmem %s8581_s0, %s5282_s25  ;;  %v807_v33 = vld [vmem:[%s8584_s3 + $0x58] sm:$0xff]  ;;  %s8613_s18 = smov (!%p382_p4, %s6980_s18), 1  ;;  %vm5228_vm9 = vcmask 122880  }
  0x14   : > { %396 = vst.msk [vmem:[#allocation2 + $0x50] sm:$0xff] %vm385_vm3, %v8593_v4  ;;  %397 = vst.msk [vmem:[#allocation2 + $0x58] sm:$0xff] %vm385_vm3, %v8593_v4  ;;  %v437_v5 = vld [vmem:[%s7074_s28] sm:$0xff]  ;;  %v438_v6 = vld [vmem:[%s7074_s28 + $0x8] sm:$0xff]  ;;  %s384_s12 = scalar_lea.vmem %s8592_s11, %s8613_s18 }
  0x15   : > { %398 = vst.msk [vmem:[#allocation2 + $0x60] sm:$0xff] %vm385_vm3, %v8593_v4  ;;  %399 = vst.msk [vmem:[#allocation2 + $0x68] sm:$0xff] %vm385_vm3, %v8593_v4  ;;  %v439_v7 = vld [vmem:[%s7074_s28 + $0x10] sm:$0xff]  ;;  %5918 = vmatprep.mubr.msk.f32.mxu0 %vm474_vm4, %v437_v5  ;;  %v440_v8 = vld [vmem:[%s7074_s28 + $0x18] sm:$0xff] }
  0x16   : > { %400 = vst.msk [vmem:[#allocation2 + $0x70] sm:$0xff] %vm385_vm3, %v8593_v4  ;;  %401 = vst.msk [vmem:[#allocation2 + $0x78] sm:$0xff] %vm385_vm3, %v8593_v4  ;;  %5919 = vmatmul.mubr.msk.f32.vlgmr.msra.gmra.mrb[0].mxu0 %vm474_vm4, %v438_v6  ;;  %v441_v9 = vld [vmem:[%s7074_s28 + $0x20] sm:$0xff]  ;;  %v442_v10 = vld [vmem:[%s7074_s28 + $0x28] sm:$0xff] }
  0x17   : > { %402 = vst.msk [vmem:[#allocation2 + $0x80] sm:$0xff] %vm385_vm3, %v8593_v4  ;;  %403 = vst.msk [vmem:[#allocation2 + $0x88] sm:$0xff] %vm385_vm3, %v8593_v4  ;;  %5921 = vmatprep.mubr.msk.f32.mxu0 %vm474_vm4, %v439_v7  ;;  %v443_v11 = vld [vmem:[%s7074_s28 + $0x30] sm:$0xff]  ;;  %v444_v12 = vld [vmem:[%s7074_s28 + $0x38] sm:$0xff]  ;;  %6125 = vmatpush3.msra.mxu0 %v5368_v35 }
  0x18   : > { %404 = vst.msk [vmem:[#allocation2 + $0x90] sm:$0xff] %vm385_vm3, %v8593_v4  ;;  %405 = vst.msk [vmem:[#allocation2 + $0x98] sm:$0xff] %vm385_vm3, %v8593_v4  ;;  %v445_v13 = vld [vmem:[%s7074_s28 + $0x40] sm:$0xff]  ;;  %v446_v14 = vld [vmem:[%s7074_s28 + $0x48] sm:$0xff]  ;;  %6206 = vmatprep.subr.mxu0 %v8593_v4 }
  0x19   : > { %406 = vst.msk [vmem:[#allocation2 + $0xa0] sm:$0xff] %vm385_vm3, %v8593_v4  ;;  %407 = vst.msk [vmem:[#allocation2 + $0xa8] sm:$0xff] %vm385_vm3, %v8593_v4  ;;  %v447_v15 = vld [vmem:[%s7074_s28 + $0x50] sm:$0xff]  ;;  %v448_v16 = vld [vmem:[%s7074_s28 + $0x58] sm:$0xff] }
  0x1a   : > { %408 = vst.msk [vmem:[#allocation2 + $0xb0] sm:$0xff] %vm385_vm3, %v8593_v4  ;;  %409 = vst.msk [vmem:[#allocation2 + $0xb8] sm:$0xff] %vm385_vm3, %v8593_v4  ;;  %5922 = vmatmul.mubr.msk.f32.gmra.mrb[2].mxu0 %vm474_vm4, %v440_v8  ;;  %v449_v17 = vld [vmem:[%s7074_s28 + $0x60] sm:$0xff]  ;;  %v450_v18 = vld [vmem:[%s7074_s28 + $0x68] sm:$0xff] }
  0x1b   : > { %410 = vst.msk [vmem:[#allocation2 + $0xc0] sm:$0xff] %vm385_vm3, %v8593_v4  ;;  %411 = vst.msk [vmem:[#allocation2 + $0xc8] sm:$0xff] %vm385_vm3, %v8593_v4  ;;  %5924 = vmatprep.mubr.msk.f32.mxu0 %vm474_vm4, %v441_v9  ;;  %v451_v19 = vld [vmem:[%s7074_s28 + $0x70] sm:$0xff]  ;;  %v452_v20 = vld [vmem:[%s7074_s28 + $0x78] sm:$0xff] }
  0x1c   : > { %412 = vst.msk [vmem:[#allocation2 + $0xd0] sm:$0xff] %vm385_vm3, %v8593_v4  ;;  %413 = vst.msk [vmem:[#allocation2 + $0xd8] sm:$0xff] %vm385_vm3, %v8593_v4  ;;  %v453_v21 = vld [vmem:[%s7074_s28 + $0x80] sm:$0xff]  ;;  %v454_v22 = vld [vmem:[%s7074_s28 + $0x88] sm:$0xff] }
  0x1d   : > { %414 = vst.msk [vmem:[#allocation2 + $0xe0] sm:$0xff] %vm385_vm3, %v8593_v4  ;;  %415 = vst.msk [vmem:[#allocation2 + $0xe8] sm:$0xff] %vm385_vm3, %v8593_v4  ;;  %v455_v23 = vld [vmem:[%s7074_s28 + $0x90] sm:$0xff]  ;;  %v456_v24 = vld [vmem:[%s7074_s28 + $0x98] sm:$0xff] }
  0x1e   : > { %5925 = vmatmul.mubr.msk.f32.gmra.mrb[4].mxu0 %vm474_vm4, %v442_v10  ;;  %v457_v25 = vld [vmem:[%s7074_s28 + $0xa0] sm:$0xff]  ;;  %v458_v26 = vld [vmem:[%s7074_s28 + $0xa8] sm:$0xff]  ;;  %v459_v27 = vld [vmem:[%s7074_s28 + $0xb0] sm:$0xff]  ;;  %421 = vst.msk [vmem:[#allocation3 + $0x10] sm:$0xff] %vm418_vm6, %v8593_v4 }
  0x1f   : > { %5927 = vmatprep.mubr.msk.f32.mxu0 %vm474_vm4, %v443_v11  ;;  %v460_v28 = vld [vmem:[%s7074_s28 + $0xb8] sm:$0xff]  ;;  %v461_v29 = vld [vmem:[%s7074_s28 + $0xc0] sm:$0xff]  ;;  %v462_v30 = vld [vmem:[%s7074_s28 + $0xc8] sm:$0xff]  ;;  %422 = vst.msk [vmem:[#allocation3 + $0x18] sm:$0xff] %vm418_vm6, %v8593_v4 }
  0x20   : > { %v463_v31 = vld [vmem:[%s7074_s28 + $0xd0] sm:$0xff]  ;;  %v464_v32 = vld [vmem:[%s7074_s28 + $0xd8] sm:$0xff]  ;;  %v907_v34 = vld [vmem:[#allocation2 + $0x1] ss:$2 sm:$0xff]  ;;  %419 = vst.msk [vmem:[#allocation3] sm:$0xff] %vm418_vm6, %v8593_v4 }
  0x21   : > { %5963 = vmatmul.mubr.msk.f32.vlgmr.msra.gmra.mrb[0].mxu1 %vm385_vm3, %v907_v34  ;;  %v803_v8 = vld [vmem:[%s8584_s3 + $0x38] sm:$0xff]  ;;  %v802_v10 = vld [vmem:[%s8584_s3 + $0x30] sm:$0xff]  ;;  %420 = vst.msk [vmem:[#allocation3 + $0x8] sm:$0xff] %vm418_vm6, %v8593_v4  ;;  %423 = vst.msk [vmem:[#allocation3 + $0x20] sm:$0xff] %vm418_vm6, %v8593_v4 }
  0x22   : > { %5928 = vmatmul.mubr.msk.f32.gmra.mrb[6].mxu0 %vm474_vm4, %v444_v12  ;;  %5965 = vmatprep.mubr.msk.f32.mxu1 %vm6912_vm5, %v8593_v4  ;;  %424 = vst.msk [vmem:[#allocation3 + $0x28] sm:$0xff] %vm418_vm6, %v8593_v4  ;;  %425 = vst.msk [vmem:[#allocation3 + $0x30] sm:$0xff] %vm418_vm6, %v8593_v4 }
  0x23   : > { %5930 = vmatprep.mubr.msk.f32.mxu0 %vm474_vm4, %v445_v13  ;;  %6002 = vmatpush3.msra.mxu1 %v905_v36  ;;  %v806_v36 = vld [vmem:[%s8584_s3 + $0x50] sm:$0xff]  ;;  %426 = vst.msk [vmem:[#allocation3 + $0x38] sm:$0xff] %vm418_vm6, %v8593_v4  ;;  %427 = vst.msk [vmem:[#allocation3 + $0x40] sm:$0xff] %vm418_vm6, %v8593_v4 }
  0x24   : > { %6042 = vmatprep.subr.mxu1 %v8593_v4  ;;  %428 = vst.msk [vmem:[#allocation3 + $0x48] sm:$0xff] %vm418_vm6, %v8593_v4  ;;  %429 = vst.msk [vmem:[#allocation3 + $0x50] sm:$0xff] %vm418_vm6, %v8593_v4 }
  0x25   : > { %430 = vst.msk [vmem:[#allocation3 + $0x58] sm:$0xff] %vm418_vm6, %v8593_v4  ;;  %431 = vst.msk [vmem:[#allocation3 + $0x60] sm:$0xff] %vm418_vm6, %v8593_v4 }
  0x26   : > { %5931 = vmatmul.mubr.msk.f32.gmra.mrb[8].mxu0 %vm474_vm4, %v446_v14  ;;  %v5396_v14 = vld [vmem:[%s8585_s4 + $0x30] sm:$0xff]  ;;  %432 = vst.msk [vmem:[#allocation3 + $0x68] sm:$0xff] %vm418_vm6, %v8593_v4  ;;  %433 = vst.msk [vmem:[#allocation3 + $0x70] sm:$0xff] %vm418_vm6, %v8593_v4 }
  0x27   : > { %5933 = vmatprep.mubr.msk.f32.mxu0 %vm474_vm4, %v447_v15  ;;  %434 = vst.msk [vmem:[#allocation3 + $0x78] sm:$0xff] %vm418_vm6, %v8593_v4  ;;  %435 = vst.msk [vmem:[#allocation3 + $0x80] sm:$0xff] %vm418_vm6, %v8593_v4 }
  0x28   : > { %436 = vst.msk [vmem:[#allocation3 + $0x88] sm:$0xff] %vm418_vm6, %v8593_v4 }
  0x2a   : > { %5934 = vmatmul.mubr.msk.f32.gmra.mrb[10].mxu0 %vm474_vm4, %v448_v16 }
  0x2b   : > { %5936 = vmatprep.mubr.msk.f32.mxu0 %vm474_vm4, %v449_v17 }
  0x2e   : > { %5937 = vmatmul.mubr.msk.f32.gmra.mrb[12].mxu0 %vm474_vm4, %v450_v18 }
  0x2f   : > { %5939 = vmatprep.mubr.msk.f32.mxu0 %vm474_vm4, %v451_v19 }
  0x32   : > { %5940 = vmatmul.mubr.msk.f32.gmra.mrb[14].mxu0 %vm474_vm4, %v452_v20 }
  0x33   : > { %5942 = vmatprep.mubr.msk.f32.mxu0 %vm474_vm4, %v453_v21  ;;  %v805_v21 = vld [vmem:[%s8584_s3 + $0x48] sm:$0xff] }
  0x36   : > { %5943 = vmatmul.mubr.msk.f32.gmra.mrb[16].mxu0 %vm474_vm4, %v454_v22 }
  0x37   : > { %5945 = vmatprep.mubr.msk.f32.mxu0 %vm474_vm4, %v455_v23 }
  0x3a   : > { %5946 = vmatmul.mubr.msk.f32.gmra.mrb[18].mxu0 %vm474_vm4, %v456_v24  ;;  %v804_v24 = vld [vmem:[%s8584_s3 + $0x40] sm:$0xff] }
  0x3b   : > { %5948 = vmatprep.mubr.msk.f32.mxu0 %vm474_vm4, %v457_v25 }
  0x3e   : > { %5949 = vmatmul.mubr.msk.f32.gmra.mrb[20].mxu0 %vm474_vm4, %v458_v26 }
  0x3f   : > { %5951 = vmatprep.mubr.msk.f32.mxu0 %vm474_vm4, %v459_v27 }
  0x42   : > { %5952 = vmatmul.mubr.msk.f32.gmra.mrb[22].mxu0 %vm474_vm4, %v460_v28 }
  0x43   : > { %5954 = vmatprep.mubr.msk.f32.mxu0 %vm474_vm4, %v461_v29 }
  0x46   : > { %5955 = vmatmul.mubr.msk.f32.gmra.mrb[24].mxu0 %vm474_vm4, %v462_v30 }
  0x47   : > { %5957 = vmatprep.mubr.msk.f32.mxu0 %vm474_vm4, %v463_v31 }
  0x4a   : > { %5958 = vmatmul.mubr.msk.f32.gmra.mrb[26].mxu0 %vm474_vm4, %v464_v32 }
  0x4b   : > { %6126 = vmatprep.mubr.msk.f32.mxu0 %vm6912_vm5, %v8593_v4 }
  0xe9   : > { %v5920_v38 = vpop.f32.mrb[0].mxu0 }
  0xea   : > { %v635_v39 = vadd.f32 %v5920_v38, %v7154_v37  ;;  %v629_v40 = vpop.f32.mrb[1].mxu0 }
  0xeb   : > { %v630_v42 = vadd.f32 %v7154_v37, %v629_v40 }
  0xec   : > { %v769_v43 = vmax.f32 %v635_v39, 0.0 }
  0xed   : > { %v768_v45 = vmax.f32 %v630_v42, 0.0  ;;  %v5923_v46 = vpop.f32.mrb[2].mxu0 }
  0xee   : > { %v825_v47 = vmul.f32 %v797_v41, %v769_v43  ;;  %v645_v48 = vadd.f32 %v5923_v46, %v7154_v37  ;;  %v639_v49 = vpop.f32.mrb[3].mxu0  ;;  %v809_v46 = vld [vmem:[%s8584_s3 + $0x68] sm:$0xff] }
  0xef   : > { %v824_v50 = vmul.f32 %v796_v44, %v768_v45  ;;  %v640_v52 = vadd.f32 %v7154_v37, %v639_v49  ;;  %v808_v49 = vld [vmem:[%s8584_s3 + $0x60] sm:$0xff] }
  0xf0   : > { %853 = vst.msk [vmem:[#allocation2 + $0x19] sm:$0xff] %vm385_vm3, %v825_v47  ;;  %v771_v53 = vmax.f32 %v645_v48, 0.0 }
  0xf1   : > { %852 = vst.msk [vmem:[#allocation2 + $0x11] sm:$0xff] %vm385_vm3, %v824_v50  ;;  %v770_v55 = vmax.f32 %v640_v52, 0.0  ;;  %v5926_v56 = vpop.f32.mrb[4].mxu0 }
  0xf2   : > { %v827_v57 = vmul.f32 %v799_v51, %v771_v53  ;;  %v655_v58 = vadd.f32 %v5926_v56, %v7154_v37  ;;  %v649_v59 = vpop.f32.mrb[5].mxu0 }
  0xf3   : > { %v826_v60 = vmul.f32 %v798_v54, %v770_v55  ;;  %v650_v62 = vadd.f32 %v7154_v37, %v649_v59 }
  0xf4   : > { %855 = vst.msk [vmem:[#allocation2 + $0x29] sm:$0xff] %vm385_vm3, %v827_v57  ;;  %v773_v63 = vmax.f32 %v655_v58, 0.0  ;;  %v811_v58 = vld [vmem:[%s8584_s3 + $0x78] sm:$0xff] }
  0xf5   : > { %854 = vst.msk [vmem:[#allocation2 + $0x21] sm:$0xff] %vm385_vm3, %v826_v60  ;;  %v772_v1 = vmax.f32 %v650_v62, 0.0  ;;  %v5929_v2 = vpop.f32.mrb[6].mxu0 }
  0xf6   : > { %v829_v3 = vmul.f32 %v801_v61, %v773_v63  ;;  %v665_v5 = vadd.f32 %v5929_v2, %v7154_v37  ;;  %v659_v6 = vpop.f32.mrb[7].mxu0  ;;  %v810_v61 = vld [vmem:[%s8584_s3 + $0x70] sm:$0xff] }
  0xf7   : > { %v828_v7 = vmul.f32 %v800_v0, %v772_v1  ;;  %v660_v9 = vadd.f32 %v7154_v37, %v659_v6 }
  0xf8   : > { %857 = vst.msk [vmem:[#allocation2 + $0x39] sm:$0xff] %vm385_vm3, %v829_v3  ;;  %v775_v11 = vmax.f32 %v665_v5, 0.0  ;;  %v909_v12 = vld [vmem:[#allocation2 + $0x11] ss:$2 sm:$0xff] }
  0xf9   : > { %v1680_v13 = vld [vmem:[#allocation2 + $0x11] ss:$2 sm:$0xff]  ;;  %856 = vst.msk [vmem:[#allocation2 + $0x31] sm:$0xff] %vm385_vm3, %v828_v7  ;;  %v774_v15 = vmax.f32 %v660_v9, 0.0  ;;  %v5932_v16 = vpop.f32.mrb[8].mxu0  ;;  %5966 = vmatmul.mubr.msk.f32.gmra.mrb[2].mxu1 %vm385_vm3, %v909_v12  ;;  %v813_v7 = vld [vmem:[%s8584_s3 + $0x88] sm:$0xff] }
  0xfa   : > { %6127 = vmatmul.mubr.msk.f32.vlgmr.msra.gmra.mrb[28].mxu0 %vm385_vm3, %v1680_v13  ;;  %v831_v17 = vmul.f32 %v803_v8, %v775_v11  ;;  %v675_v18 = vadd.f32 %v5932_v16, %v7154_v37  ;;  %v669_v19 = vpop.f32.mrb[9].mxu0  ;;  %5968 = vmatprep.mubr.msk.f32.mxu1 %vm6912_vm5, %v8593_v4 }
  0xfb   : > { %6129 = vmatprep.mubr.msk.f32.mxu0 %vm6912_vm5, %v8593_v4  ;;  %v830_v20 = vmul.f32 %v802_v10, %v774_v15  ;;  %v670_v22 = vadd.f32 %v7154_v37, %v669_v19  ;;  %6207 = vmatpush3.msra.mxu0 %v5396_v14  ;;  %v812_v10 = vld [vmem:[%s8584_s3 + $0x80] sm:$0xff]  ;;  %v815_v19 = vld [vmem:[%s8584_s3 + $0x98] sm:$0xff] }
  0xfc   : > { %859 = vst.msk [vmem:[#allocation2 + $0x49] sm:$0xff] %vm385_vm3, %v831_v17  ;;  %v777_v23 = vmax.f32 %v675_v18, 0.0  ;;  %v911_v25 = vld [vmem:[#allocation2 + $0x21] ss:$2 sm:$0xff]  ;;  %6288 = vmatprep.subr.mxu0 %v8593_v4 }
  0xfd   : > { %v1681_v26 = vld [vmem:[#allocation2 + $0x21] ss:$2 sm:$0xff]  ;;  %858 = vst.msk [vmem:[#allocation2 + $0x41] sm:$0xff] %vm385_vm3, %v830_v20  ;;  %v776_v27 = vmax.f32 %v670_v22, 0.0  ;;  %v5935_v28 = vpop.f32.mrb[10].mxu0  ;;  %5969 = vmatmul.mubr.msk.f32.gmra.mrb[4].mxu1 %vm385_vm3, %v911_v25  ;;  %v814_v22 = vld [vmem:[%s8584_s3 + $0x90] sm:$0xff] }
  0xfe   : > { %6130 = vmatmul.mubr.msk.f32.gmra.mrb[30].mxu0 %vm385_vm3, %v1681_v26  ;;  %v833_v29 = vmul.f32 %v805_v21, %v777_v23  ;;  %v685_v30 = vadd.f32 %v5935_v28, %v7154_v37  ;;  %v679_v31 = vpop.f32.mrb[11].mxu0  ;;  %5971 = vmatprep.mubr.msk.f32.mxu1 %vm6912_vm5, %v8593_v4 }
  0xff   : > { %6132 = vmatprep.mubr.msk.f32.mxu0 %vm6912_vm5, %v8593_v4  ;;  %v832_v32 = vmul.f32 %v804_v24, %v776_v27  ;;  %v680_v34 = vadd.f32 %v7154_v37, %v679_v31  ;;  %v817_v31 = vld [vmem:[%s8584_s3 + $0xa8] sm:$0xff] }
 0x100   : > { %861 = vst.msk [vmem:[#allocation2 + $0x59] sm:$0xff] %vm385_vm3, %v833_v29  ;;  %v779_v35 = vmax.f32 %v685_v30, 0.0  ;;  %v913_v38 = vld [vmem:[#allocation2 + $0x31] ss:$2 sm:$0xff] }
 0x101   : > { %v1682_v39 = vld [vmem:[#allocation2 + $0x31] ss:$2 sm:$0xff]  ;;  %860 = vst.msk [vmem:[#allocation2 + $0x51] sm:$0xff] %vm385_vm3, %v832_v32  ;;  %v778_v40 = vmax.f32 %v680_v34, 0.0  ;;  %v5938_v41 = vpop.f32.mrb[12].mxu0  ;;  %5972 = vmatmul.mubr.msk.f32.gmra.mrb[6].mxu1 %vm385_vm3, %v913_v38  ;;  %v816_v34 = vld [vmem:[%s8584_s3 + $0xa0] sm:$0xff] }
 0x102   : > { %6133 = vmatmul.mubr.msk.f32.gmra.mrb[32].mxu0 %vm385_vm3, %v1682_v39  ;;  %v835_v42 = vmul.f32 %v807_v33, %v779_v35  ;;  %v695_v43 = vadd.f32 %v5938_v41, %v7154_v37  ;;  %v689_v44 = vpop.f32.mrb[13].mxu0  ;;  %5974 = vmatprep.mubr.msk.f32.mxu1 %vm6912_vm5, %v8593_v4 }
 0x103   : > { %6135 = vmatprep.mubr.msk.f32.mxu0 %vm6912_vm5, %v8593_v4  ;;  %v834_v45 = vmul.f32 %v806_v36, %v778_v40  ;;  %v690_v47 = vadd.f32 %v7154_v37, %v689_v44  ;;  %v819_v44 = vld [vmem:[%s8584_s3 + $0xb8] sm:$0xff] }
 0x104   : > { %863 = vst.msk [vmem:[#allocation2 + $0x69] sm:$0xff] %vm385_vm3, %v835_v42  ;;  %v781_v48 = vmax.f32 %v695_v43, 0.0  ;;  %v915_v50 = vld [vmem:[#allocation2 + $0x41] ss:$2 sm:$0xff] }
 0x105   : > { %v1683_v51 = vld [vmem:[#allocation2 + $0x41] ss:$2 sm:$0xff]  ;;  %862 = vst.msk [vmem:[#allocation2 + $0x61] sm:$0xff] %vm385_vm3, %v834_v45  ;;  %v780_v52 = vmax.f32 %v690_v47, 0.0  ;;  %v5941_v53 = vpop.f32.mrb[14].mxu0  ;;  %5975 = vmatmul.mubr.msk.f32.gmra.mrb[8].mxu1 %vm385_vm3, %v915_v50  ;;  %v818_v47 = vld [vmem:[%s8584_s3 + $0xb0] sm:$0xff] }
 0x106   : > { %6136 = vmatmul.mubr.msk.f32.gmra.mrb[34].mxu0 %vm385_vm3, %v1683_v51  ;;  %v837_v54 = vmul.f32 %v809_v46, %v781_v48  ;;  %v705_v55 = vadd.f32 %v5941_v53, %v7154_v37  ;;  %v699_v56 = vpop.f32.mrb[15].mxu0  ;;  %5977 = vmatprep.mubr.msk.f32.mxu1 %vm6912_vm5, %v8593_v4 }
 0x107   : > { %6138 = vmatprep.mubr.msk.f32.mxu0 %vm6912_vm5, %v8593_v4  ;;  %v836_v57 = vmul.f32 %v808_v49, %v780_v52  ;;  %v700_v59 = vadd.f32 %v7154_v37, %v699_v56  ;;  %v821_v56 = vld [vmem:[%s8584_s3 + $0xc8] sm:$0xff] }
 0x108   : > { %865 = vst.msk [vmem:[#allocation2 + $0x79] sm:$0xff] %vm385_vm3, %v837_v54  ;;  %v783_v60 = vmax.f32 %v705_v55, 0.0  ;;  %v917_v62 = vld [vmem:[#allocation2 + $0x51] ss:$2 sm:$0xff] }
 0x109   : > { %v1684_v63 = vld [vmem:[#allocation2 + $0x51] ss:$2 sm:$0xff]  ;;  %864 = vst.msk [vmem:[#allocation2 + $0x71] sm:$0xff] %vm385_vm3, %v836_v57  ;;  %v782_v0 = vmax.f32 %v700_v59, 0.0  ;;  %v5944_v1 = vpop.f32.mrb[16].mxu0  ;;  %5978 = vmatmul.mubr.msk.f32.gmra.mrb[10].mxu1 %vm385_vm3, %v917_v62  ;;  %v820_v59 = vld [vmem:[%s8584_s3 + $0xc0] sm:$0xff] }
 0x10a   : > { %6139 = vmatmul.mubr.msk.f32.gmra.mrb[36].mxu0 %vm385_vm3, %v1684_v63  ;;  %v839_v2 = vmul.f32 %v811_v58, %v783_v60  ;;  %v715_v3 = vadd.f32 %v5944_v1, %v7154_v37  ;;  %v709_v5 = vpop.f32.mrb[17].mxu0  ;;  %5980 = vmatprep.mubr.msk.f32.mxu1 %vm6912_vm5, %v8593_v4 }
 0x10b   : > { %6141 = vmatprep.mubr.msk.f32.mxu0 %vm6912_vm5, %v8593_v4  ;;  %v838_v6 = vmul.f32 %v810_v61, %v782_v0  ;;  %v710_v8 = vadd.f32 %v7154_v37, %v709_v5  ;;  %v823_v5 = vld [vmem:[%s8584_s3 + $0xd8] sm:$0xff] }
 0x10c   : > { %867 = vst.msk [vmem:[#allocation2 + $0x89] sm:$0xff] %vm385_vm3, %v839_v2  ;;  %v785_v9 = vmax.f32 %v715_v3, 0.0  ;;  %v919_v11 = vld [vmem:[#allocation2 + $0x61] ss:$2 sm:$0xff] }
 0x10d   : > { %v1685_v12 = vld [vmem:[#allocation2 + $0x61] ss:$2 sm:$0xff]  ;;  %866 = vst.msk [vmem:[#allocation2 + $0x81] sm:$0xff] %vm385_vm3, %v838_v6  ;;  %v784_v13 = vmax.f32 %v710_v8, 0.0  ;;  %v5947_v14 = vpop.f32.mrb[18].mxu0  ;;  %5981 = vmatmul.mubr.msk.f32.gmra.mrb[12].mxu1 %vm385_vm3, %v919_v11 }
 0x10e   : > { %6142 = vmatmul.mubr.msk.f32.gmra.mrb[38].mxu0 %vm385_vm3, %v1685_v12  ;;  %v841_v15 = vmul.f32 %v813_v7, %v785_v9  ;;  %v725_v16 = vadd.f32 %v5947_v14, %v7154_v37  ;;  %v719_v17 = vpop.f32.mrb[19].mxu0  ;;  %5983 = vmatprep.mubr.msk.f32.mxu1 %vm6912_vm5, %v8593_v4 }
 0x10f   : > { %6144 = vmatprep.mubr.msk.f32.mxu0 %vm6912_vm5, %v8593_v4  ;;  %v840_v18 = vmul.f32 %v812_v10, %v784_v13  ;;  %v720_v20 = vadd.f32 %v7154_v37, %v719_v17  ;;  %v822_v10 = vld [vmem:[%s8584_s3 + $0xd0] sm:$0xff] }
 0x110   : > { %869 = vst.msk [vmem:[#allocation2 + $0x99] sm:$0xff] %vm385_vm3, %v841_v15  ;;  %v787_v21 = vmax.f32 %v725_v16, 0.0  ;;  %v921_v23 = vld [vmem:[#allocation2 + $0x71] ss:$2 sm:$0xff]  ;;  %v880_v15 = vld [vmem:[#allocation2] ss:$2 sm:$0xff] }
 0x111   : > { %v1686_v24 = vld [vmem:[#allocation2 + $0x71] ss:$2 sm:$0xff]  ;;  %868 = vst.msk [vmem:[#allocation2 + $0x91] sm:$0xff] %vm385_vm3, %v840_v18  ;;  %v786_v25 = vmax.f32 %v720_v20, 0.0  ;;  %v5950_v26 = vpop.f32.mrb[20].mxu0  ;;  %5984 = vmatmul.mubr.msk.f32.gmra.mrb[14].mxu1 %vm385_vm3, %v921_v23  ;;  %v5424_v20 = vld [vmem:[%s8585_s4 + $0x40] sm:$0xff] }
 0x112   : > { %6145 = vmatmul.mubr.msk.f32.gmra.mrb[40].mxu0 %vm385_vm3, %v1686_v24  ;;  %v843_v27 = vmul.f32 %v815_v19, %v787_v21  ;;  %v735_v28 = vadd.f32 %v5950_v26, %v7154_v37  ;;  %v729_v29 = vpop.f32.mrb[21].mxu0  ;;  %5986 = vmatprep.mubr.msk.f32.mxu1 %vm6912_vm5, %v8593_v4  ;;  %v5340_v16 = vld [vmem:[%s8585_s4 + $0x10] sm:$0xff]  ;;  %v2076_v19 = vld [vmem:[#allocation2 + $0x20] ss:$2 sm:$0xff] }
 0x113   : > { %6147 = vmatprep.mubr.msk.f32.mxu0 %vm6912_vm5, %v8593_v4  ;;  %v842_v30 = vmul.f32 %v814_v22, %v786_v25  ;;  %v730_v32 = vadd.f32 %v7154_v37, %v729_v29  ;;  %v882_v18 = vld [vmem:[#allocation2 + $0x10] ss:$2 sm:$0xff]  ;;  %v884_v21 = vld [vmem:[#allocation2 + $0x20] ss:$2 sm:$0xff] }
 0x114   : > { %871 = vst.msk [vmem:[#allocation2 + $0xa9] sm:$0xff] %vm385_vm3, %v843_v27  ;;  %v789_v33 = vmax.f32 %v735_v28, 0.0  ;;  %v923_v35 = vld [vmem:[#allocation2 + $0x81] ss:$2 sm:$0xff]  ;;  %v2077_v22 = vld [vmem:[#allocation2 + $0x30] ss:$2 sm:$0xff] }
 0x115   : > { %v1687_v36 = vld [vmem:[#allocation2 + $0x81] ss:$2 sm:$0xff]  ;;  %870 = vst.msk [vmem:[#allocation2 + $0xa1] sm:$0xff] %vm385_vm3, %v842_v30  ;;  %v788_v38 = vmax.f32 %v730_v32, 0.0  ;;  %v5953_v39 = vpop.f32.mrb[22].mxu0  ;;  %5987 = vmatmul.mubr.msk.f32.gmra.mrb[16].mxu1 %vm385_vm3, %v923_v35 }
 0x116   : > { %6148 = vmatmul.mubr.msk.f32.gmra.mrb[42].mxu0 %vm385_vm3, %v1687_v36  ;;  %v845_v40 = vmul.f32 %v817_v31, %v789_v33  ;;  %v745_v41 = vadd.f32 %v5953_v39, %v7154_v37  ;;  %v739_v42 = vpop.f32.mrb[23].mxu0  ;;  %5989 = vmatprep.mubr.msk.f32.mxu1 %vm6912_vm5, %v8593_v4  ;;  %v886_v23 = vld [vmem:[#allocation2 + $0x30] ss:$2 sm:$0xff]  ;;  %v2078_v24 = vld [vmem:[#allocation2 + $0x40] ss:$2 sm:$0xff]  ;;  %v7427_v33 = vpop.f32.mrb[0].mxu1 }
 0x117   : > { %6150 = vmatprep.mubr.msk.f32.mxu0 %vm6912_vm5, %v8593_v4  ;;  %v844_v43 = vmul.f32 %v816_v34, %v788_v38  ;;  %v740_v45 = vadd.f32 %v7154_v37, %v739_v42  ;;  %v888_v25 = vld [vmem:[#allocation2 + $0x40] ss:$2 sm:$0xff]  ;;  %v2079_v26 = vld [vmem:[#allocation2 + $0x50] ss:$2 sm:$0xff]  ;;  %v5964_v36 = vpop.f32.mrb[1].mxu1 }
 0x118   : > { %873 = vst.msk [vmem:[#allocation2 + $0xb9] sm:$0xff] %vm385_vm3, %v845_v40  ;;  %v791_v46 = vmax.f32 %v745_v41, 0.0  ;;  %v925_v48 = vld [vmem:[#allocation2 + $0x91] ss:$2 sm:$0xff]  ;;  %v890_v27 = vld [vmem:[#allocation2 + $0x50] ss:$2 sm:$0xff] }
 0x119   : > { %v1688_v49 = vld [vmem:[#allocation2 + $0x91] ss:$2 sm:$0xff]  ;;  %872 = vst.msk [vmem:[#allocation2 + $0xb1] sm:$0xff] %vm385_vm3, %v844_v43  ;;  %v790_v50 = vmax.f32 %v740_v45, 0.0  ;;  %v5956_v51 = vpop.f32.mrb[24].mxu0  ;;  %5990 = vmatmul.mubr.msk.f32.gmra.mrb[18].mxu1 %vm385_vm3, %v925_v48 }
 0x11a   : > { %6151 = vmatmul.mubr.msk.f32.gmra.mrb[44].mxu0 %vm385_vm3, %v1688_v49  ;;  %v847_v52 = vmul.f32 %v819_v44, %v791_v46  ;;  %v755_v53 = vadd.f32 %v5956_v51, %v7154_v37  ;;  %v749_v54 = vpop.f32.mrb[25].mxu0  ;;  %5992 = vmatprep.mubr.msk.f32.mxu1 %vm6912_vm5, %v8593_v4  ;;  %v2080_v28 = vld [vmem:[#allocation2 + $0x60] ss:$2 sm:$0xff]  ;;  %v2081_v30 = vld [vmem:[#allocation2 + $0x70] ss:$2 sm:$0xff] }
 0x11b   : > { %6153 = vmatprep.mubr.msk.f32.mxu0 %vm6912_vm5, %v8593_v4  ;;  %v846_v55 = vmul.f32 %v818_v47, %v790_v50  ;;  %v750_v57 = vadd.f32 %v7154_v37, %v749_v54  ;;  %v892_v29 = vld [vmem:[#allocation2 + $0x60] ss:$2 sm:$0xff]  ;;  %v894_v31 = vld [vmem:[#allocation2 + $0x70] ss:$2 sm:$0xff] }
 0x11c   : > { %875 = vst.msk [vmem:[#allocation2 + $0xc9] sm:$0xff] %vm385_vm3, %v847_v52  ;;  %v793_v58 = vmax.f32 %v755_v53, 0.0  ;;  %v927_v60 = vld [vmem:[#allocation2 + $0xa1] ss:$2 sm:$0xff]  ;;  %v2082_v32 = vld [vmem:[#allocation2 + $0x80] ss:$2 sm:$0xff] }
 0x11d   : > { %v1689_v61 = vld [vmem:[#allocation2 + $0xa1] ss:$2 sm:$0xff]  ;;  %874 = vst.msk [vmem:[#allocation2 + $0xc1] sm:$0xff] %vm385_vm3, %v846_v55  ;;  %v792_v62 = vmax.f32 %v750_v57, 0.0  ;;  %5993 = vmatmul.mubr.msk.f32.gmra.mrb[20].mxu1 %vm385_vm3, %v927_v60  ;;  %v5959_v63 = vpop.f32.mrb[26].mxu0  ;;  %v5354_v48 = vld [vmem:[%s8585_s4 + $0x18] sm:$0xff] }
 0x11e   : > { %6154 = vmatmul.mubr.msk.f32.gmra.mrb[46].mxu0 %vm385_vm3, %v1689_v61  ;;  %v849_v0 = vmul.f32 %v821_v56, %v793_v58  ;;  %5995 = vmatprep.mubr.msk.f32.mxu1 %vm6912_vm5, %v8593_v4  ;;  %v765_v1 = vadd.f32 %v5959_v63, %v7154_v37  ;;  %v759_v2 = vpop.f32.mrb[27].mxu0  ;;  %v896_v34 = vld [vmem:[#allocation2 + $0x80] ss:$2 sm:$0xff]  ;;  %v2083_v35 = vld [vmem:[#allocation2 + $0x90] ss:$2 sm:$0xff] }
 0x11f   : > { %6156 = vmatprep.mubr.msk.f32.mxu0 %vm6912_vm5, %v8593_v4  ;;  %v848_v3 = vmul.f32 %v820_v59, %v792_v62  ;;  %v760_v6 = vadd.f32 %v7154_v37, %v759_v2  ;;  %v898_v38 = vld [vmem:[#allocation2 + $0x90] ss:$2 sm:$0xff]  ;;  %v2084_v39 = vld [vmem:[#allocation2 + $0xa0] ss:$2 sm:$0xff] }
 0x120   : > { %877 = vst.msk [vmem:[#allocation2 + $0xd9] sm:$0xff] %vm385_vm3, %v849_v0  ;;  %v929_v7 = vld [vmem:[#allocation2 + $0xb1] ss:$2 sm:$0xff]  ;;  %v795_v9 = vmax.f32 %v765_v1, 0.0  ;;  %v900_v40 = vld [vmem:[#allocation2 + $0xa0] ss:$2 sm:$0xff] }
 0x121   : > { %v1690_v8 = vld [vmem:[#allocation2 + $0xb1] ss:$2 sm:$0xff]  ;;  %876 = vst.msk [vmem:[#allocation2 + $0xd1] sm:$0xff] %vm385_vm3, %v848_v3  ;;  %5996 = vmatmul.mubr.msk.f32.gmra.mrb[22].mxu1 %vm385_vm3, %v929_v7  ;;  %v794_v11 = vmax.f32 %v760_v6, 0.0  ;;  %v2085_v41 = vld [vmem:[#allocation2 + $0xb0] ss:$2 sm:$0xff] }
 0x122   : > { %6157 = vmatmul.mubr.msk.f32.gmra.mrb[48].mxu0 %vm385_vm3, %v1690_v8  ;;  %5998 = vmatprep.mubr.msk.f32.mxu1 %vm6912_vm5, %v8593_v4  ;;  %v851_v37 = vmul.f32 %v823_v5, %v795_v9  ;;  %v902_v42 = vld [vmem:[#allocation2 + $0xb0] ss:$2 sm:$0xff] }
 0x123   : > { %6159 = vmatprep.mubr.msk.f32.mxu0 %vm6912_vm5, %v8593_v4  ;;  %v850_v12 = vmul.f32 %v822_v10, %v794_v11  ;;  %v1273_v46 = vld [vmem:[#allocation2 + $0x2] ss:$2 sm:$0xff]  ;;  %v1275_v49 = vld [vmem:[#allocation2 + $0x12] ss:$2 sm:$0xff] }
 0x124   : > { %v931_v13 = vld [vmem:[#allocation2 + $0xc1] ss:$2 sm:$0x7f]  ;;  %879 = vst.msk [vmem:[#allocation2 + $0xe9] sm:$0xff] %vm385_vm3, %v851_v37  ;;  %v2086_v43 = vld [vmem:[#allocation2 + $0xc0] ss:$2 sm:$0xff] }
 0x125   : > { %v1691_v14 = vld [vmem:[#allocation2 + $0xc1] ss:$2 sm:$0xff]  ;;  %5999 = vmatmul.mubr.msk.f32.gmra.mrb[24].mxu1 %vm385_vm3, %v931_v13  ;;  %878 = vst.msk [vmem:[#allocation2 + $0xe1] sm:$0xff] %vm385_vm3, %v850_v12  ;;  %v904_v44 = vld [vmem:[#allocation2 + $0xc0] ss:$2 sm:$0x7f] }
 0x126   : > { %6160 = vmatmul.mubr.msk.f32.gmra.mrb[50].mxu0 %vm385_vm3, %v1691_v14  ;;  %6003 = vmatprep.mubr.msk.f32.mxu1 %vm6912_vm5, %v8593_v4  ;;  %v2472_v50 = vld [vmem:[#allocation2 + $0x22] ss:$2 sm:$0xff]  ;;  %v2473_v52 = vld [vmem:[#allocation2 + $0x32] ss:$2 sm:$0xff] }
 0x127   : > { %6162 = vmatprep.mubr.msk.f32.mxu0 %vm6912_vm5, %v8593_v4  ;;  %v1277_v51 = vld [vmem:[#allocation2 + $0x22] ss:$2 sm:$0xff]  ;;  %v1279_v53 = vld [vmem:[#allocation2 + $0x32] ss:$2 sm:$0xff] }
 0x128   : > { %v1693_v17 = vld [vmem:[#allocation2 + $0xd1] ss:$2 sm:$0x7f]  ;;  %v2087_v45 = vld [vmem:[#allocation2 + $0xd0] ss:$2 sm:$0xff]  ;;  %v5382_v11 = vld [vmem:[%s8585_s4 + $0x28] sm:$0xff] }
 0x129   : > { %6004 = vmatmul.mubr.msk.f32.vlgmr.msra.gmra.mrb[26].mxu1 %vm385_vm3, %v880_v15  ;;  %v2474_v54 = vld [vmem:[#allocation2 + $0x42] ss:$2 sm:$0xff]  ;;  %v2475_v56 = vld [vmem:[#allocation2 + $0x52] ss:$2 sm:$0xff] }
 0x12a   : > { %6163 = vmatmul.mubr.msk.f32.gmra.mrb[52].mxu0 %vm385_vm3, %v1693_v17  ;;  %6043 = vmatpush3.msra.mxu1 %v5340_v16  ;;  %v1281_v55 = vld [vmem:[#allocation2 + $0x42] ss:$2 sm:$0xff]  ;;  %v1283_v57 = vld [vmem:[#allocation2 + $0x52] ss:$2 sm:$0xff] }
 0x12b   : > { %6006 = vmatprep.mubr.msk.f32.mxu1 %vm6912_vm5, %v8593_v4  ;;  %6208 = vmatprep.mubr.msk.f32.mxu0 %vm6912_vm5, %v8593_v4  ;;  %v2476_v58 = vld [vmem:[#allocation2 + $0x62] ss:$2 sm:$0xff]  ;;  %v2477_v60 = vld [vmem:[#allocation2 + $0x72] ss:$2 sm:$0xff] }
 0x12c   : > { %6083 = vmatprep.subr.mxu1 %v8593_v4  ;;  %v2089_v47 = vld [vmem:[#allocation2 + $0xe0] ss:$2 sm:$0x7f]  ;;  %v1482_v37 = vld [vmem:[#allocation2 + $0x10] ss:$2 sm:$0xff] }
 0x12d   : > { %6007 = vmatmul.mubr.msk.f32.gmra.mrb[28].mxu1 %vm385_vm3, %v882_v18  ;;  %v1285_v59 = vld [vmem:[#allocation2 + $0x62] ss:$2 sm:$0xff]  ;;  %v1287_v61 = vld [vmem:[#allocation2 + $0x72] ss:$2 sm:$0xff] }
 0x12e   : > { %6209 = vmatmul.mubr.msk.f32.vlgmr.msra.gmra.mrb[54].mxu0 %vm385_vm3, %v2076_v19  ;;  %6009 = vmatprep.mubr.msk.f32.mxu1 %vm6912_vm5, %v8593_v4  ;;  %v2478_v62 = vld [vmem:[#allocation2 + $0x82] ss:$2 sm:$0xff]  ;;  %v2479_v0 = vld [vmem:[#allocation2 + $0x92] ss:$2 sm:$0xff] }
 0x12f   : > { %6211 = vmatprep.mubr.msk.f32.mxu0 %vm6912_vm5, %v8593_v4  ;;  %6289 = vmatpush3.msra.mxu0 %v5424_v20  ;;  %v1289_v63 = vld [vmem:[#allocation2 + $0x82] ss:$2 sm:$0xff]  ;;  %v1291_v1 = vld [vmem:[#allocation2 + $0x92] ss:$2 sm:$0xff] }
 0x130   : > { %v2480_v2 = vld [vmem:[#allocation2 + $0xa2] ss:$2 sm:$0xff]  ;;  %v2481_v5 = vld [vmem:[#allocation2 + $0xb2] ss:$2 sm:$0xff] }
 0x131   : > { %6010 = vmatmul.mubr.msk.f32.gmra.mrb[30].mxu1 %vm385_vm3, %v884_v21  ;;  %v1293_v3 = vld [vmem:[#allocation2 + $0xa2] ss:$2 sm:$0xff]  ;;  %v1295_v6 = vld [vmem:[#allocation2 + $0xb2] ss:$2 sm:$0xff] }
 0x132   : > { %6212 = vmatmul.mubr.msk.f32.gmra.mrb[56].mxu0 %vm385_vm3, %v2077_v22  ;;  %6012 = vmatprep.mubr.msk.f32.mxu1 %vm6912_vm5, %v8593_v4  ;;  %v2482_v7 = vld [vmem:[#allocation2 + $0xc2] ss:$2 sm:$0xff]  ;;  %v2483_v8 = vld [vmem:[#allocation2 + $0xd2] ss:$2 sm:$0xff] }
 0x133   : > { %6214 = vmatprep.mubr.msk.f32.mxu0 %vm6912_vm5, %v8593_v4  ;;  %v1297_v9 = vld [vmem:[#allocation2 + $0xc2] ss:$2 sm:$0x7f]  ;;  %v1484_v13 = vld [vmem:[#allocation2 + $0x30] ss:$2 sm:$0xff] }
 0x134   : > { %v2485_v10 = vld [vmem:[#allocation2 + $0xe2] ss:$2 sm:$0x7f]  ;;  %v1486_v15 = vld [vmem:[#allocation2 + $0x50] ss:$2 sm:$0xff] }
 0x135   : > { %6013 = vmatmul.mubr.msk.f32.gmra.mrb[32].mxu1 %vm385_vm3, %v886_v23  ;;  %v1483_v12 = vld [vmem:[#allocation2 + $0x20] ss:$2 sm:$0xff]  ;;  %v1488_v17 = vld [vmem:[#allocation2 + $0x70] ss:$2 sm:$0xff] }
 0x136   : > { %6215 = vmatmul.mubr.msk.f32.gmra.mrb[58].mxu0 %vm385_vm3, %v2078_v24  ;;  %6015 = vmatprep.mubr.msk.f32.mxu1 %vm6912_vm5, %v8593_v4  ;;  %v1485_v14 = vld [vmem:[#allocation2 + $0x40] ss:$2 sm:$0xff]  ;;  %v1490_v19 = vld [vmem:[#allocation2 + $0x90] ss:$2 sm:$0xff] }
 0x137   : > { %6217 = vmatprep.mubr.msk.f32.mxu0 %vm6912_vm5, %v8593_v4  ;;  %v1487_v16 = vld [vmem:[#allocation2 + $0x60] ss:$2 sm:$0xff]  ;;  %v1492_v21 = vld [vmem:[#allocation2 + $0xb0] ss:$2 sm:$0xff] }
 0x138   : > { %v1489_v18 = vld [vmem:[#allocation2 + $0x80] ss:$2 sm:$0xff]  ;;  %v1495_v23 = vld [vmem:[#allocation2 + $0xd0] ss:$2 sm:$0x7f] }
 0x139   : > { %6016 = vmatmul.mubr.msk.f32.gmra.mrb[34].mxu1 %vm385_vm3, %v888_v25  ;;  %v1491_v20 = vld [vmem:[#allocation2 + $0xa0] ss:$2 sm:$0xff]  ;;  %v5410_v24 = vld [vmem:[%s8585_s4 + $0x38] sm:$0xff] }
 0x13a   : > { %6218 = vmatmul.mubr.msk.f32.gmra.mrb[60].mxu0 %vm385_vm3, %v2079_v26  ;;  %6018 = vmatprep.mubr.msk.f32.mxu1 %vm6912_vm5, %v8593_v4  ;;  %v1493_v22 = vld [vmem:[#allocation2 + $0xc0] ss:$2 sm:$0xff] }
 0x13b   : > { %6220 = vmatprep.mubr.msk.f32.mxu0 %vm6912_vm5, %v8593_v4  ;;  %v1878_v25 = vld [vmem:[#allocation2 + $0x12] ss:$2 sm:$0xff]  ;;  %v1879_v26 = vld [vmem:[#allocation2 + $0x22] ss:$2 sm:$0xff] }
 0x13d   : > { %6019 = vmatmul.mubr.msk.f32.gmra.mrb[36].mxu1 %vm385_vm3, %v890_v27 }
 0x13e   : > { %6221 = vmatmul.mubr.msk.f32.gmra.mrb[62].mxu0 %vm385_vm3, %v2080_v28  ;;  %6021 = vmatprep.mubr.msk.f32.mxu1 %vm6912_vm5, %v8593_v4 }
 0x13f   : > { %6223 = vmatprep.mubr.msk.f32.mxu0 %vm6912_vm5, %v8593_v4 }
 0x141   : > { %6022 = vmatmul.mubr.msk.f32.gmra.mrb[38].mxu1 %vm385_vm3, %v892_v29  ;;  %v1880_v29 = vld [vmem:[#allocation2 + $0x32] ss:$2 sm:$0xff] }
 0x142   : > { %6224 = vmatmul.mubr.msk.f32.gmra.mrb[64].mxu0 %vm385_vm3, %v2081_v30  ;;  %6024 = vmatprep.mubr.msk.f32.mxu1 %vm6912_vm5, %v8593_v4 }
 0x143   : > { %6226 = vmatprep.mubr.msk.f32.mxu0 %vm6912_vm5, %v8593_v4 }
 0x145   : > { %6025 = vmatmul.mubr.msk.f32.gmra.mrb[40].mxu1 %vm385_vm3, %v894_v31 }
 0x146   : > { %6227 = vmatmul.mubr.msk.f32.gmra.mrb[66].mxu0 %vm385_vm3, %v2082_v32  ;;  %6027 = vmatprep.mubr.msk.f32.mxu1 %vm6912_vm5, %v8593_v4 }
 0x147   : > { %6229 = vmatprep.mubr.msk.f32.mxu0 %vm6912_vm5, %v8593_v4 }
 0x149   : > { %6028 = vmatmul.mubr.msk.f32.gmra.mrb[42].mxu1 %vm385_vm3, %v896_v34 }
 0x14a   : > { %6230 = vmatmul.mubr.msk.f32.gmra.mrb[68].mxu0 %vm385_vm3, %v2083_v35  ;;  %6030 = vmatprep.mubr.msk.f32.mxu1 %vm6912_vm5, %v8593_v4  ;;  %v1881_v35 = vld [vmem:[#allocation2 + $0x42] ss:$2 sm:$0xff] }
 0x14b   : > { %6232 = vmatprep.mubr.msk.f32.mxu0 %vm6912_vm5, %v8593_v4 }
 0x14d   : > { %6031 = vmatmul.mubr.msk.f32.gmra.mrb[44].mxu1 %vm385_vm3, %v898_v38 }
 0x14e   : > { %6233 = vmatmul.mubr.msk.f32.gmra.mrb[70].mxu0 %vm385_vm3, %v2084_v39  ;;  %6033 = vmatprep.mubr.msk.f32.mxu1 %vm6912_vm5, %v8593_v4 }
 0x14f   : > { %6235 = vmatprep.mubr.msk.f32.mxu0 %vm6912_vm5, %v8593_v4 }
 0x151   : > { %6034 = vmatmul.mubr.msk.f32.gmra.mrb[46].mxu1 %vm385_vm3, %v900_v40 }
 0x152   : > { %6236 = vmatmul.mubr.msk.f32.gmra.mrb[72].mxu0 %vm385_vm3, %v2085_v41  ;;  %6036 = vmatprep.mubr.msk.f32.mxu1 %vm6912_vm5, %v8593_v4  ;;  %v1882_v41 = vld [vmem:[#allocation2 + $0x52] ss:$2 sm:$0xff] }
 0x153   : > { %6238 = vmatprep.mubr.msk.f32.mxu0 %vm6912_vm5, %v8593_v4 }
 0x155   : > { %6037 = vmatmul.mubr.msk.f32.gmra.mrb[48].mxu1 %vm385_vm3, %v902_v42 }
 0x156   : > { %6239 = vmatmul.mubr.msk.f32.gmra.mrb[74].mxu0 %vm385_vm3, %v2086_v43  ;;  %6039 = vmatprep.mubr.msk.f32.mxu1 %vm6912_vm5, %v8593_v4 }
 0x157   : > { %6241 = vmatprep.mubr.msk.f32.mxu0 %vm6912_vm5, %v8593_v4 }
 0x159   : > { %6040 = vmatmul.mubr.msk.f32.gmra.mrb[50].mxu1 %vm385_vm3, %v904_v44 }
 0x15a   : > { %6242 = vmatmul.mubr.msk.f32.gmra.mrb[76].mxu0 %vm385_vm3, %v2087_v45  ;;  %6044 = vmatprep.mubr.msk.f32.mxu1 %vm6912_vm5, %v8593_v4 }
 0x15b   : > { %6244 = vmatprep.mubr.msk.f32.mxu0 %vm6912_vm5, %v8593_v4 }
 0x15d   : > { %6045 = vmatmul.mubr.msk.f32.vlgmr.msra.gmra.mrb[52].mxu1 %vm385_vm3, %v1273_v46  ;;  %v1883_v46 = vld [vmem:[#allocation2 + $0x62] ss:$2 sm:$0xff] }
 0x15e   : > { %6245 = vmatmul.mubr.msk.f32.gmra.mrb[78].mxu0 %vm385_vm3, %v2089_v47  ;;  %6084 = vmatpush3.msra.mxu1 %v5354_v48 }
 0x15f   : > { %6047 = vmatprep.mubr.msk.f32.mxu1 %vm6912_vm5, %v8593_v4  ;;  %6290 = vmatprep.mubr.msk.f32.mxu0 %vm6912_vm5, %v8593_v4 }
 0x160   : > { %6165 = vmatprep.subr.mxu1 %v8593_v4 }
 0x161   : > { %6048 = vmatmul.mubr.msk.f32.gmra.mrb[54].mxu1 %vm385_vm3, %v1275_v49 }
 0x162   : > { %6291 = vmatmul.mubr.msk.f32.vlgmr.msra.gmra.mrb[80].mxu0 %vm385_vm3, %v2472_v50  ;;  %6050 = vmatprep.mubr.msk.f32.mxu1 %vm6912_vm5, %v8593_v4 }
 0x163   : > { %6293 = vmatprep.mubr.msk.f32.mxu0 %vm6912_vm5, %v8593_v4 }
 0x165   : > { %6051 = vmatmul.mubr.msk.f32.gmra.mrb[56].mxu1 %vm385_vm3, %v1277_v51  ;;  %v1884_v51 = vld [vmem:[#allocation2 + $0x72] ss:$2 sm:$0xff] }
 0x166   : > { %6294 = vmatmul.mubr.msk.f32.gmra.mrb[82].mxu0 %vm385_vm3, %v2473_v52  ;;  %6053 = vmatprep.mubr.msk.f32.mxu1 %vm6912_vm5, %v8593_v4 }
 0x167   : > { %6296 = vmatprep.mubr.msk.f32.mxu0 %vm6912_vm5, %v8593_v4 }
 0x169   : > { %6054 = vmatmul.mubr.msk.f32.gmra.mrb[58].mxu1 %vm385_vm3, %v1279_v53 }
 0x16a   : > { %6297 = vmatmul.mubr.msk.f32.gmra.mrb[84].mxu0 %vm385_vm3, %v2474_v54  ;;  %6056 = vmatprep.mubr.msk.f32.mxu1 %vm6912_vm5, %v8593_v4 }
 0x16b   : > { %6299 = vmatprep.mubr.msk.f32.mxu0 %vm6912_vm5, %v8593_v4 }
 0x16d   : > { %6057 = vmatmul.mubr.msk.f32.gmra.mrb[60].mxu1 %vm385_vm3, %v1281_v55 }
 0x16e   : > { %6300 = vmatmul.mubr.msk.f32.gmra.mrb[86].mxu0 %vm385_vm3, %v2475_v56  ;;  %6059 = vmatprep.mubr.msk.f32.mxu1 %vm6912_vm5, %v8593_v4  ;;  %v1885_v56 = vld [vmem:[#allocation2 + $0x82] ss:$2 sm:$0xff] }
 0x16f   : > { %6302 = vmatprep.mubr.msk.f32.mxu0 %vm6912_vm5, %v8593_v4 }
 0x171   : > { %6060 = vmatmul.mubr.msk.f32.gmra.mrb[62].mxu1 %vm385_vm3, %v1283_v57 }
 0x172   : > { %6303 = vmatmul.mubr.msk.f32.gmra.mrb[88].mxu0 %vm385_vm3, %v2476_v58  ;;  %6062 = vmatprep.mubr.msk.f32.mxu1 %vm6912_vm5, %v8593_v4 }
 0x173   : > { %6305 = vmatprep.mubr.msk.f32.mxu0 %vm6912_vm5, %v8593_v4 }
 0x175   : > { %6063 = vmatmul.mubr.msk.f32.gmra.mrb[64].mxu1 %vm385_vm3, %v1285_v59 }
 0x176   : > { %6306 = vmatmul.mubr.msk.f32.gmra.mrb[90].mxu0 %vm385_vm3, %v2477_v60  ;;  %6065 = vmatprep.mubr.msk.f32.mxu1 %vm6912_vm5, %v8593_v4 }
 0x177   : > { %6308 = vmatprep.mubr.msk.f32.mxu0 %vm6912_vm5, %v8593_v4 }
 0x179   : > { %6066 = vmatmul.mubr.msk.f32.gmra.mrb[66].mxu1 %vm385_vm3, %v1287_v61  ;;  %v1886_v61 = vld [vmem:[#allocation2 + $0x92] ss:$2 sm:$0xff] }
 0x17a   : > { %6309 = vmatmul.mubr.msk.f32.gmra.mrb[92].mxu0 %vm385_vm3, %v2478_v62  ;;  %6068 = vmatprep.mubr.msk.f32.mxu1 %vm6912_vm5, %v8593_v4 }
 0x17b   : > { %6311 = vmatprep.mubr.msk.f32.mxu0 %vm6912_vm5, %v8593_v4 }
 0x17d   : > { %6069 = vmatmul.mubr.msk.f32.gmra.mrb[68].mxu1 %vm385_vm3, %v1289_v63 }
 0x17e   : > { %6312 = vmatmul.mubr.msk.f32.gmra.mrb[94].mxu0 %vm385_vm3, %v2479_v0  ;;  %6071 = vmatprep.mubr.msk.f32.mxu1 %vm6912_vm5, %v8593_v4 }
 0x17f   : > { %6314 = vmatprep.mubr.msk.f32.mxu0 %vm6912_vm5, %v8593_v4 }
 0x181   : > { %6072 = vmatmul.mubr.msk.f32.gmra.mrb[70].mxu1 %vm385_vm3, %v1291_v1 }
 0x182   : > { %6315 = vmatmul.mubr.msk.f32.gmra.mrb[96].mxu0 %vm385_vm3, %v2480_v2  ;;  %6074 = vmatprep.mubr.msk.f32.mxu1 %vm6912_vm5, %v8593_v4  ;;  %v1887_v2 = vld [vmem:[#allocation2 + $0xa2] ss:$2 sm:$0xff] }
 0x183   : > { %6317 = vmatprep.mubr.msk.f32.mxu0 %vm6912_vm5, %v8593_v4 }
 0x185   : > { %6075 = vmatmul.mubr.msk.f32.gmra.mrb[72].mxu1 %vm385_vm3, %v1293_v3 }
 0x186   : > { %6318 = vmatmul.mubr.msk.f32.gmra.mrb[98].mxu0 %vm385_vm3, %v2481_v5  ;;  %6077 = vmatprep.mubr.msk.f32.mxu1 %vm6912_vm5, %v8593_v4 }
 0x187   : > { %6320 = vmatprep.mubr.msk.f32.mxu0 %vm6912_vm5, %v8593_v4 }
 0x189   : > { %6078 = vmatmul.mubr.msk.f32.gmra.mrb[74].mxu1 %vm385_vm3, %v1295_v6 }
 0x18a   : > { %6321 = vmatmul.mubr.msk.f32.gmra.mrb[100].mxu0 %vm385_vm3, %v2482_v7  ;;  %6080 = vmatprep.mubr.msk.f32.mxu1 %vm6912_vm5, %v8593_v4 }
 0x18b   : > { %6323 = vmatprep.mubr.msk.f32.mxu0 %vm6912_vm5, %v8593_v4 }
 0x18d   : > { %6081 = vmatmul.mubr.msk.f32.gmra.mrb[76].mxu1 %vm385_vm3, %v1297_v9 }
 0x18e   : > { %6324 = vmatmul.mubr.msk.f32.gmra.mrb[102].mxu0 %vm385_vm3, %v2483_v8  ;;  %6085 = vmatprep.mubr.msk.f32.mxu1 %vm6912_vm5, %v8593_v4  ;;  %v1888_v8 = vld [vmem:[#allocation2 + $0xb2] ss:$2 sm:$0xff] }
 0x18f   : > { %6326 = vmatprep.mubr.msk.f32.mxu0 %vm6912_vm5, %v8593_v4 }
 0x191   : > { %6086 = vmatmul.mubr.msk.f32.vlgmr.msra.gmra.mrb[78].mxu1 %vm385_vm3, %v1482_v37 }
 0x192   : > { %6327 = vmatmul.mubr.msk.f32.gmra.mrb[104].mxu0 %vm385_vm3, %v2485_v10  ;;  %6166 = vmatpush3.msra.mxu1 %v5382_v11 }
 0x193   : > { %6088 = vmatprep.mubr.msk.f32.mxu1 %vm6912_vm5, %v8593_v4  ;;  %6247 = vmatprep.subr.mxu1 %v8593_v4 }
 0x194   : > { %6358 = vmatprep.mubr.msk.f32.mxu0 %vm6912_vm5, %v8593_v4 }
 0x195   : > { %6089 = vmatmul.mubr.msk.f32.gmra.mrb[80].mxu1 %vm385_vm3, %v1483_v12  ;;  %v1889_v12 = vld [vmem:[#allocation2 + $0xc2] ss:$2 sm:$0xff] }
 0x196   : > { %6091 = vmatprep.mubr.msk.f32.mxu1 %vm6912_vm5, %v8593_v4 }
 0x199   : > { %6092 = vmatmul.mubr.msk.f32.gmra.mrb[82].mxu1 %vm385_vm3, %v1484_v13 }
 0x19a   : > { %6094 = vmatprep.mubr.msk.f32.mxu1 %vm6912_vm5, %v8593_v4 }
 0x19d   : > { %6095 = vmatmul.mubr.msk.f32.gmra.mrb[84].mxu1 %vm385_vm3, %v1485_v14 }
 0x19e   : > { %6097 = vmatprep.mubr.msk.f32.mxu1 %vm6912_vm5, %v8593_v4 }
 0x1a1   : > { %6098 = vmatmul.mubr.msk.f32.gmra.mrb[86].mxu1 %vm385_vm3, %v1486_v15 }
 0x1a2   : > { %6100 = vmatprep.mubr.msk.f32.mxu1 %vm6912_vm5, %v8593_v4 }
 0x1a5   : > { %6101 = vmatmul.mubr.msk.f32.gmra.mrb[88].mxu1 %vm385_vm3, %v1487_v16 }
 0x1a6   : > { %6103 = vmatprep.mubr.msk.f32.mxu1 %vm6912_vm5, %v8593_v4 }
 0x1a9   : > { %6104 = vmatmul.mubr.msk.f32.gmra.mrb[90].mxu1 %vm385_vm3, %v1488_v17  ;;  %v1891_v17 = vld [vmem:[#allocation2 + $0xd2] ss:$2 sm:$0x7f] }
 0x1aa   : > { %6106 = vmatprep.mubr.msk.f32.mxu1 %vm6912_vm5, %v8593_v4 }
 0x1ad   : > { %6107 = vmatmul.mubr.msk.f32.gmra.mrb[92].mxu1 %vm385_vm3, %v1489_v18 }
 0x1ae   : > { %6109 = vmatprep.mubr.msk.f32.mxu1 %vm6912_vm5, %v8593_v4 }
 0x1b1   : > { %6110 = vmatmul.mubr.msk.f32.gmra.mrb[94].mxu1 %vm385_vm3, %v1490_v19 }
 0x1b2   : > { %6112 = vmatprep.mubr.msk.f32.mxu1 %vm6912_vm5, %v8593_v4 }
 0x1b5   : > { %6113 = vmatmul.mubr.msk.f32.gmra.mrb[96].mxu1 %vm385_vm3, %v1491_v20 }
 0x1b6   : > { %6115 = vmatprep.mubr.msk.f32.mxu1 %vm6912_vm5, %v8593_v4 }
 0x1b9   : > { %6116 = vmatmul.mubr.msk.f32.gmra.mrb[98].mxu1 %vm385_vm3, %v1492_v21 }
 0x1ba   : > { %6118 = vmatprep.mubr.msk.f32.mxu1 %vm6912_vm5, %v8593_v4 }
 0x1bd   : > { %6119 = vmatmul.mubr.msk.f32.gmra.mrb[100].mxu1 %vm385_vm3, %v1493_v22  ;;  %v2274_v22 = vld [vmem:[#allocation2 + $0x21] ss:$2 sm:$0xff] }
 0x1be   : > { %6121 = vmatprep.mubr.msk.f32.mxu1 %vm6912_vm5, %v8593_v4 }
 0x1c1   : > { %6122 = vmatmul.mubr.msk.f32.gmra.mrb[102].mxu1 %vm385_vm3, %v1495_v23 }
 0x1c2   : > { %6167 = vmatprep.mubr.msk.f32.mxu1 %vm6912_vm5, %v8593_v4 }
 0x1c5   : > { %6168 = vmatmul.mubr.msk.f32.vlgmr.msra.gmra.mrb[104].mxu1 %vm385_vm3, %v1878_v25 }
 0x1c6   : > { %6248 = vmatpush3.msra.mxu1 %v5410_v24  ;;  %6170 = vmatprep.mubr.msk.f32.mxu1 %vm6912_vm5, %v8593_v4 }
 0x1c9   : > { %6171 = vmatmul.mubr.msk.f32.gmra.mrb[106].mxu1 %vm385_vm3, %v1879_v26  ;;  %v2275_v26 = vld [vmem:[#allocation2 + $0x31] ss:$2 sm:$0xff] }
 0x1ca   : > { %6173 = vmatprep.mubr.msk.f32.mxu1 %vm6912_vm5, %v8593_v4 }
 0x1cc   : > { %v7596_v27 = vpop.f32.mrb[2].mxu1 }
 0x1cd   : > { %v7598_v28 = vpop.f32.mrb[28].mxu0  ;;  %v5967_v30 = vpop.f32.mrb[3].mxu1  ;;  %6174 = vmatmul.mubr.msk.f32.gmra.mrb[108].mxu1 %vm385_vm3, %v1880_v29 }
 0x1ce   : > { %v6128_v31 = vpop.f32.mrb[29].mxu0  ;;  %6176 = vmatprep.mubr.msk.f32.mxu1 %vm6912_vm5, %v8593_v4 }
 0x1d0   : > { %v7603_v32 = vpop.f32.mrb[4].mxu1 }
 0x1d1   : > { %v7605_v34 = vpop.f32.mrb[30].mxu0  ;;  %v5970_v36 = vpop.f32.mrb[5].mxu1  ;;  %6177 = vmatmul.mubr.msk.f32.gmra.mrb[110].mxu1 %vm385_vm3, %v1881_v35 }
 0x1d2   : > { %v6131_v38 = vpop.f32.mrb[31].mxu0  ;;  %6179 = vmatprep.mubr.msk.f32.mxu1 %vm6912_vm5, %v8593_v4 }
 0x1d4   : > { %v7610_v39 = vpop.f32.mrb[6].mxu1 }
 0x1d5   : > { %v7612_v40 = vpop.f32.mrb[32].mxu0  ;;  %v5973_v42 = vpop.f32.mrb[7].mxu1  ;;  %6180 = vmatmul.mubr.msk.f32.gmra.mrb[112].mxu1 %vm385_vm3, %v1882_v41  ;;  %v2276_v41 = vld [vmem:[#allocation2 + $0x41] ss:$2 sm:$0xff] }
 0x1d6   : > { %v6134_v43 = vpop.f32.mrb[33].mxu0  ;;  %6182 = vmatprep.mubr.msk.f32.mxu1 %vm6912_vm5, %v8593_v4 }
 0x1d8   : > { %v7617_v44 = vpop.f32.mrb[8].mxu1 }
 0x1d9   : > { %v7619_v45 = vpop.f32.mrb[34].mxu0  ;;  %v5976_v47 = vpop.f32.mrb[9].mxu1  ;;  %6183 = vmatmul.mubr.msk.f32.gmra.mrb[114].mxu1 %vm385_vm3, %v1883_v46 }
 0x1da   : > { %v6137_v48 = vpop.f32.mrb[35].mxu0  ;;  %6185 = vmatprep.mubr.msk.f32.mxu1 %vm6912_vm5, %v8593_v4 }
 0x1db   : > { %v2277_v48 = vld [vmem:[#allocation2 + $0x51] ss:$2 sm:$0xff] }
 0x1dc   : > { %v7624_v49 = vpop.f32.mrb[10].mxu1 }
 0x1dd   : > { %v7626_v50 = vpop.f32.mrb[36].mxu0  ;;  %v5979_v52 = vpop.f32.mrb[11].mxu1  ;;  %6186 = vmatmul.mubr.msk.f32.gmra.mrb[116].mxu1 %vm385_vm3, %v1884_v51 }
 0x1de   : > { %v6140_v53 = vpop.f32.mrb[37].mxu0  ;;  %6188 = vmatprep.mubr.msk.f32.mxu1 %vm6912_vm5, %v8593_v4 }
 0x1e0   : > { %v7631_v54 = vpop.f32.mrb[12].mxu1 }
 0x1e1   : > { %v7633_v55 = vpop.f32.mrb[38].mxu0  ;;  %v5982_v57 = vpop.f32.mrb[13].mxu1  ;;  %6189 = vmatmul.mubr.msk.f32.gmra.mrb[118].mxu1 %vm385_vm3, %v1885_v56 }
 0x1e2   : > { %v6143_v58 = vpop.f32.mrb[39].mxu0  ;;  %6191 = vmatprep.mubr.msk.f32.mxu1 %vm6912_vm5, %v8593_v4  ;;  %v2278_v57 = vld [vmem:[#allocation2 + $0x61] ss:$2 sm:$0xff] }
 0x1e4   : > { %v7638_v59 = vpop.f32.mrb[14].mxu1 }
 0x1e5   : > { %v7640_v60 = vpop.f32.mrb[40].mxu0  ;;  %v5985_v62 = vpop.f32.mrb[15].mxu1  ;;  %6192 = vmatmul.mubr.msk.f32.gmra.mrb[120].mxu1 %vm385_vm3, %v1886_v61 }
 0x1e6   : > { %v6146_v63 = vpop.f32.mrb[41].mxu0  ;;  %6194 = vmatprep.mubr.msk.f32.mxu1 %vm6912_vm5, %v8593_v4 }
 0x1e8   : > { %v7645_v0 = vpop.f32.mrb[16].mxu1 }
 0x1e9   : > { %v7647_v1 = vpop.f32.mrb[42].mxu0  ;;  %v5988_v3 = vpop.f32.mrb[17].mxu1  ;;  %6195 = vmatmul.mubr.msk.f32.gmra.mrb[122].mxu1 %vm385_vm3, %v1887_v2  ;;  %v2279_v2 = vld [vmem:[#allocation2 + $0x71] ss:$2 sm:$0xff] }
 0x1ea   : > { %v6149_v5 = vpop.f32.mrb[43].mxu0  ;;  %6197 = vmatprep.mubr.msk.f32.mxu1 %vm6912_vm5, %v8593_v4 }
 0x1ec   : > { %v7652_v6 = vpop.f32.mrb[18].mxu1 }
 0x1ed   : > { %v7654_v7 = vpop.f32.mrb[44].mxu0  ;;  %v5991_v9 = vpop.f32.mrb[19].mxu1  ;;  %6198 = vmatmul.mubr.msk.f32.gmra.mrb[124].mxu1 %vm385_vm3, %v1888_v8 }
 0x1ee   : > { %v6152_v10 = vpop.f32.mrb[45].mxu0  ;;  %6200 = vmatprep.mubr.msk.f32.mxu1 %vm6912_vm5, %v8593_v4 }
 0x1ef   : > { %v2280_v10 = vld [vmem:[#allocation2 + $0x81] ss:$2 sm:$0xff] }
 0x1f0   : > { %v7659_v11 = vpop.f32.mrb[20].mxu1 }
 0x1f1   : > { %v7661_v37 = vpop.f32.mrb[46].mxu0  ;;  %v5994_v13 = vpop.f32.mrb[21].mxu1  ;;  %6201 = vmatmul.mubr.msk.f32.gmra.mrb[126].mxu1 %vm385_vm3, %v1889_v12 }
 0x1f2   : > { %v6155_v14 = vpop.f32.mrb[47].mxu0  ;;  %6203 = vmatprep.mubr.msk.f32.mxu1 %vm6912_vm5, %v8593_v4 }
 0x1f4   : > { %v7666_v15 = vpop.f32.mrb[22].mxu1 }
 0x1f5   : > { %v7668_v16 = vpop.f32.mrb[48].mxu0  ;;  %v5997_v18 = vpop.f32.mrb[23].mxu1  ;;  %6204 = vmatmul.mubr.msk.f32.gmra.mrb[128].mxu1 %vm385_vm3, %v1891_v17 }
 0x1f6   : > { %v6158_v19 = vpop.f32.mrb[49].mxu0  ;;  %6249 = vmatprep.mubr.msk.f32.mxu1 %vm6912_vm5, %v8593_v4  ;;  %v2281_v18 = vld [vmem:[#allocation2 + $0x91] ss:$2 sm:$0xff] }
 0x1f8   : > { %v7673_v20 = vpop.f32.mrb[24].mxu1 }
 0x1f9   : > { %v7675_v21 = vpop.f32.mrb[50].mxu0  ;;  %v6000_v23 = vpop.f32.mrb[25].mxu1  ;;  %6250 = vmatmul.mubr.msk.f32.vlgmr.msra.gmra.mrb[130].mxu1 %vm385_vm3, %v2274_v22 }
 0x1fa   : > { %v6161_v24 = vpop.f32.mrb[51].mxu0  ;;  %6252 = vmatprep.mubr.msk.f32.mxu1 %vm6912_vm5, %v8593_v4 }
 0x1fc   : > { %v1208_v25 = vpop.f32.mrb[26].mxu1 }
 0x1fd   : > { %v7680_v29 = vpop.f32.mrb[52].mxu0  ;;  %v7683_v30 = vadd.f32 %v1208_v25, %v7427_v33  ;;  %v6005_v31 = vpop.f32.mrb[27].mxu1  ;;  %6253 = vmatmul.mubr.msk.f32.gmra.mrb[132].mxu1 %vm385_vm3, %v2275_v26  ;;  %v2282_v25 = vld [vmem:[#allocation2 + $0xa1] ss:$2 sm:$0xff] }
 0x1fe   : > { %v6164_v35 = vpop.f32.mrb[53].mxu0  ;;  %6255 = vmatprep.mubr.msk.f32.mxu1 %vm6912_vm5, %v8593_v4 }
 0x200   : > { %v1213_v36 = vpop.f32.mrb[28].mxu1 }
 0x201   : > { %v7688_v38 = vpop.f32.mrb[54].mxu0  ;;  %v7691_v42 = vadd.f32 %v1213_v36, %v7596_v27  ;;  %v6008_v43 = vpop.f32.mrb[29].mxu1  ;;  %6256 = vmatmul.mubr.msk.f32.gmra.mrb[134].mxu1 %vm385_vm3, %v2276_v41  ;;  %v2283_v41 = vld [vmem:[#allocation2 + $0xb1] ss:$2 sm:$0xff] }
 0x202   : > { %v6210_v46 = vpop.f32.mrb[55].mxu0  ;;  %6258 = vmatprep.mubr.msk.f32.mxu1 %vm6912_vm5, %v8593_v4 }
 0x204   : > { %v1218_v33 = vpop.f32.mrb[30].mxu1 }
 0x205   : > { %v7696_v47 = vpop.f32.mrb[56].mxu0  ;;  %v7699_v51 = vadd.f32 %v1218_v33, %v7603_v32  ;;  %v6011_v52 = vpop.f32.mrb[31].mxu1  ;;  %6259 = vmatmul.mubr.msk.f32.gmra.mrb[136].mxu1 %vm385_vm3, %v2277_v48 }
 0x206   : > { %v6213_v53 = vpop.f32.mrb[57].mxu0  ;;  %6261 = vmatprep.mubr.msk.f32.mxu1 %vm6912_vm5, %v8593_v4  ;;  %v2284_v52 = vld [vmem:[#allocation2 + $0xc1] ss:$2 sm:$0xff] }
 0x208   : > { %v1223_v27 = vpop.f32.mrb[32].mxu1 }
 0x209   : > { %v7704_v56 = vpop.f32.mrb[58].mxu0  ;;  %v7707_v58 = vadd.f32 %v1223_v27, %v7610_v39  ;;  %v6014_v61 = vpop.f32.mrb[33].mxu1  ;;  %6262 = vmatmul.mubr.msk.f32.gmra.mrb[138].mxu1 %vm385_vm3, %v2278_v57 }
 0x20a   : > { %v6216_v62 = vpop.f32.mrb[59].mxu0  ;;  %6264 = vmatprep.mubr.msk.f32.mxu1 %vm6912_vm5, %v8593_v4 }
 0x20b   : > { %v2285_v62 = vld [vmem:[#allocation2 + $0xd1] ss:$2 sm:$0xff] }
 0x20c   : > { %v1228_v32 = vpop.f32.mrb[34].mxu1 }
 0x20d   : > { %v7712_v63 = vpop.f32.mrb[60].mxu0  ;;  %v7715_v3 = vadd.f32 %v1228_v32, %v7617_v44  ;;  %v6017_v5 = vpop.f32.mrb[35].mxu1  ;;  %6265 = vmatmul.mubr.msk.f32.gmra.mrb[140].mxu1 %vm385_vm3, %v2279_v2 }
 0x20e   : > { %v6219_v8 = vpop.f32.mrb[61].mxu0  ;;  %6267 = vmatprep.mubr.msk.f32.mxu1 %vm6912_vm5, %v8593_v4 }
 0x210   : > { %v1233_v39 = vpop.f32.mrb[36].mxu1 }
 0x211   : > { %v7720_v9 = vpop.f32.mrb[62].mxu0  ;;  %v7723_v12 = vadd.f32 %v1233_v39, %v7624_v49  ;;  %v6020_v13 = vpop.f32.mrb[37].mxu1  ;;  %6268 = vmatmul.mubr.msk.f32.gmra.mrb[142].mxu1 %vm385_vm3, %v2280_v10  ;;  %v2287_v39 = vld [vmem:[#allocation2 + $0xe1] ss:$2 sm:$0x7f] }
 0x212   : > { %v6222_v14 = vpop.f32.mrb[63].mxu0  ;;  %6270 = vmatprep.mubr.msk.f32.mxu1 %vm6912_vm5, %v8593_v4 }
 0x214   : > { %v1238_v44 = vpop.f32.mrb[38].mxu1 }
 0x215   : > { %v7728_v17 = vpop.f32.mrb[64].mxu0  ;;  %v7731_v19 = vadd.f32 %v1238_v44, %v7631_v54  ;;  %v6023_v22 = vpop.f32.mrb[39].mxu1  ;;  %6271 = vmatmul.mubr.msk.f32.gmra.mrb[144].mxu1 %vm385_vm3, %v2281_v18 }
 0x216   : > { %v6225_v23 = vpop.f32.mrb[65].mxu0  ;;  %6273 = vmatprep.mubr.msk.f32.mxu1 %vm6912_vm5, %v8593_v4 }
 0x218   : > { %v1243_v49 = vpop.f32.mrb[40].mxu1 }
 0x219   : > { %v7736_v24 = vpop.f32.mrb[66].mxu0  ;;  %v7739_v26 = vadd.f32 %v1243_v49, %v7638_v59  ;;  %v6026_v31 = vpop.f32.mrb[41].mxu1  ;;  %6274 = vmatmul.mubr.msk.f32.gmra.mrb[146].mxu1 %vm385_vm3, %v2282_v25 }
 0x21a   : > { %v6228_v35 = vpop.f32.mrb[67].mxu0  ;;  %6276 = vmatprep.mubr.msk.f32.mxu1 %vm6912_vm5, %v8593_v4 }
 0x21c   : > { %v1248_v54 = vpop.f32.mrb[42].mxu1 }
 0x21d   : > { %v7744_v36 = vpop.f32.mrb[68].mxu0  ;;  %v7747_v43 = vadd.f32 %v1248_v54, %v7645_v0  ;;  %v6029_v46 = vpop.f32.mrb[43].mxu1  ;;  %6277 = vmatmul.mubr.msk.f32.gmra.mrb[148].mxu1 %vm385_vm3, %v2283_v41 }
 0x21e   : > { %v6231_v33 = vpop.f32.mrb[69].mxu0  ;;  %6279 = vmatprep.mubr.msk.f32.mxu1 %vm6912_vm5, %v8593_v4 }
 0x220   : > { %v1253_v59 = vpop.f32.mrb[44].mxu1 }
 0x221   : > { %v7752_v48 = vpop.f32.mrb[70].mxu0  ;;  %v7755_v53 = vadd.f32 %v1253_v59, %v7652_v6  ;;  %v6032_v27 = vpop.f32.mrb[45].mxu1  ;;  %6280 = vmatmul.mubr.msk.f32.gmra.mrb[150].mxu1 %vm385_vm3, %v2284_v52 }
 0x222   : > { %v6234_v57 = vpop.f32.mrb[71].mxu0  ;;  %6282 = vmatprep.mubr.msk.f32.mxu1 %vm6912_vm5, %v8593_v4 }
 0x224   : > { %v1258_v0 = vpop.f32.mrb[46].mxu1 }
 0x225   : > { %v7760_v61 = vpop.f32.mrb[72].mxu0  ;;  %v7763_v32 = vadd.f32 %v1258_v0, %v7659_v11  ;;  %v6035_v2 = vpop.f32.mrb[47].mxu1  ;;  %6283 = vmatmul.mubr.msk.f32.gmra.mrb[152].mxu1 %vm385_vm3, %v2285_v62  ;;  %v5440_v62 = vld [vmem:[%s8588_s7 + $0x18] sm:$0xff] }
 0x226   : > { %v6237_v5 = vpop.f32.mrb[73].mxu0  ;;  %6285 = vmatprep.mubr.msk.f32.mxu1 %vm6912_vm5, %v8593_v4 }
 0x228   : > { %v1263_v6 = vpop.f32.mrb[48].mxu1 }
 0x229   : > { %v7768_v8 = vpop.f32.mrb[74].mxu0  ;;  %v7771_v10 = vadd.f32 %v1263_v6, %v7666_v15  ;;  %v6038_v13 = vpop.f32.mrb[49].mxu1  ;;  %6286 = vmatmul.mubr.msk.f32.gmra.mrb[154].mxu1 %vm385_vm3, %v2287_v39 }
 0x22a   : > { %v6240_v14 = vpop.f32.mrb[75].mxu0  ;;  %6333 = vmatprep.mubr.msk.f32.mxu1 %vm6912_vm5, %v8593_v4  ;;  %v2759_v4 = vld [vmem:[#allocation3 + $0x1] ss:$2 sm:$0xff] }
 0x22c   : > { %v1268_v11 = vpop.f32.mrb[50].mxu1 }
 0x22d   : > { %v7776_v44 = vpop.f32.mrb[76].mxu0  ;;  %v7779_v18 = vadd.f32 %v1268_v11, %v7673_v20  ;;  %v6041_v22 = vpop.f32.mrb[51].mxu1 }
 0x22e   : > { %v6243_v23 = vpop.f32.mrb[77].mxu0 }
 0x230   : > { %v1405_v49 = vpop.f32.mrb[52].mxu1 }
 0x231   : > { %v7781_v25 = vpop.f32.mrb[78].mxu0  ;;  %v7784_v15 = vadd.f32 %v1405_v49, %v7683_v30  ;;  %v6046_v31 = vpop.f32.mrb[53].mxu1  ;;  %v5439_v30 = vld [vmem:[%s8588_s7 + $0x10] sm:$0xff] }
 0x232   : > { %v6246_v35 = vpop.f32.mrb[79].mxu0  ;;  %v6737_v2 = vpack.c.bf16 %v5440_v62, %v5439_v30 }
 0x234   : > { %v1410_v54 = vpop.f32.mrb[54].mxu1 }
 0x235   : > { %v7786_v41 = vpop.f32.mrb[80].mxu0  ;;  %v7789_v46 = vadd.f32 %v1410_v54, %v7691_v42  ;;  %v6049_v33 = vpop.f32.mrb[55].mxu1  ;;  %v8595_v42 = vmov 0.0|0.0  }
 0x236   : > { %v6292_v59 = vpop.f32.mrb[81].mxu0  ;;  %6736 = vmatprep.subr.bf16.mxu1 %v8595_v42  ;;  %6739 = vmatprep.subr.bf16.mxu0 %v8595_v42 }
 0x237   : > { %6738 = vmatpush3.bf16.msra.mxu1 %v6737_v2 }
 0x238   : > { %v1415_v20 = vpop.f32.mrb[56].mxu1  ;;  %6742 = vmatprep.subr.bf16.mxu1 %v8595_v42 }
 0x239   : > { %v7791_v52 = vpop.f32.mrb[82].mxu0  ;;  %v7794_v27 = vadd.f32 %v1415_v20, %v7699_v51  ;;  %v6052_v57 = vpop.f32.mrb[57].mxu1 }
 0x23a   : > { %v6295_v0 = vpop.f32.mrb[83].mxu0  ;;  %6334 = vmatmul.mubr.msk.f32.vlgmr.msra.gmra.mrb[156].mxu1 %vm418_vm6, %v2759_v4 }
 0x23c   : > { %v1420_v5 = vpop.f32.mrb[58].mxu1 }
 0x23d   : > { %v7804_v6 = vpop.f32.mrb[84].mxu0  ;;  %v7807_v51 = vadd.f32 %v1420_v5, %v7707_v58  ;;  %v6055_v39 = vpop.f32.mrb[59].mxu1 }
 0x23e   : > { %v6298_v13 = vpop.f32.mrb[85].mxu0 }
 0x240   : > { %v1425_v14 = vpop.f32.mrb[60].mxu1 }
 0x241   : > { %v7810_v11 = vpop.f32.mrb[86].mxu0  ;;  %v7813_v22 = vadd.f32 %v1425_v14, %v7715_v3  ;;  %v6058_v23 = vpop.f32.mrb[61].mxu1 }
 0x242   : > { %v6301_v49 = vpop.f32.mrb[87].mxu0 }
 0x244   : > { %v1430_v31 = vpop.f32.mrb[62].mxu1 }
 0x245   : > { %v7815_v35 = vpop.f32.mrb[88].mxu0  ;;  %v7818_v54 = vadd.f32 %v1430_v31, %v7723_v12  ;;  %v6061_v58 = vpop.f32.mrb[63].mxu1 }
 0x246   : > { %v6304_v33 = vpop.f32.mrb[89].mxu0 }
 0x248   : > { %v1435_v59 = vpop.f32.mrb[64].mxu1 }
 0x249   : > { %v7820_v20 = vpop.f32.mrb[90].mxu0  ;;  %v7823_v57 = vadd.f32 %v1435_v59, %v7731_v19  ;;  %v6064_v0 = vpop.f32.mrb[65].mxu1 }
 0x24a   : > { %v6307_v30 = vpop.f32.mrb[91].mxu0 }
 0x24c   : > { %v1440_v3 = vpop.f32.mrb[66].mxu1 }
 0x24d   : > { %v7861_v12 = vpop.f32.mrb[92].mxu0  ;;  %v7864_v19 = vadd.f32 %v1440_v3, %v7739_v26  ;;  %v6067_v62 = vpop.f32.mrb[67].mxu1 }
 0x24e   : > { %v6310_v2 = vpop.f32.mrb[93].mxu0 }
 0x250   : > { %v1445_v5 = vpop.f32.mrb[68].mxu1 }
 0x251   : > { %v7866_v39 = vpop.f32.mrb[94].mxu0  ;;  %v7869_v13 = vadd.f32 %v1445_v5, %v7747_v43  ;;  %v6070_v14 = vpop.f32.mrb[69].mxu1  ;;  %v2756_v5 = vld [vmem:[%s8588_s7] sm:$0xff] }
 0x252   : > { %v6313_v23 = vpop.f32.mrb[95].mxu0 }
 0x254   : > { %v1450_v49 = vpop.f32.mrb[70].mxu1 }
 0x255   : > { %v7871_v31 = vpop.f32.mrb[96].mxu0  ;;  %v7874_v58 = vadd.f32 %v1450_v49, %v7755_v53  ;;  %v6073_v33 = vpop.f32.mrb[71].mxu1  ;;  %v2757_v53 = vld [vmem:[%s8588_s7 + $0x8] sm:$0xff] }
 0x256   : > { %v6316_v59 = vpop.f32.mrb[97].mxu0 }
 0x258   : > { %v1455_v26 = vpop.f32.mrb[72].mxu1 }
 0x259   : > { %v7876_v0 = vpop.f32.mrb[98].mxu0  ;;  %v7879_v30 = vadd.f32 %v1455_v26, %v7763_v32  ;;  %v6076_v3 = vpop.f32.mrb[73].mxu1  ;;  %v6740_v32 = vpack.c.bf16 %v2757_v53, %v2756_v5 }
 0x25a   : > { %8600 = vst [vmem:[#allocation4_spill] sm:$0xff] %v7876_v0  ;;  %v6319_v62 = vpop.f32.mrb[99].mxu0 }
 0x25b   : > { %6741 = vmatpush3.bf16.msra.mxu0 %v6740_v32 }
 0x25c   : > { %v1460_v43 = vpop.f32.mrb[74].mxu1  ;;  %6745 = vmatprep.subr.bf16.mxu0 %v8595_v42 }
 0x25d   : > { %v7881_v2 = vpop.f32.mrb[100].mxu0  ;;  %v7890_v14 = vadd.f32 %v1460_v43, %v7771_v10  ;;  %v6079_v23 = vpop.f32.mrb[75].mxu1  ;;  %v8603_v10 = vmov 0.0  }
 0x25e   : > { %8601 = vst [vmem:[#allocation5_spill] sm:$0xff] %v7881_v2  ;;  %v6322_v49 = vpop.f32.mrb[101].mxu0  ;;  %v2743_v2 = vld [vmem:[#allocation3] ss:$2 sm:$0xff]  ;;  %6336 = vmatprep.mubr.msk.f32.mxu1 %vm6912_vm5, %v8603_v10 }
 0x25f   : > { %6359 = vmatmul.mubr.msk.f32.vlgmr.msra.gmra.mrb[106].mxu0 %vm418_vm6, %v2743_v2 }
 0x260   : > { %v1465_v33 = vpop.f32.mrb[76].mxu1  ;;  %6361 = vmatprep.mubr.msk.f32.mxu0 %vm6912_vm5, %v8603_v10 }
 0x261   : > { %v7892_v59 = vpop.f32.mrb[102].mxu0  ;;  %v7896_v26 = vadd.f32 %v1465_v33, %v7779_v18  ;;  %v6082_v3 = vpop.f32.mrb[77].mxu1 }
 0x262   : > { %8602 = vst [vmem:[#allocation6_spill] sm:$0xff] %v7892_v59  ;;  %v6325_v62 = vpop.f32.mrb[103].mxu0 }
 0x264   : > { %v1603_v43 = vpop.f32.mrb[78].mxu1 }
 0x265   : > { %v7904_v5 = vpop.f32.mrb[104].mxu0  ;;  %v1667_v18 = vadd.f32 %v1603_v43, %v7784_v15  ;;  %v6087_v53 = vpop.f32.mrb[79].mxu1 }
 0x266   : > { %8604 = vst [vmem:[#allocation7_spill] sm:$0xff] %v7904_v5  ;;  %v6328_v23 = vpop.f32.mrb[105].mxu0 }
 0x267   : > { %v1865_v49 = vadd.f32 %v7598_v28, %v1667_v18 }
 0x268   : > { %v1608_v32 = vpop.f32.mrb[80].mxu1 }
 0x269   : > { %v1668_v4 = vadd.f32 %v1608_v32, %v7789_v46  ;;  %v6090_v33 = vpop.f32.mrb[81].mxu1 }
 0x26b   : > { %v1866_v2 = vadd.f32 %v7605_v34, %v1668_v4  ;;  %v5455_v34 = vld [vmem:[%s8588_s7 + $0x20] sm:$0xff] }
 0x26c   : > { %v1613_v3 = vpop.f32.mrb[82].mxu1 }
 0x26d   : > { %v1669_v62 = vadd.f32 %v1613_v3, %v7794_v27  ;;  %v6093_v42 = vpop.f32.mrb[83].mxu1 }
 0x26f   : > { %v1867_v59 = vadd.f32 %v7612_v40, %v1669_v62  ;;  %v5456_v40 = vld [vmem:[%s8588_s7 + $0x28] sm:$0xff] }
 0x270   : > { %v1618_v0 = vpop.f32.mrb[84].mxu1  ;;  %v6743_v42 = vpack.c.bf16 %v5456_v40, %v5455_v34 }
 0x271   : > { %v1670_v5 = vadd.f32 %v1618_v0, %v7807_v51  ;;  %v6096_v15 = vpop.f32.mrb[85].mxu1 }
 0x272   : > { %6744 = vmatpush3.bf16.msra.mxu1 %v6743_v42 }
 0x273   : > { %v1868_v43 = vadd.f32 %v7619_v45, %v1670_v5 }
 0x274   : > { %v1623_v53 = vpop.f32.mrb[86].mxu1 }
 0x275   : > { %v1671_v28 = vadd.f32 %v1623_v53, %v7813_v22  ;;  %v6099_v18 = vpop.f32.mrb[87].mxu1  ;;  %v8605_v22 = vmov 0.0|0.0  }
 0x276   : > { %6748 = vmatprep.subr.bf16.mxu1 %v8605_v22 }
 0x277   : > { %v1869_v46 = vadd.f32 %v7626_v50, %v1671_v28  ;;  %v5464_v28 = vld [vmem:[%s8588_s7 + $0x30] sm:$0xff] }
 0x278   : > { %v1628_v27 = vpop.f32.mrb[88].mxu1 }
 0x279   : > { %v1672_v51 = vadd.f32 %v1628_v27, %v7818_v54  ;;  %v6102_v0 = vpop.f32.mrb[89].mxu1 }
 0x27b   : > { %v1870_v45 = vadd.f32 %v7633_v55, %v1672_v51 }
 0x27c   : > { %v1633_v5 = vpop.f32.mrb[90].mxu1 }
 0x27d   : > { %v1673_v50 = vadd.f32 %v1633_v5, %v7823_v57  ;;  %v6105_v23 = vpop.f32.mrb[91].mxu1 }
 0x27f   : > { %v1871_v32 = vadd.f32 %v7640_v60, %v1673_v50  ;;  %v5465_v60 = vld [vmem:[%s8588_s7 + $0x38] sm:$0xff] }
 0x280   : > { %v1638_v4 = vpop.f32.mrb[92].mxu1  ;;  %v6746_v18 = vpack.c.bf16 %v5465_v60, %v5464_v28 }
 0x281   : > { %v1674_v33 = vadd.f32 %v1638_v4, %v7864_v19  ;;  %v6108_v3 = vpop.f32.mrb[93].mxu1 }
 0x282   : > { %6747 = vmatpush3.bf16.msra.mxu0 %v6746_v18 }
 0x283   : > { %v1872_v62 = vadd.f32 %v7647_v1, %v1674_v33  ;;  %6751 = vmatprep.subr.bf16.mxu0 %v8605_v22 }
 0x284   : > { %v1643_v15 = vpop.f32.mrb[94].mxu1 }
 0x285   : > { %v1675_v54 = vadd.f32 %v1643_v15, %v7869_v13  ;;  %v6111_v53 = vpop.f32.mrb[95].mxu1 }
 0x287   : > { %v1873_v55 = vadd.f32 %v7654_v7, %v1675_v54 }
 0x288   : > { %v1648_v57 = vpop.f32.mrb[96].mxu1 }
 0x289   : > { %v1676_v19 = vadd.f32 %v1648_v57, %v7874_v58  ;;  %v6114_v34 = vpop.f32.mrb[97].mxu1 }
 0x28b   : > { %v1874_v1 = vadd.f32 %v7661_v37, %v1676_v19 }
 0x28c   : > { %v1653_v13 = vpop.f32.mrb[98].mxu1 }
 0x28d   : > { %v1677_v7 = vadd.f32 %v1653_v13, %v7879_v30  ;;  %v6117_v40 = vpop.f32.mrb[99].mxu1 }
 0x28f   : > { %v1875_v27 = vadd.f32 %v7668_v16, %v1677_v7 }
 0x290   : > { %v1658_v42 = vpop.f32.mrb[100].mxu1 }
 0x291   : > { %v1678_v51 = vadd.f32 %v1658_v42, %v7890_v14  ;;  %v6120_v0 = vpop.f32.mrb[101].mxu1 }
 0x293   : > { %v1876_v5 = vadd.f32 %v7675_v21, %v1678_v51 }
 0x294   : > { %v1663_v50 = vpop.f32.mrb[102].mxu1 }
 0x295   : > { %v1679_v58 = vadd.f32 %v1663_v50, %v7896_v26  ;;  %v6123_v23 = vpop.f32.mrb[103].mxu1 }
 0x297   : > { %v1877_v37 = vadd.f32 %v7680_v29, %v1679_v58 }
 0x298   : > { %v1999_v4 = vpop.f32.mrb[104].mxu1 }
 0x299   : > { %v2063_v33 = vadd.f32 %v1999_v4, %v1865_v49  ;;  %v6169_v3 = vpop.f32.mrb[105].mxu1 }
 0x29b   : > { %v2261_v30 = vadd.f32 %v7688_v38, %v2063_v33 }
 0x29c   : > { %v2004_v15 = vpop.f32.mrb[106].mxu1 }
 0x29d   : > { %v2064_v54 = vadd.f32 %v2004_v15, %v1866_v2  ;;  %v6172_v16 = vpop.f32.mrb[107].mxu1 }
 0x29f   : > { %v2262_v53 = vadd.f32 %v7696_v47, %v2064_v54 }
 0x2a0   : > { %v2009_v14 = vpop.f32.mrb[108].mxu1 }
 0x2a1   : > { %v2065_v28 = vadd.f32 %v2009_v14, %v1867_v59  ;;  %v6175_v60 = vpop.f32.mrb[109].mxu1 }
 0x2a3   : > { %v2263_v21 = vadd.f32 %v7704_v56, %v2065_v28 }
 0x2a4   : > { %v2014_v57 = vpop.f32.mrb[110].mxu1 }
 0x2a5   : > { %v2066_v26 = vadd.f32 %v2014_v57, %v1868_v43  ;;  %v6178_v18 = vpop.f32.mrb[111].mxu1 }
 0x2a7   : > { %v2264_v29 = vadd.f32 %v7712_v63, %v2066_v26 }
 0x2a8   : > { %v2019_v19 = vpop.f32.mrb[112].mxu1 }
 0x2a9   : > { %v2067_v49 = vadd.f32 %v2019_v19, %v1869_v46  ;;  %v6181_v34 = vpop.f32.mrb[113].mxu1 }
 0x2ab   : > { %v7951_v38 = vadd.f32 %v7720_v9, %v2067_v49 }
 0x2ac   : > { %v2024_v2 = vpop.f32.mrb[114].mxu1 }
 0x2ad   : > { %v2068_v13 = vadd.f32 %v2024_v2, %v1870_v45  ;;  %v6184_v7 = vpop.f32.mrb[115].mxu1 }
 0x2af   : > { %v7954_v47 = vadd.f32 %v7728_v17, %v2068_v13 }
 0x2b0   : > { %v2029_v59 = vpop.f32.mrb[116].mxu1 }
 0x2b1   : > { %v2069_v40 = vadd.f32 %v2029_v59, %v1871_v32  ;;  %v6187_v56 = vpop.f32.mrb[117].mxu1 }
 0x2b3   : > { %v7957_v43 = vadd.f32 %v7736_v24, %v2069_v40 }
 0x2b4   : > { %v2034_v42 = vpop.f32.mrb[118].mxu1 }
 0x2b5   : > { %v2070_v63 = vadd.f32 %v2034_v42, %v1872_v62  ;;  %v6190_v51 = vpop.f32.mrb[119].mxu1 }
 0x2b7   : > { %v7960_v46 = vadd.f32 %v7744_v36, %v2070_v63 }
 0x2b8   : > { %v2039_v9 = vpop.f32.mrb[120].mxu1 }
 0x2b9   : > { %v2071_v0 = vadd.f32 %v2039_v9, %v1873_v55  ;;  %v6193_v50 = vpop.f32.mrb[121].mxu1 }
 0x2bb   : > { %v7963_v45 = vadd.f32 %v7752_v48, %v2071_v0 }
 0x2bc   : > { %v2044_v17 = vpop.f32.mrb[122].mxu1 }
 0x2bd   : > { %v2072_v58 = vadd.f32 %v2044_v17, %v1874_v1  ;;  %v6196_v23 = vpop.f32.mrb[123].mxu1 }
 0x2bf   : > { %v7966_v32 = vadd.f32 %v7760_v61, %v2072_v58 }
 0x2c0   : > { %v2049_v24 = vpop.f32.mrb[124].mxu1 }
 0x2c1   : > { %v2073_v4 = vadd.f32 %v2049_v24, %v1875_v27  ;;  %v6199_v33 = vpop.f32.mrb[125].mxu1 }
 0x2c3   : > { %v7969_v62 = vadd.f32 %v7768_v8, %v2073_v4  ;;  %v7980_v8 = vld [vmem:[%s8586_s5] ss:$0 sm:$0xff] }
 0x2c4   : > { %v2054_v36 = vpop.f32.mrb[126].mxu1 }
 0x2c5   : > { %v2074_v3 = vadd.f32 %v2054_v36, %v1876_v5  ;;  %v6202_v15 = vpop.f32.mrb[127].mxu1 }
 0x2c7   : > { %v7972_v55 = vadd.f32 %v7776_v44, %v2074_v3 }
 0x2c8   : > { %v2059_v48 = vpop.f32.mrb[128].mxu1 }
 0x2c9   : > { %v2075_v54 = vadd.f32 %v2059_v48, %v1877_v37  ;;  %v6205_v16 = vpop.f32.mrb[129].mxu1 }
 0x2cb   : > { %v7975_v1 = vadd.f32 %v7781_v25, %v2075_v54  ;;  %v2703_v25 = vld [vmem:[%s8587_s6] sm:$0xff] }
 0x2cc   : > { %v2395_v61 = vpop.f32.mrb[130].mxu1 }
 0x2cd   : > { %v2459_v14 = vadd.f32 %v2395_v61, %v2261_v30  ;;  %v6251_v28 = vpop.f32.mrb[131].mxu1 }
 0x2cf   : > { %v2657_v27 = vadd.f32 %v7786_v41, %v2459_v14  ;;  %v2704_v41 = vld [vmem:[%s8587_s6 + $0x8] sm:$0xff] }
 0x2d0   : > { %v2400_v5 = vpop.f32.mrb[132].mxu1 }
 0x2d1   : > { %v2677_v44 = vadd.f32 %v7980_v8, %v2657_v27  ;;  %v2460_v60 = vadd.f32 %v2400_v5, %v2262_v53  ;;  %v6254_v57 = vpop.f32.mrb[133].mxu1 }
 0x2d3   : > { %v2690_v37 = vmax.f32 %v2677_v44, 0.0  ;;  %v2658_v30 = vadd.f32 %v7791_v52, %v2460_v60 }
 0x2d4   : > { %v2405_v26 = vpop.f32.mrb[134].mxu1 }
 0x2d5   : > { %v2716_v18 = vmul.f32 %v2703_v25, %v2690_v37  ;;  %v2678_v19 = vadd.f32 %v7980_v8, %v2658_v30  ;;  %v2461_v49 = vadd.f32 %v2405_v26, %v2263_v21  ;;  %v6257_v34 = vpop.f32.mrb[135].mxu1  ;;  %v2705_v21 = vld [vmem:[%s8587_s6 + $0x10] sm:$0xff] }
 0x2d7   : > { %2729 = vst.msk [vmem:[#allocation3 + $0x11] sm:$0xff] %vm418_vm6, %v2716_v18  ;;  %v2691_v53 = vmax.f32 %v2678_v19, 0.0  ;;  %v2659_v2 = vadd.f32 %v7804_v6, %v2461_v49 }
 0x2d8   : > { %v2410_v13 = vpop.f32.mrb[136].mxu1 }
 0x2d9   : > { %v2717_v7 = vmul.f32 %v2704_v41, %v2691_v53  ;;  %v2679_v59 = vadd.f32 %v7980_v8, %v2659_v2  ;;  %v2462_v52 = vadd.f32 %v2410_v13, %v2264_v29  ;;  %v6260_v40 = vpop.f32.mrb[137].mxu1  ;;  %v2706_v29 = vld [vmem:[%s8587_s6 + $0x18] sm:$0xff] }
 0x2db   : > { %2730 = vst.msk [vmem:[#allocation3 + $0x19] sm:$0xff] %vm418_vm6, %v2717_v7  ;;  %v2692_v56 = vmax.f32 %v2679_v59, 0.0  ;;  %v2660_v42 = vadd.f32 %v7810_v11, %v2462_v52 }
 0x2dc   : > { %v2415_v63 = vpop.f32.mrb[138].mxu1 }
 0x2dd   : > { %v2718_v51 = vmul.f32 %v2705_v21, %v2692_v56  ;;  %v2680_v9 = vadd.f32 %v7980_v8, %v2660_v42  ;;  %v2463_v6 = vadd.f32 %v2415_v63, %v7951_v38  ;;  %v6263_v0 = vpop.f32.mrb[139].mxu1  ;;  %v2707_v38 = vld [vmem:[%s8587_s6 + $0x20] sm:$0xff]  ;;  %v8606_v21 = vld [vmem:[#allocation4_spill] sm:$0xff] }
 0x2de   : > { %v8607_v0 = vld [vmem:[#allocation5_spill] sm:$0xff] }
 0x2df   : > { %2731 = vst.msk [vmem:[#allocation3 + $0x21] sm:$0xff] %vm418_vm6, %v2718_v51  ;;  %v2693_v50 = vmax.f32 %v2680_v9, 0.0  ;;  %v2661_v17 = vadd.f32 %v7815_v35, %v2463_v6  ;;  %v2712_v9 = vld [vmem:[%s8587_s6 + $0x48] sm:$0xff] }
 0x2e0   : > { %v2420_v58 = vpop.f32.mrb[140].mxu1 }
 0x2e1   : > { %v2719_v23 = vmul.f32 %v2706_v29, %v2693_v50  ;;  %v2681_v11 = vadd.f32 %v7980_v8, %v2661_v17  ;;  %v2464_v24 = vadd.f32 %v2420_v58, %v7954_v47  ;;  %v6266_v4 = vpop.f32.mrb[141].mxu1 }
 0x2e2   : > { %v2761_v33 = vld [vmem:[#allocation3 + $0x11] ss:$2 sm:$0xff]  ;;  %v2745_v36 = vld [vmem:[#allocation3 + $0x10] ss:$2 sm:$0xff] }
 0x2e3   : > { %2732 = vst.msk [vmem:[#allocation3 + $0x29] sm:$0xff] %vm418_vm6, %v2719_v23  ;;  %v2694_v3 = vmax.f32 %v2681_v11, 0.0  ;;  %v2662_v15 = vadd.f32 %v7820_v20, %v2464_v24  ;;  %6337 = vmatmul.mubr.msk.f32.gmra.mrb[158].mxu1 %vm418_vm6, %v2761_v33  ;;  %6362 = vmatmul.mubr.msk.f32.gmra.mrb[108].mxu0 %vm418_vm6, %v2745_v36  ;;  %v2708_v20 = vld [vmem:[%s8587_s6 + $0x28] sm:$0xff]  ;;  %v8608_v33 = vld [vmem:[#allocation6_spill] sm:$0xff] }
 0x2e4   : > { %v2425_v35 = vpop.f32.mrb[142].mxu1  ;;  %6339 = vmatprep.mubr.msk.f32.mxu1 %vm6912_vm5, %v8603_v10  ;;  %6364 = vmatprep.mubr.msk.f32.mxu0 %vm6912_vm5, %v8603_v10 }
 0x2e5   : > { %v2720_v47 = vmul.f32 %v2707_v38, %v2694_v3  ;;  %v2682_v48 = vadd.f32 %v7980_v8, %v2662_v15  ;;  %v2465_v54 = vadd.f32 %v2425_v35, %v7957_v43  ;;  %v6269_v16 = vpop.f32.mrb[143].mxu1  ;;  %v2709_v43 = vld [vmem:[%s8587_s6 + $0x30] sm:$0xff] }
 0x2e6   : > { %v8609_v16 = vld [vmem:[#allocation7_spill] sm:$0xff] }
 0x2e7   : > { %2733 = vst.msk [vmem:[#allocation3 + $0x31] sm:$0xff] %vm418_vm6, %v2720_v47  ;;  %v2695_v61 = vmax.f32 %v2682_v48, 0.0  ;;  %v2663_v14 = vadd.f32 %v7861_v12, %v2465_v54  ;;  %v2714_v48 = vld [vmem:[%s8587_s6 + $0x58] sm:$0xff] }
 0x2e8   : > { %v2430_v28 = vpop.f32.mrb[144].mxu1 }
 0x2e9   : > { %v2721_v27 = vmul.f32 %v2708_v20, %v2695_v61  ;;  %v2683_v5 = vadd.f32 %v7980_v8, %v2663_v14  ;;  %v2466_v44 = vadd.f32 %v2430_v28, %v7960_v46  ;;  %v6272_v60 = vpop.f32.mrb[145].mxu1  ;;  %v2715_v28 = vld [vmem:[%s8587_s6 + $0x60] sm:$0x7f] }
 0x2ea   : > { %v2763_v57 = vld [vmem:[#allocation3 + $0x21] ss:$2 sm:$0xff]  ;;  %v2747_v25 = vld [vmem:[#allocation3 + $0x20] ss:$2 sm:$0xff] }
 0x2eb   : > { %2734 = vst.msk [vmem:[#allocation3 + $0x39] sm:$0xff] %vm418_vm6, %v2721_v27  ;;  %v2696_v37 = vmax.f32 %v2683_v5, 0.0  ;;  %v2664_v30 = vadd.f32 %v7866_v39, %v2466_v44  ;;  %6340 = vmatmul.mubr.msk.f32.gmra.mrb[160].mxu1 %vm418_vm6, %v2763_v57  ;;  %6365 = vmatmul.mubr.msk.f32.gmra.mrb[110].mxu0 %vm418_vm6, %v2747_v25  ;;  %v2710_v39 = vld [vmem:[%s8587_s6 + $0x38] sm:$0xff]  ;;  %v5474_v60 = vld [vmem:[%s8588_s7 + $0x48] sm:$0xff] }
 0x2ec   : > { %v2435_v12 = vpop.f32.mrb[146].mxu1  ;;  %6342 = vmatprep.mubr.msk.f32.mxu1 %vm6912_vm5, %v8603_v10  ;;  %6367 = vmatprep.mubr.msk.f32.mxu0 %vm6912_vm5, %v8603_v10  ;;  %v5483_v57 = vld [vmem:[%s8588_s7 + $0x58] sm:$0xff] }
 0x2ed   : > { %v2722_v46 = vmul.f32 %v2709_v43, %v2696_v37  ;;  %v2684_v26 = vadd.f32 %v7980_v8, %v2664_v30  ;;  %v2467_v18 = vadd.f32 %v2435_v12, %v7963_v45  ;;  %v6275_v19 = vpop.f32.mrb[147].mxu1  ;;  %v2711_v45 = vld [vmem:[%s8587_s6 + $0x40] sm:$0xff]  ;;  %v5482_v43 = vld [vmem:[%s8588_s7 + $0x50] sm:$0xff] }
 0x2ee   : > { %v3012_v30 = vld [vmem:[#allocation3 + $0x2] ss:$2 sm:$0xff] }
 0x2ef   : > { %2735 = vst.msk [vmem:[#allocation3 + $0x41] sm:$0xff] %vm418_vm6, %v2722_v46  ;;  %v2697_v49 = vmax.f32 %v2684_v26, 0.0  ;;  %v2665_v34 = vadd.f32 %v7871_v31, %v2467_v18  ;;  %v6752_v46 = vpack.c.bf16 %v5483_v57, %v5482_v43  ;;  %v3150_v26 = vld [vmem:[#allocation3 + $0x10] ss:$2 sm:$0xff]  ;;  %v3151_v19 = vld [vmem:[#allocation3 + $0x20] ss:$2 sm:$0xff] }
 0x2f0   : > { %v2440_v41 = vpop.f32.mrb[148].mxu1  ;;  %v3014_v18 = vld [vmem:[#allocation3 + $0x12] ss:$2 sm:$0xff]  ;;  %v3815_v43 = vld [vmem:[#allocation3 + $0x22] ss:$2 sm:$0xff] }
 0x2f1   : > { %v2723_v53 = vmul.f32 %v2710_v39, %v2697_v49  ;;  %v2685_v2 = vadd.f32 %v7980_v8, %v2665_v34  ;;  %v2468_v13 = vadd.f32 %v2440_v41, %v7966_v32  ;;  %v6278_v7 = vpop.f32.mrb[149].mxu1  ;;  %v3016_v39 = vld [vmem:[#allocation3 + $0x22] ss:$2 sm:$0xff] }
 0x2f2   : > { %v2765_v59 = vld [vmem:[#allocation3 + $0x31] ss:$2 sm:$0xff]  ;;  %v2749_v52 = vld [vmem:[#allocation3 + $0x30] ss:$2 sm:$0xff] }
 0x2f3   : > { %2736 = vst.msk [vmem:[#allocation3 + $0x49] sm:$0xff] %vm418_vm6, %v2723_v53  ;;  %v2698_v40 = vmax.f32 %v2685_v2, 0.0  ;;  %v2666_v56 = vadd.f32 %v8606_v21, %v2468_v13  ;;  %6343 = vmatmul.mubr.msk.f32.gmra.mrb[162].mxu1 %vm418_vm6, %v2765_v59  ;;  %6368 = vmatmul.mubr.msk.f32.gmra.mrb[112].mxu0 %vm418_vm6, %v2749_v52  ;;  %v3152_v49 = vld [vmem:[#allocation3 + $0x30] ss:$2 sm:$0xff]  ;;  %v5492_v59 = vld [vmem:[%s8588_s7 + $0x68] sm:$0xff] }
 0x2f4   : > { %v2445_v31 = vpop.f32.mrb[150].mxu1  ;;  %6345 = vmatprep.mubr.msk.f32.mxu1 %vm6912_vm5, %v8603_v10  ;;  %6370 = vmatprep.mubr.msk.f32.mxu0 %vm6912_vm5, %v8603_v10  ;;  %v3018_v34 = vld [vmem:[#allocation3 + $0x32] ss:$2 sm:$0xff] }
 0x2f5   : > { %v2724_v32 = vmul.f32 %v2711_v45, %v2698_v40  ;;  %v2686_v42 = vadd.f32 %v7980_v8, %v2666_v56  ;;  %v2469_v63 = vadd.f32 %v2445_v31, %v7969_v62  ;;  %v6281_v51 = vpop.f32.mrb[151].mxu1  ;;  %v2713_v62 = vld [vmem:[%s8587_s6 + $0x50] sm:$0xff]  ;;  %v5491_v45 = vld [vmem:[%s8588_s7 + $0x60] sm:$0xff]  ;;  %v5501_v40 = vld [vmem:[%s8588_s7 + $0x78] sm:$0xff] }
 0x2f6   : > { %v5500_v52 = vld [vmem:[%s8588_s7 + $0x70] sm:$0xff]  ;;  %v6755_v31 = vpack.c.bf16 %v5492_v59, %v5491_v45  ;;  %v3284_v51 = vld [vmem:[#allocation3 + $0x21] ss:$2 sm:$0xff] }
 0x2f7   : > { %2737 = vst.msk [vmem:[#allocation3 + $0x51] sm:$0xff] %vm418_vm6, %v2724_v32  ;;  %v2699_v6 = vmax.f32 %v2686_v42, 0.0  ;;  %v2667_v29 = vadd.f32 %v8607_v0, %v2469_v63  ;;  %v6758_v32 = vpack.c.bf16 %v5501_v40, %v5500_v52  ;;  %v3283_v42 = vld [vmem:[#allocation3 + $0x11] ss:$2 sm:$0xff]  ;;  %v3416_v63 = vld [vmem:[#allocation3 + $0x12] ss:$2 sm:$0xff] }
 0x2f8   : > { %v2450_v50 = vpop.f32.mrb[152].mxu1  ;;  %v3418_v0 = vld [vmem:[#allocation3 + $0x32] ss:$2 sm:$0xff] }
 0x2f9   : > { %v2725_v17 = vmul.f32 %v2712_v9, %v2699_v6  ;;  %v2687_v58 = vadd.f32 %v7980_v8, %v2667_v29  ;;  %v2470_v23 = vadd.f32 %v2450_v50, %v7972_v55  ;;  %v6284_v11 = vpop.f32.mrb[153].mxu1  ;;  %v3417_v9 = vld [vmem:[#allocation3 + $0x22] ss:$2 sm:$0xff]  ;;  %v3285_v6 = vld [vmem:[#allocation3 + $0x31] ss:$2 sm:$0xff] }
 0x2fa   : > { %v2767_v24 = vld [vmem:[#allocation3 + $0x41] ss:$2 sm:$0xff]  ;;  %v2751_v4 = vld [vmem:[#allocation3 + $0x40] ss:$2 sm:$0xff] }
 0x2fb   : > { %2738 = vst.msk [vmem:[#allocation3 + $0x59] sm:$0xff] %vm418_vm6, %v2725_v17  ;;  %v2700_v38 = vmax.f32 %v2687_v58, 0.0  ;;  %v2668_v36 = vadd.f32 %v8608_v33, %v2470_v23  ;;  %6346 = vmatmul.mubr.msk.f32.gmra.mrb[164].mxu1 %vm418_vm6, %v2767_v24  ;;  %6371 = vmatmul.mubr.msk.f32.gmra.mrb[114].mxu0 %vm418_vm6, %v2751_v4  ;;  %v3153_v41 = vld [vmem:[#allocation3 + $0x40] ss:$2 sm:$0xff]  ;;  %v3286_v29 = vld [vmem:[#allocation3 + $0x41] ss:$2 sm:$0xff] }
 0x2fc   : > { %v2455_v3 = vpop.f32.mrb[154].mxu1  ;;  %6348 = vmatprep.mubr.msk.f32.mxu1 %vm6912_vm5, %v8603_v10  ;;  %6373 = vmatprep.mubr.msk.f32.mxu0 %vm6912_vm5, %v8603_v10  ;;  %v3020_v53 = vld [vmem:[#allocation3 + $0x42] ss:$2 sm:$0xff]  ;;  %v3816_v57 = vld [vmem:[#allocation3 + $0x32] ss:$2 sm:$0xff] }
 0x2fd   : > { %v2726_v55 = vmul.f32 %v2713_v62, %v2700_v38  ;;  %v2688_v15 = vadd.f32 %v7980_v8, %v2668_v36  ;;  %v2471_v35 = vadd.f32 %v2455_v3, %v7975_v1  ;;  %v6287_v47 = vpop.f32.mrb[155].mxu1  ;;  %v3419_v50 = vld [vmem:[#allocation3 + $0x42] ss:$2 sm:$0xff] }
 0x2fe   : > { %v5509_v36 = vld [vmem:[%s8588_s7 + $0x80] sm:$0xff]  ;;  %v5510_v3 = vld [vmem:[%s8588_s7 + $0x88] sm:$0xff] }
 0x2ff   : > { %2739 = vst.msk [vmem:[#allocation3 + $0x61] sm:$0xff] %vm418_vm6, %v2726_v55  ;;  %v2701_v54 = vmax.f32 %v2688_v15, 0.0  ;;  %v2669_v20 = vadd.f32 %v8609_v16, %v2471_v35  ;;  %v6761_v35 = vpack.c.bf16 %v5510_v3, %v5509_v36  ;;  %v3549_v47 = vld [vmem:[#allocation3 + $0x20] ss:$2 sm:$0xff]  ;;  %v3683_v16 = vld [vmem:[#allocation3 + $0x31] ss:$2 sm:$0xff] }
 0x301   : > { %v2727_v61 = vmul.f32 %v2714_v48, %v2701_v54  ;;  %v2689_v14 = vadd.f32 %v7980_v8, %v2669_v20  ;;  %v5473_v8 = vld [vmem:[%s8588_s7 + $0x40] sm:$0xff]  ;;  %v3550_v54 = vld [vmem:[#allocation3 + $0x30] ss:$2 sm:$0xff] }
 0x302   : > { %v2769_v27 = vld [vmem:[#allocation3 + $0x51] ss:$2 sm:$0xff]  ;;  %v2753_v5 = vld [vmem:[#allocation3 + $0x50] ss:$2 sm:$0xff]  ;;  %v6749_v12 = vpack.c.bf16 %v5474_v60, %v5473_v8  ;;  %v3682_v48 = vld [vmem:[#allocation3 + $0x21] ss:$2 sm:$0xff] }
 0x303   : > { %2740 = vst.msk [vmem:[#allocation3 + $0x69] sm:$0xff] %vm418_vm6, %v2727_v61  ;;  %v2702_v1 = vmax.f32 %v2689_v14, 0.0  ;;  %6349 = vmatmul.mubr.msk.f32.gmra.mrb[166].mxu1 %vm418_vm6, %v2769_v27  ;;  %6374 = vmatmul.mubr.msk.f32.gmra.mrb[116].mxu0 %vm418_vm6, %v2753_v5  ;;  %v3154_v2 = vld [vmem:[#allocation3 + $0x50] ss:$2 sm:$0xff]  ;;  %v3287_v23 = vld [vmem:[#allocation3 + $0x51] ss:$2 sm:$0xff] }
 0x304   : > { %6351 = vmatprep.mubr.msk.f32.mxu1 %vm6912_vm5, %v8603_v10  ;;  %6376 = vmatprep.mubr.msk.f32.mxu0 %vm6912_vm5, %v8603_v10  ;;  %v3022_v13 = vld [vmem:[#allocation3 + $0x52] ss:$2 sm:$0xff]  ;;  %v3684_v61 = vld [vmem:[#allocation3 + $0x41] ss:$2 sm:$0xff] }
 0x305   : > { %v2728_v44 = vmul.f32 %v2715_v28, %v2702_v1  ;;  %v3420_v11 = vld [vmem:[#allocation3 + $0x52] ss:$2 sm:$0xff]  ;;  %v3685_v28 = vld [vmem:[#allocation3 + $0x51] ss:$2 sm:$0xff] }
 0x306   : > { %v2771_v25 = vld [vmem:[#allocation3 + $0x61] ss:$2 sm:$0xf]  ;;  %v2755_v37 = vld [vmem:[#allocation3 + $0x60] ss:$2 sm:$0xf] }
 0x307   : > { %2742 = vst.msk [vmem:[#allocation3 + $0x71] sm:$0x7f] %vm2741_vm7, %v2728_v44  ;;  %6352 = vmatmul.mubr.msk.f32.gmra.mrb[168].mxu1 %vm418_vm6, %v2771_v25  ;;  %6377 = vmatmul.mubr.msk.f32.gmra.mrb[118].mxu0 %vm418_vm6, %v2755_v37  ;;  %v3024_v21 = vld [vmem:[#allocation3 + $0x62] ss:$2 sm:$0xf] }
 0x308   : > { %6383 = vmatprep.mubr.msk.f32.mxu1 %vm6912_vm5, %v8603_v10  ;;  %6408 = vmatprep.mubr.msk.f32.mxu0 %vm6912_vm5, %v8603_v10  ;;  %v3551_v20 = vld [vmem:[#allocation3 + $0x40] ss:$2 sm:$0xff]  ;;  %v3552_v14 = vld [vmem:[#allocation3 + $0x50] ss:$2 sm:$0xff] }
 0x309   : > { %v3556_v44 = vld [vmem:[#allocation3 + $0x80] ss:$2 sm:$0xf]  ;;  %v3689_v60 = vld [vmem:[#allocation3 + $0x81] ss:$2 sm:$0xf] }
 0x30a   : > { %v3155_v7 = vld [vmem:[#allocation3 + $0x60] ss:$2 sm:$0xff]  ;;  %v3288_v38 = vld [vmem:[#allocation3 + $0x61] ss:$2 sm:$0xff] }
 0x30b   : > { %6384 = vmatmul.mubr.msk.f32.vlgmr.msra.gmra.mrb[170].mxu1 %vm418_vm6, %v3012_v30  ;;  %6409 = vmatmul.mubr.msk.f32.vlgmr.msra.gmra.mrb[120].mxu0 %vm418_vm6, %v3150_v26  ;;  %v3421_v33 = vld [vmem:[#allocation3 + $0x62] ss:$2 sm:$0xff]  ;;  %v3686_v5 = vld [vmem:[#allocation3 + $0x61] ss:$2 sm:$0xff]  ;;  %v3818_v37 = vld [vmem:[#allocation3 + $0x52] ss:$2 sm:$0xff] }
 0x30c   : > { %6750 = vmatpush3.bf16.msra.mxu1 %v6749_v12  ;;  %6386 = vmatprep.mubr.msk.f32.mxu1 %vm6912_vm5, %v8603_v10  ;;  %v3553_v27 = vld [vmem:[#allocation3 + $0x60] ss:$2 sm:$0xff] }
 0x30d   : > { %6411 = vmatprep.mubr.msk.f32.mxu0 %vm6912_vm5, %v8603_v10  ;;  %6753 = vmatpush3.bf16.msra.mxu0 %v6752_v46  ;;  %v2862_v17 = vpop.f32.mrb[156].mxu1  ;;  %v3817_v25 = vld [vmem:[#allocation3 + $0x42] ss:$2 sm:$0xff] }
 0x30e   : > { %6754 = vmatprep.subr.bf16.mxu1 %v8605_v22  ;;  %6757 = vmatprep.subr.bf16.mxu0 %v8605_v22  ;;  %v3157_v56 = vld [vmem:[#allocation3 + $0x70] ss:$2 sm:$0xf]  ;;  %v6335_v24 = vpop.f32.mrb[157].mxu1  ;;  %v3687_v8 = vld [vmem:[#allocation3 + $0x71] ss:$2 sm:$0xff] }
 0x30f   : > { %6387 = vmatmul.mubr.msk.f32.gmra.mrb[172].mxu1 %vm418_vm6, %v3014_v18  ;;  %6412 = vmatmul.mubr.msk.f32.gmra.mrb[122].mxu0 %vm418_vm6, %v3151_v19  ;;  %v3290_v55 = vld [vmem:[#allocation3 + $0x71] ss:$2 sm:$0xf]  ;;  %v3423_v15 = vld [vmem:[#allocation3 + $0x72] ss:$2 sm:$0xf] }
 0x310   : > { %6389 = vmatprep.mubr.msk.f32.mxu1 %vm6912_vm5, %v8603_v10  ;;  %6414 = vmatprep.mubr.msk.f32.mxu0 %vm6912_vm5, %v8603_v10  ;;  %v3554_v1 = vld [vmem:[#allocation3 + $0x70] ss:$2 sm:$0xff]  ;;  %v3822_v46 = vld [vmem:[#allocation3 + $0x82] ss:$2 sm:$0xf] }
 0x311   : > { %v3819_v30 = vld [vmem:[#allocation3 + $0x62] ss:$2 sm:$0xff]  ;;  %v3820_v12 = vld [vmem:[#allocation3 + $0x72] ss:$2 sm:$0xff] }
 0x312   : > { %v3964_v26 = vld [vmem:[%s8590_s9] sm:$0xff]  ;;  %v3965_v18 = vld [vmem:[%s8590_s9 + $0x8] sm:$0xff] }
 0x313   : > { %6390 = vmatmul.mubr.msk.f32.gmra.mrb[174].mxu1 %vm418_vm6, %v3016_v39  ;;  %6415 = vmatmul.mubr.msk.f32.gmra.mrb[124].mxu0 %vm418_vm6, %v3152_v49  ;;  %v6764_v19 = vpack.c.bf16 %v3965_v18, %v3964_v26  ;;  %v3966_v39 = vld [vmem:[%s8590_s9 + $0x10] sm:$0xff]  ;;  %v3967_v49 = vld [vmem:[%s8590_s9 + $0x18] sm:$0xff] }
 0x314   : > { %6392 = vmatprep.mubr.msk.f32.mxu1 %vm6912_vm5, %v8603_v10  ;;  %6417 = vmatprep.mubr.msk.f32.mxu0 %vm6912_vm5, %v8603_v10 }
 0x317   : > { %6393 = vmatmul.mubr.msk.f32.gmra.mrb[176].mxu1 %vm418_vm6, %v3018_v34  ;;  %6418 = vmatmul.mubr.msk.f32.gmra.mrb[126].mxu0 %vm418_vm6, %v3153_v41  ;;  %v6767_v34 = vpack.c.bf16 %v3967_v49, %v3966_v39 }
 0x318   : > { %6395 = vmatprep.mubr.msk.f32.mxu1 %vm6912_vm5, %v8603_v10  ;;  %6420 = vmatprep.mubr.msk.f32.mxu0 %vm6912_vm5, %v8603_v10 }
 0x31b   : > { %6396 = vmatmul.mubr.msk.f32.gmra.mrb[178].mxu1 %vm418_vm6, %v3020_v53  ;;  %6421 = vmatmul.mubr.msk.f32.gmra.mrb[128].mxu0 %vm418_vm6, %v3154_v2 }
 0x31c   : > { %6398 = vmatprep.mubr.msk.f32.mxu1 %vm6912_vm5, %v8603_v10  ;;  %6423 = vmatprep.mubr.msk.f32.mxu0 %vm6912_vm5, %v8603_v10 }
 0x31f   : > { %6399 = vmatmul.mubr.msk.f32.gmra.mrb[180].mxu1 %vm418_vm6, %v3022_v13  ;;  %6424 = vmatmul.mubr.msk.f32.gmra.mrb[130].mxu0 %vm418_vm6, %v3155_v7 }
 0x320   : > { %6401 = vmatprep.mubr.msk.f32.mxu1 %vm6912_vm5, %v8603_v10  ;;  %6426 = vmatprep.mubr.msk.f32.mxu0 %vm6912_vm5, %v8603_v10 }
 0x323   : > { %6402 = vmatmul.mubr.msk.f32.gmra.mrb[182].mxu1 %vm418_vm6, %v3024_v21  ;;  %6427 = vmatmul.mubr.msk.f32.gmra.mrb[132].mxu0 %vm418_vm6, %v3157_v56 }
 0x324   : > { %6433 = vmatprep.mubr.msk.f32.mxu1 %vm6912_vm5, %v8603_v10  ;;  %6458 = vmatprep.mubr.msk.f32.mxu0 %vm6912_vm5, %v8603_v10 }
 0x327   : > { %6434 = vmatmul.mubr.msk.f32.vlgmr.msra.gmra.mrb[184].mxu1 %vm418_vm6, %v3283_v42  ;;  %6459 = vmatmul.mubr.msk.f32.vlgmr.msra.gmra.mrb[134].mxu0 %vm418_vm6, %v3416_v63 }
 0x328   : > { %6756 = vmatpush3.bf16.msra.mxu1 %v6755_v31  ;;  %6436 = vmatprep.mubr.msk.f32.mxu1 %vm6912_vm5, %v8603_v10 }
 0x329   : > { %6461 = vmatprep.mubr.msk.f32.mxu0 %vm6912_vm5, %v8603_v10  ;;  %6759 = vmatpush3.bf16.msra.mxu0 %v6758_v32 }
 0x32a   : > { %6760 = vmatprep.subr.bf16.mxu1 %v8605_v22  ;;  %6763 = vmatprep.subr.bf16.mxu0 %v8605_v22 }
 0x32b   : > { %6437 = vmatmul.mubr.msk.f32.gmra.mrb[186].mxu1 %vm418_vm6, %v3284_v51  ;;  %6462 = vmatmul.mubr.msk.f32.gmra.mrb[136].mxu0 %vm418_vm6, %v3417_v9 }
 0x32c   : > { %6439 = vmatprep.mubr.msk.f32.mxu1 %vm6912_vm5, %v8603_v10  ;;  %6464 = vmatprep.mubr.msk.f32.mxu0 %vm6912_vm5, %v8603_v10 }
 0x32f   : > { %6440 = vmatmul.mubr.msk.f32.gmra.mrb[188].mxu1 %vm418_vm6, %v3285_v6  ;;  %6465 = vmatmul.mubr.msk.f32.gmra.mrb[138].mxu0 %vm418_vm6, %v3418_v0 }
 0x330   : > { %6442 = vmatprep.mubr.msk.f32.mxu1 %vm6912_vm5, %v8603_v10  ;;  %6467 = vmatprep.mubr.msk.f32.mxu0 %vm6912_vm5, %v8603_v10 }
 0x332   : > { %v2980_v58 = vpop.f32.mrb[106].mxu0 }
 0x333   : > { %6443 = vmatmul.mubr.msk.f32.gmra.mrb[190].mxu1 %vm418_vm6, %v3286_v29  ;;  %6468 = vmatmul.mubr.msk.f32.gmra.mrb[140].mxu0 %vm418_vm6, %v3419_v50  ;;  %v8198_v62 = vadd.f32 %v2980_v58, %v2862_v17  ;;  %v6360_v4 = vpop.f32.mrb[107].mxu0 }
 0x334   : > { %6445 = vmatprep.mubr.msk.f32.mxu1 %vm6912_vm5, %v8603_v10  ;;  %6470 = vmatprep.mubr.msk.f32.mxu0 %vm6912_vm5, %v8603_v10 }
 0x337   : > { %6446 = vmatmul.mubr.msk.f32.gmra.mrb[192].mxu1 %vm418_vm6, %v3287_v23  ;;  %6471 = vmatmul.mubr.msk.f32.gmra.mrb[142].mxu0 %vm418_vm6, %v3420_v11 }
 0x338   : > { %6448 = vmatprep.mubr.msk.f32.mxu1 %vm6912_vm5, %v8603_v10  ;;  %6473 = vmatprep.mubr.msk.f32.mxu0 %vm6912_vm5, %v8603_v10 }
 0x33b   : > { %6449 = vmatmul.mubr.msk.f32.gmra.mrb[194].mxu1 %vm418_vm6, %v3288_v38  ;;  %6474 = vmatmul.mubr.msk.f32.gmra.mrb[144].mxu0 %vm418_vm6, %v3421_v33 }
 0x33c   : > { %6451 = vmatprep.mubr.msk.f32.mxu1 %vm6912_vm5, %v8603_v10  ;;  %6476 = vmatprep.mubr.msk.f32.mxu0 %vm6912_vm5, %v8603_v10 }
 0x33f   : > { %6452 = vmatmul.mubr.msk.f32.gmra.mrb[196].mxu1 %vm418_vm6, %v3290_v55  ;;  %6477 = vmatmul.mubr.msk.f32.gmra.mrb[146].mxu0 %vm418_vm6, %v3423_v15 }
 0x340   : > { %6483 = vmatprep.mubr.msk.f32.mxu1 %vm6912_vm5, %v8603_v10  ;;  %6508 = vmatprep.mubr.msk.f32.mxu0 %vm6912_vm5, %v8603_v10 }
 0x343   : > { %6484 = vmatmul.mubr.msk.f32.vlgmr.msra.gmra.mrb[198].mxu1 %vm418_vm6, %v3549_v47  ;;  %6509 = vmatmul.mubr.msk.f32.vlgmr.msra.gmra.mrb[148].mxu0 %vm418_vm6, %v3682_v48 }
 0x344   : > { %6762 = vmatpush3.bf16.msra.mxu1 %v6761_v35  ;;  %6486 = vmatprep.mubr.msk.f32.mxu1 %vm6912_vm5, %v8603_v10 }
 0x345   : > { %6511 = vmatprep.mubr.msk.f32.mxu0 %vm6912_vm5, %v8603_v10  ;;  %6765 = vmatpush3.bf16.msra.mxu0 %v6764_v19 }
 0x346   : > { %6766 = vmatprep.subr.bf16.mxu0 %v8605_v22 }
 0x347   : > { %6487 = vmatmul.mubr.msk.f32.gmra.mrb[200].mxu1 %vm418_vm6, %v3550_v54  ;;  %6512 = vmatmul.mubr.msk.f32.gmra.mrb[150].mxu0 %vm418_vm6, %v3683_v16 }
 0x348   : > { %6489 = vmatprep.mubr.msk.f32.mxu1 %vm6912_vm5, %v8603_v10  ;;  %6514 = vmatprep.mubr.msk.f32.mxu0 %vm6912_vm5, %v8603_v10 }
 0x349   : > { %6768 = vmatpush3.bf16.msra.mxu0 %v6767_v34 }
 0x34a   : > { %6769 = vmatprep.subr.bf16.mxu0 %v8605_v22 }
 0x34b   : > { %6490 = vmatmul.mubr.msk.f32.gmra.mrb[202].mxu1 %vm418_vm6, %v3551_v20  ;;  %6515 = vmatmul.mubr.msk.f32.gmra.mrb[152].mxu0 %vm418_vm6, %v3684_v61 }
 0x34c   : > { %6492 = vmatprep.mubr.msk.f32.mxu1 %vm6912_vm5, %v8603_v10  ;;  %6517 = vmatprep.mubr.msk.f32.mxu0 %vm6912_vm5, %v8603_v10 }
 0x34f   : > { %6493 = vmatmul.mubr.msk.f32.gmra.mrb[204].mxu1 %vm418_vm6, %v3552_v14  ;;  %6518 = vmatmul.mubr.msk.f32.gmra.mrb[154].mxu0 %vm418_vm6, %v3685_v28 }
 0x350   : > { %6495 = vmatprep.mubr.msk.f32.mxu1 %vm6912_vm5, %v8603_v10  ;;  %6520 = vmatprep.mubr.msk.f32.mxu0 %vm6912_vm5, %v8603_v10 }
 0x353   : > { %6496 = vmatmul.mubr.msk.f32.gmra.mrb[206].mxu1 %vm418_vm6, %v3553_v27  ;;  %6521 = vmatmul.mubr.msk.f32.gmra.mrb[156].mxu0 %vm418_vm6, %v3686_v5 }
 0x354   : > { %6498 = vmatprep.mubr.msk.f32.mxu1 %vm6912_vm5, %v8603_v10  ;;  %6523 = vmatprep.mubr.msk.f32.mxu0 %vm6912_vm5, %v8603_v10 }
 0x357   : > { %6499 = vmatmul.mubr.msk.f32.gmra.mrb[208].mxu1 %vm418_vm6, %v3554_v1  ;;  %6524 = vmatmul.mubr.msk.f32.gmra.mrb[158].mxu0 %vm418_vm6, %v3687_v8 }
 0x358   : > { %6501 = vmatprep.mubr.msk.f32.mxu1 %vm6912_vm5, %v8603_v10  ;;  %6526 = vmatprep.mubr.msk.f32.mxu0 %vm6912_vm5, %v8603_v10 }
 0x35b   : > { %6502 = vmatmul.mubr.msk.f32.gmra.mrb[210].mxu1 %vm418_vm6, %v3556_v44  ;;  %6527 = vmatmul.mubr.msk.f32.gmra.mrb[160].mxu0 %vm418_vm6, %v3689_v60 }
 0x35c   : > { %6533 = vmatprep.mubr.msk.f32.mxu1 %vm6912_vm5, %v8603_v10  ;;  %6562 = vmatprep.mubr.msk.f32.mxu0 %vm6912_vm5, %v8603_v10 }
 0x35f   : > { %6534 = vmatmul.mubr.msk.f32.vlgmr.msra.gmra.mrb[212].mxu1 %vm418_vm6, %v3815_v43 }
 0x360   : > { %6536 = vmatprep.mubr.msk.f32.mxu1 %vm6912_vm5, %v8603_v10 }
 0x363   : > { %6537 = vmatmul.mubr.msk.f32.gmra.mrb[214].mxu1 %vm418_vm6, %v3816_v57 }
 0x364   : > { %6539 = vmatprep.mubr.msk.f32.mxu1 %vm6912_vm5, %v8603_v10 }
 0x367   : > { %6540 = vmatmul.mubr.msk.f32.gmra.mrb[216].mxu1 %vm418_vm6, %v3817_v25 }
 0x368   : > { %6542 = vmatprep.mubr.msk.f32.mxu1 %vm6912_vm5, %v8603_v10 }
 0x36b   : > { %6543 = vmatmul.mubr.msk.f32.gmra.mrb[218].mxu1 %vm418_vm6, %v3818_v37 }
 0x36c   : > { %6545 = vmatprep.mubr.msk.f32.mxu1 %vm6912_vm5, %v8603_v10 }
 0x36f   : > { %6546 = vmatmul.mubr.msk.f32.gmra.mrb[220].mxu1 %vm418_vm6, %v3819_v30 }
 0x370   : > { %6548 = vmatprep.mubr.msk.f32.mxu1 %vm6912_vm5, %v8603_v10 }
 0x373   : > { %6549 = vmatmul.mubr.msk.f32.gmra.mrb[222].mxu1 %vm418_vm6, %v3820_v12 }
 0x374   : > { %6551 = vmatprep.mubr.msk.f32.mxu1 %vm6912_vm5, %v8603_v10 }
 0x377   : > { %6552 = vmatmul.mubr.msk.f32.gmra.mrb[224].mxu1 %vm418_vm6, %v3822_v46 }
 0x3b6   : > { %v2867_v41 = vpop.f32.mrb[158].mxu1  ;;  %v2985_v53 = vpop.f32.mrb[108].mxu0 }
 0x3b7   : > { %v6338_v2 = vpop.f32.mrb[159].mxu1  ;;  %v6363_v13 = vpop.f32.mrb[109].mxu0 }
 0x3be   : > { %v2871_v7 = vpop.f32.mrb[160].mxu1  ;;  %v2989_v45 = vpop.f32.mrb[110].mxu0 }
 0x3bf   : > { %v2990_v59 = vadd.f32 %v2989_v45, %v2871_v7  ;;  %v6341_v52 = vpop.f32.mrb[161].mxu1  ;;  %v6366_v40 = vpop.f32.mrb[111].mxu0 }
 0x3c6   : > { %v2876_v21 = vpop.f32.mrb[162].mxu1  ;;  %v2994_v56 = vpop.f32.mrb[112].mxu0 }
 0x3c7   : > { %v6344_v31 = vpop.f32.mrb[163].mxu1  ;;  %v6369_v32 = vpop.f32.mrb[113].mxu0 }
 0x3ce   : > { %v2880_v42 = vpop.f32.mrb[164].mxu1  ;;  %v2998_v63 = vpop.f32.mrb[114].mxu0 }
 0x3cf   : > { %v2999_v51 = vadd.f32 %v2998_v63, %v2880_v42  ;;  %v6347_v9 = vpop.f32.mrb[165].mxu1  ;;  %v6372_v6 = vpop.f32.mrb[115].mxu0 }
 0x3d6   : > { %v2885_v0 = vpop.f32.mrb[166].mxu1  ;;  %v3003_v29 = vpop.f32.mrb[116].mxu0 }
 0x3d7   : > { %v6350_v50 = vpop.f32.mrb[167].mxu1  ;;  %v6375_v17 = vpop.f32.mrb[117].mxu0 }
 0x3da   : > { %v2889_v58 = vpop.f32.mrb[168].mxu1  ;;  %v3007_v23 = vpop.f32.mrb[118].mxu0 }
 0x3db   : > { %v3008_v11 = vadd.f32 %v3007_v23, %v2889_v58  ;;  %v6353_v24 = vpop.f32.mrb[169].mxu1  ;;  %v6378_v4 = vpop.f32.mrb[119].mxu0 }
 0x3de   : > { %v3115_v38 = vpop.f32.mrb[170].mxu1  ;;  %v3248_v33 = vpop.f32.mrb[120].mxu0 }
 0x3df   : > { %v3146_v36 = vadd.f32 %v3115_v38, %v8198_v62  ;;  %v6385_v3 = vpop.f32.mrb[171].mxu1  ;;  %v6410_v55 = vpop.f32.mrb[121].mxu0 }
 0x3e1   : > { %v3279_v15 = vadd.f32 %v3248_v33, %v3146_v36 }
 0x3e2   : > { %v3120_v35 = vpop.f32.mrb[172].mxu1  ;;  %v3253_v47 = vpop.f32.mrb[122].mxu0 }
 0x3e3   : > { %v6388_v48 = vpop.f32.mrb[173].mxu1  ;;  %v6413_v54 = vpop.f32.mrb[123].mxu0 }
 0x3e6   : > { %v3124_v16 = vpop.f32.mrb[174].mxu1  ;;  %v3257_v20 = vpop.f32.mrb[124].mxu0 }
 0x3e7   : > { %v3147_v61 = vadd.f32 %v3124_v16, %v2990_v59  ;;  %v6391_v14 = vpop.f32.mrb[175].mxu1  ;;  %v6416_v28 = vpop.f32.mrb[125].mxu0 }
 0x3e9   : > { %v3280_v27 = vadd.f32 %v3257_v20, %v3147_v61 }
 0x3ea   : > { %v3129_v5 = vpop.f32.mrb[176].mxu1  ;;  %v3262_v1 = vpop.f32.mrb[126].mxu0 }
 0x3eb   : > { %v6394_v8 = vpop.f32.mrb[177].mxu1  ;;  %v6419_v44 = vpop.f32.mrb[127].mxu0 }
 0x3ee   : > { %v3133_v60 = vpop.f32.mrb[178].mxu1  ;;  %v3266_v43 = vpop.f32.mrb[128].mxu0 }
 0x3ef   : > { %v3148_v62 = vadd.f32 %v3133_v60, %v2999_v51  ;;  %v6397_v57 = vpop.f32.mrb[179].mxu1  ;;  %v6422_v25 = vpop.f32.mrb[129].mxu0 }
 0x3f1   : > { %v3281_v37 = vadd.f32 %v3266_v43, %v3148_v62 }
 0x3f2   : > { %v3138_v30 = vpop.f32.mrb[180].mxu1  ;;  %v3271_v12 = vpop.f32.mrb[130].mxu0 }
 0x3f3   : > { %v6400_v46 = vpop.f32.mrb[181].mxu1  ;;  %v6425_v26 = vpop.f32.mrb[131].mxu0 }
 0x3f6   : > { %v3142_v18 = vpop.f32.mrb[182].mxu1  ;;  %v3275_v19 = vpop.f32.mrb[132].mxu0 }
 0x3f7   : > { %v3149_v39 = vadd.f32 %v3142_v18, %v3008_v11  ;;  %v6403_v49 = vpop.f32.mrb[183].mxu1  ;;  %v6428_v34 = vpop.f32.mrb[133].mxu0 }
 0x3f9   : > { %v3282_v41 = vadd.f32 %v3275_v19, %v3149_v39 }
 0x3fa   : > { %v3381_v53 = vpop.f32.mrb[184].mxu1  ;;  %v3514_v2 = vpop.f32.mrb[134].mxu0 }
 0x3fb   : > { %v3412_v13 = vadd.f32 %v3381_v53, %v3279_v15  ;;  %v6435_v7 = vpop.f32.mrb[185].mxu1  ;;  %v6460_v45 = vpop.f32.mrb[135].mxu0 }
 0x3fd   : > { %v3545_v59 = vadd.f32 %v3514_v2, %v3412_v13 }
 0x3fe   : > { %v3386_v52 = vpop.f32.mrb[186].mxu1  ;;  %v3519_v40 = vpop.f32.mrb[136].mxu0 }
 0x3ff   : > { %v6438_v21 = vpop.f32.mrb[187].mxu1  ;;  %v6463_v56 = vpop.f32.mrb[137].mxu0 }
 0x402   : > { %v3390_v31 = vpop.f32.mrb[188].mxu1  ;;  %v3523_v32 = vpop.f32.mrb[138].mxu0 }
 0x403   : > { %v3413_v42 = vadd.f32 %v3390_v31, %v3280_v27  ;;  %v6441_v63 = vpop.f32.mrb[189].mxu1  ;;  %v6466_v51 = vpop.f32.mrb[139].mxu0 }
 0x404   : > { %v5520_v51 = vld [vmem:[%s8590_s9 + $0x20] sm:$0xff] }
 0x405   : > { %v3546_v9 = vadd.f32 %v3523_v32, %v3413_v42  ;;  %v8303_v32 = vld [vmem:[%s8589_s8] ss:$0 sm:$0xff] }
 0x406   : > { %v3395_v6 = vpop.f32.mrb[190].mxu1  ;;  %v3528_v0 = vpop.f32.mrb[140].mxu0 }
 0x407   : > { %v6444_v29 = vpop.f32.mrb[191].mxu1  ;;  %v6469_v50 = vpop.f32.mrb[141].mxu0 }
 0x40a   : > { %v3399_v17 = vpop.f32.mrb[192].mxu1  ;;  %v3532_v58 = vpop.f32.mrb[142].mxu0 }
 0x40b   : > { %v3414_v23 = vadd.f32 %v3399_v17, %v3281_v37  ;;  %v6447_v11 = vpop.f32.mrb[193].mxu1  ;;  %v6472_v24 = vpop.f32.mrb[143].mxu0 }
 0x40d   : > { %v3547_v4 = vadd.f32 %v3532_v58, %v3414_v23  ;;  %v5522_v58 = vld [vmem:[%s8590_s9 + $0x30] sm:$0xff]  ;;  %v5523_v23 = vld [vmem:[%s8590_s9 + $0x38] sm:$0xff] }
 0x40e   : > { %v3404_v38 = vpop.f32.mrb[194].mxu1  ;;  %v3537_v33 = vpop.f32.mrb[144].mxu0  ;;  %v6773_v24 = vpack.c.bf16 %v5523_v23, %v5522_v58  ;;  %v5556_v58 = vld [vmem:[%s8590_s9 + $0x108] sm:$0xff] }
 0x40f   : > { %v6450_v36 = vpop.f32.mrb[195].mxu1  ;;  %v6475_v3 = vpop.f32.mrb[145].mxu0  ;;  %v5525_v33 = vld [vmem:[%s8590_s9 + $0x40] sm:$0xff] }
 0x410   : > { %v5526_v36 = vld [vmem:[%s8590_s9 + $0x48] sm:$0xff] }
 0x412   : > { %v3408_v55 = vpop.f32.mrb[196].mxu1  ;;  %v3541_v15 = vpop.f32.mrb[146].mxu0 }
 0x413   : > { %v3415_v35 = vadd.f32 %v3408_v55, %v3282_v41  ;;  %v6453_v47 = vpop.f32.mrb[197].mxu1  ;;  %v6478_v48 = vpop.f32.mrb[147].mxu0  ;;  %v6776_v55 = vpack.c.bf16 %v5526_v36, %v5525_v33  ;;  %v5560_v33 = vld [vmem:[%s8590_s9 + $0x120] sm:$0xff]  ;;  %v5561_v36 = vld [vmem:[%s8590_s9 + $0x128] sm:$0xff] }
 0x414   : > { %v5527_v47 = vld [vmem:[%s8590_s9 + $0x50] sm:$0xff]  ;;  %v5528_v48 = vld [vmem:[%s8590_s9 + $0x58] sm:$0xff] }
 0x415   : > { %v3548_v54 = vadd.f32 %v3541_v15, %v3415_v35 }
 0x416   : > { %v3647_v16 = vpop.f32.mrb[198].mxu1  ;;  %v3780_v20 = vpop.f32.mrb[148].mxu0 }
 0x417   : > { %v3678_v61 = vadd.f32 %v3647_v16, %v3545_v59  ;;  %v6485_v14 = vpop.f32.mrb[199].mxu1  ;;  %v6510_v28 = vpop.f32.mrb[149].mxu0  ;;  %v6779_v16 = vpack.c.bf16 %v5528_v48, %v5527_v47  ;;  %v5565_v48 = vld [vmem:[%s8590_s9 + $0x140] sm:$0xff] }
 0x418   : > { %v5530_v14 = vld [vmem:[%s8590_s9 + $0x60] sm:$0xff]  ;;  %v5531_v28 = vld [vmem:[%s8590_s9 + $0x68] sm:$0xff] }
 0x419   : > { %v3811_v27 = vadd.f32 %v3780_v20, %v3678_v61 }
 0x41a   : > { %v3652_v5 = vpop.f32.mrb[200].mxu1  ;;  %v3785_v1 = vpop.f32.mrb[150].mxu0 }
 0x41b   : > { %v6488_v8 = vpop.f32.mrb[201].mxu1  ;;  %v6513_v44 = vpop.f32.mrb[151].mxu0  ;;  %v6782_v1 = vpack.c.bf16 %v5531_v28, %v5530_v14  ;;  %v5568_v14 = vld [vmem:[%s8590_s9 + $0x158] sm:$0xff] }
 0x41e   : > { %v3656_v60 = vpop.f32.mrb[202].mxu1  ;;  %v3789_v43 = vpop.f32.mrb[152].mxu0 }
 0x41f   : > { %v3679_v62 = vadd.f32 %v3656_v60, %v3546_v9  ;;  %v6491_v57 = vpop.f32.mrb[203].mxu1  ;;  %v6516_v25 = vpop.f32.mrb[153].mxu0  ;;  %v5521_v9 = vld [vmem:[%s8590_s9 + $0x28] sm:$0xff]  ;;  %v5532_v60 = vld [vmem:[%s8590_s9 + $0x70] sm:$0xff] }
 0x420   : > { %v6770_v29 = vpack.c.bf16 %v5521_v9, %v5520_v51  ;;  %v5551_v51 = vld [vmem:[%s8590_s9 + $0xe8] sm:$0xff] }
 0x421   : > { %v3812_v37 = vadd.f32 %v3789_v43, %v3679_v62  ;;  %v5533_v43 = vld [vmem:[%s8590_s9 + $0x78] sm:$0xff] }
 0x422   : > { %v3661_v30 = vpop.f32.mrb[204].mxu1  ;;  %v3794_v12 = vpop.f32.mrb[154].mxu0  ;;  %v6785_v57 = vpack.c.bf16 %v5533_v43, %v5532_v60  ;;  %v5573_v60 = vld [vmem:[%s8590_s9 + $0x178] sm:$0xff] }
 0x423   : > { %v6494_v46 = vpop.f32.mrb[205].mxu1  ;;  %v6519_v26 = vpop.f32.mrb[155].mxu0  ;;  %v5536_v30 = vld [vmem:[%s8590_s9 + $0x88] sm:$0xff] }
 0x426   : > { %v3665_v18 = vpop.f32.mrb[206].mxu1  ;;  %v3798_v19 = vpop.f32.mrb[156].mxu0 }
 0x427   : > { %v3680_v39 = vadd.f32 %v3665_v18, %v3547_v4  ;;  %v6497_v49 = vpop.f32.mrb[207].mxu1  ;;  %v6522_v34 = vpop.f32.mrb[157].mxu0 }
 0x429   : > { %v3813_v41 = vadd.f32 %v3798_v19, %v3680_v39  ;;  %v5537_v19 = vld [vmem:[%s8590_s9 + $0x90] sm:$0xff]  ;;  %v5538_v39 = vld [vmem:[%s8590_s9 + $0x98] sm:$0xff] }
 0x42a   : > { %v3670_v53 = vpop.f32.mrb[208].mxu1  ;;  %v3803_v2 = vpop.f32.mrb[158].mxu0  ;;  %v6791_v49 = vpack.c.bf16 %v5538_v39, %v5537_v19  ;;  %v5581_v19 = vld [vmem:[%s8590_s9 + $0x1a8] sm:$0xff] }
 0x42b   : > { %v6500_v13 = vpop.f32.mrb[209].mxu1  ;;  %v6525_v7 = vpop.f32.mrb[159].mxu0  ;;  %v5541_v53 = vld [vmem:[%s8590_s9 + $0xa8] sm:$0xff] }
 0x42c   : > { %v5542_v7 = vld [vmem:[%s8590_s9 + $0xb0] sm:$0xff] }
 0x42e   : > { %v3674_v45 = vpop.f32.mrb[210].mxu1  ;;  %v3807_v59 = vpop.f32.mrb[160].mxu0 }
 0x42f   : > { %v3681_v52 = vadd.f32 %v3674_v45, %v3548_v54  ;;  %v6503_v40 = vpop.f32.mrb[211].mxu1  ;;  %v6528_v21 = vpop.f32.mrb[161].mxu0  ;;  %v5543_v45 = vld [vmem:[%s8590_s9 + $0xb8] sm:$0xff] }
 0x430   : > { %v5546_v40 = vld [vmem:[%s8590_s9 + $0xc8] sm:$0xff] }
 0x431   : > { %v3814_v56 = vadd.f32 %v3807_v59, %v3681_v52  ;;  %v6797_v59 = vpack.c.bf16 %v5543_v45, %v5542_v7  ;;  %v5545_v52 = vld [vmem:[%s8590_s9 + $0xc0] sm:$0xff]  ;;  %v5587_v45 = vld [vmem:[%s8590_s9 + $0x1d0] sm:$0xff] }
 0x432   : > { %v3913_v31 = vpop.f32.mrb[212].mxu1  ;;  %v6800_v21 = vpack.c.bf16 %v5546_v40, %v5545_v52  ;;  %v5590_v40 = vld [vmem:[%s8590_s9 + $0x1e0] sm:$0xff] }
 0x433   : > { %v3944_v42 = vadd.f32 %v3913_v31, %v3811_v27  ;;  %v6535_v63 = vpop.f32.mrb[213].mxu1  ;;  %v5547_v31 = vld [vmem:[%s8590_s9 + $0xd0] sm:$0xff] }
 0x434   : > { %v5550_v63 = vld [vmem:[%s8590_s9 + $0xe0] sm:$0xff] }
 0x435   : > { %v3955_v6 = vadd.f32 %v8303_v32, %v3944_v42  ;;  %v6806_v9 = vpack.c.bf16 %v5551_v51, %v5550_v63 }
 0x436   : > { %v3918_v0 = vpop.f32.mrb[214].mxu1 }
 0x437   : > { %v3959_v50 = vmax.f32 %v3955_v6, 0.0  ;;  %v6538_v17 = vpop.f32.mrb[215].mxu1  ;;  %v5552_v0 = vld [vmem:[%s8590_s9 + $0xf0] sm:$0xff] }
 0x438   : > { %v5555_v17 = vld [vmem:[%s8590_s9 + $0x100] sm:$0xff] }
 0x439   : > { %6563 = vmatmul.mubr.msk.f32.vlgmr.msra.gmra.mrb[162].mxu0 %vm3968_vm8, %v3959_v50  ;;  %v4048_v15 = vrot.slane %v3959_v50, 1  ;;  %v4127_v8 = vrot.slane %v3959_v50, 2  ;;  %v4206_v18 = vrot.slane %v3959_v50, 3  ;;  %v6812_v23 = vpack.c.bf16 %v5556_v58, %v5555_v17 }
 0x43a   : > { %6771 = vmatpush3.bf16.msra.mxu0 %v6770_v29  ;;  %v3922_v11 = vpop.f32.mrb[216].mxu1  ;;  %6573 = vmatprep.mubr.msk.f32.mxu0 %vm6912_vm5, %v8603_v10  ;;  %v5553_v29 = vld [vmem:[%s8590_s9 + $0xf8] sm:$0xff] }
 0x43b   : > { %v3945_v4 = vadd.f32 %v3922_v11, %v3812_v37  ;;  %v6541_v38 = vpop.f32.mrb[217].mxu1  ;;  %6772 = vmatprep.subr.bf16.mxu0 %v8605_v22  ;;  %v5535_v37 = vld [vmem:[%s8590_s9 + $0x80] sm:$0xff]  ;;  %v6809_v50 = vpack.c.bf16 %v5553_v29, %v5552_v0 }
 0x43c   : > { %v6788_v26 = vpack.c.bf16 %v5536_v30, %v5535_v37  ;;  %v5577_v30 = vld [vmem:[%s8590_s9 + $0x190] sm:$0xff] }
 0x43d   : > { %v3956_v34 = vadd.f32 %v8303_v32, %v3945_v4  ;;  %v5558_v4 = vld [vmem:[%s8590_s9 + $0x118] sm:$0xff] }
 0x43e   : > { %6774 = vmatpush3.bf16.msra.mxu0 %v6773_v24  ;;  %v3927_v3 = vpop.f32.mrb[218].mxu1  ;;  %v5557_v24 = vld [vmem:[%s8590_s9 + $0x110] sm:$0xff] }
 0x43f   : > { %v6544_v35 = vpop.f32.mrb[219].mxu1  ;;  %6775 = vmatprep.subr.bf16.mxu0 %v8605_v22  ;;  %v3960_v13 = vmax.f32 %v3956_v34, 0.0  ;;  %v6815_v38 = vpack.c.bf16 %v5558_v4, %v5557_v24  ;;  %v6818_v3 = vpack.c.bf16 %v5561_v36, %v5560_v33  ;;  %v5582_v34 = vld [vmem:[%s8590_s9 + $0x1b0] sm:$0xff] }
 0x440   : > { %v5563_v35 = vld [vmem:[%s8590_s9 + $0x138] sm:$0xff] }
 0x441   : > { %6574 = vmatmul.mubr.msk.f32.vlgmr.msra.gmra.mrb[162].mxu0 %vm3968_vm8, %v4048_v15  ;;  %v4443_v6 = vrot.slane %v3960_v13, 2  ;;  %v4522_v11 = vrot.slane %v3960_v13, 3  ;;  %v5562_v15 = vld [vmem:[%s8590_s9 + $0x130] sm:$0xff] }
 0x442   : > { %6777 = vmatpush3.bf16.msra.mxu0 %v6776_v55  ;;  %v3931_v54 = vpop.f32.mrb[220].mxu1  ;;  %6584 = vmatprep.mubr.msk.f32.mxu0 %vm6912_vm5, %v8603_v10  ;;  %v6821_v47 = vpack.c.bf16 %v5563_v35, %v5562_v15 }
 0x443   : > { %v3946_v20 = vadd.f32 %v3931_v54, %v3813_v41  ;;  %v6547_v61 = vpop.f32.mrb[221].mxu1  ;;  %6778 = vmatprep.subr.bf16.mxu0 %v8605_v22  ;;  %v5540_v41 = vld [vmem:[%s8590_s9 + $0xa0] sm:$0xff]  ;;  %v5566_v54 = vld [vmem:[%s8590_s9 + $0x148] sm:$0xff] }
 0x444   : > { %v6794_v2 = vpack.c.bf16 %v5541_v53, %v5540_v41  ;;  %v5567_v61 = vld [vmem:[%s8590_s9 + $0x150] sm:$0xff]  ;;  %v5583_v41 = vld [vmem:[%s8590_s9 + $0x1b8] sm:$0xff] }
 0x445   : > { %v8346_v27 = vadd.f32 %v8303_v32, %v3946_v20  ;;  %v6827_v28 = vpack.c.bf16 %v5568_v14, %v5567_v61  ;;  %v6845_v53 = vpack.c.bf16 %v5583_v41, %v5582_v34 }
 0x446   : > { %6780 = vmatpush3.bf16.msra.mxu0 %v6779_v16  ;;  %v3936_v5 = vpop.f32.mrb[222].mxu1  ;;  %v6824_v16 = vpack.c.bf16 %v5566_v54, %v5565_v48 }
 0x447   : > { %v6550_v44 = vpop.f32.mrb[223].mxu1  ;;  %6781 = vmatprep.subr.bf16.mxu0 %v8605_v22  ;;  %v3961_v55 = vmax.f32 %v8346_v27, 0.0  ;;  %v5570_v27 = vld [vmem:[%s8590_s9 + $0x160] sm:$0xff]  ;;  %v5571_v5 = vld [vmem:[%s8590_s9 + $0x168] sm:$0xff] }
 0x448   : > { %v5572_v44 = vld [vmem:[%s8590_s9 + $0x170] sm:$0xff] }
 0x449   : > { %6585 = vmatmul.mubr.msk.f32.vlgmr.msra.gmra.mrb[162].mxu0 %vm3968_vm8, %v4127_v8  ;;  %v4680_v20 = vrot.slane %v3961_v55, 1  ;;  %v4759_v8 = vrot.slane %v3961_v55, 2  ;;  %v6833_v43 = vpack.c.bf16 %v5573_v60, %v5572_v44  ;;  %v4838_v37 = vrot.slane %v3961_v55, 3 }
 0x44a   : > { %6783 = vmatpush3.bf16.msra.mxu0 %v6782_v1  ;;  %v3940_v62 = vpop.f32.mrb[224].mxu1  ;;  %6595 = vmatprep.mubr.msk.f32.mxu0 %vm6912_vm5, %v8603_v10  ;;  %v6830_v1 = vpack.c.bf16 %v5571_v5, %v5570_v27 }
 0x44b   : > { %v3947_v25 = vadd.f32 %v3940_v62, %v3814_v56  ;;  %6784 = vmatprep.subr.bf16.mxu0 %v8605_v22  ;;  %v6553_v12 = vpop.f32.mrb[225].mxu1  ;;  %v4364_v56 = vrot.slane %v3960_v13, 1  ;;  %v5575_v62 = vld [vmem:[%s8590_s9 + $0x180] sm:$0xff] }
 0x44c   : > { %v5578_v12 = vld [vmem:[%s8590_s9 + $0x198] sm:$0xff] }
 0x44d   : > { %v8366_v46 = vadd.f32 %v8303_v32, %v3947_v25  ;;  %v5548_v32 = vld [vmem:[%s8590_s9 + $0xd8] sm:$0xff] }
 0x44e   : > { %6786 = vmatpush3.bf16.msra.mxu0 %v6785_v57  ;;  %v6803_v42 = vpack.c.bf16 %v5548_v32, %v5547_v31  ;;  %v5576_v57 = vld [vmem:[%s8590_s9 + $0x188] sm:$0xff]  ;;  %v5592_v32 = vld [vmem:[%s8590_s9 + $0x1f0] sm:$0xff] }
 0x44f   : > { %6787 = vmatprep.subr.bf16.mxu0 %v8605_v22  ;;  %v6836_v25 = vpack.c.bf16 %v5576_v57, %v5575_v62 }
 0x451   : > { %6596 = vmatmul.mubr.msk.f32.vlgmr.msra.gmra.mrb[162].mxu0 %vm3968_vm8, %v4206_v18  ;;  %v5580_v18 = vld [vmem:[%s8590_s9 + $0x1a0] sm:$0xff] }
 0x452   : > { %6789 = vmatpush3.bf16.msra.mxu0 %v6788_v26  ;;  %6606 = vmatprep.mubr.msk.f32.mxu0 %vm6912_vm5, %v8603_v10  ;;  %v6839_v26 = vpack.c.bf16 %v5578_v12, %v5577_v30  ;;  %v6842_v39 = vpack.c.bf16 %v5581_v19, %v5580_v18 }
 0x453   : > { %6790 = vmatprep.subr.bf16.mxu0 %v8605_v22 }
 0x456   : > { %6792 = vmatpush3.bf16.msra.mxu0 %v6791_v49  ;;  %v3962_v49 = vmax.f32 %v8366_v46, 0.0  ;;  %v5585_v46 = vld [vmem:[%s8590_s9 + $0x1c0] sm:$0xff] }
 0x457   : > { %6793 = vmatprep.subr.bf16.mxu0 %v8605_v22 }
 0x458   : > { %v4996_v7 = vrot.slane %v3962_v49, 1  ;;  %v5075_v31 = vrot.slane %v3962_v49, 2  ;;  %v5154_v51 = vrot.slane %v3962_v49, 3 }
 0x459   : > { %6607 = vmatmul.mubr.msk.f32.vlgmr.msra.gmra.mrb[162].mxu0 %vm3968_vm8, %v3960_v13 }
 0x45a   : > { %6795 = vmatpush3.bf16.msra.mxu0 %v6794_v2  ;;  %6617 = vmatprep.mubr.msk.f32.mxu0 %vm6912_vm5, %v8603_v10  ;;  %v5586_v2 = vld [vmem:[%s8590_s9 + $0x1c8] sm:$0xff] }
 0x45b   : > { %6796 = vmatprep.subr.bf16.mxu0 %v8605_v22  ;;  %v6848_v13 = vpack.c.bf16 %v5586_v2, %v5585_v46 }
 0x45e   : > { %6798 = vmatpush3.bf16.msra.mxu0 %v6797_v59  ;;  %v5588_v59 = vld [vmem:[%s8590_s9 + $0x1d8] sm:$0xff] }
 0x45f   : > { %6799 = vmatprep.subr.bf16.mxu0 %v8605_v22  ;;  %v6851_v52 = vpack.c.bf16 %v5588_v59, %v5587_v45 }
 0x461   : > { %6618 = vmatmul.mubr.msk.f32.vlgmr.msra.gmra.mrb[162].mxu0 %vm3968_vm8, %v4364_v56 }
 0x462   : > { %6801 = vmatpush3.bf16.msra.mxu0 %v6800_v21  ;;  %6628 = vmatprep.mubr.msk.f32.mxu0 %vm6912_vm5, %v8603_v10  ;;  %v5591_v21 = vld [vmem:[%s8590_s9 + $0x1e8] sm:$0xff] }
 0x463   : > { %6802 = vmatprep.subr.bf16.mxu0 %v8605_v22  ;;  %v6854_v56 = vpack.c.bf16 %v5591_v21, %v5590_v40 }
 0x466   : > { %6804 = vmatpush3.bf16.msra.mxu0 %v6803_v42  ;;  %v5593_v42 = vld [vmem:[%s8590_s9 + $0x1f8] sm:$0xff] }
 0x467   : > { %6805 = vmatprep.subr.bf16.mxu0 %v8605_v22  ;;  %v6857_v63 = vpack.c.bf16 %v5593_v42, %v5592_v32 }
 0x469   : > { %6629 = vmatmul.mubr.msk.f32.vlgmr.msra.gmra.mrb[162].mxu0 %vm3968_vm8, %v4443_v6 }
 0x46a   : > { %6807 = vmatpush3.bf16.msra.mxu0 %v6806_v9  ;;  %6639 = vmatprep.mubr.msk.f32.mxu0 %vm6912_vm5, %v8603_v10  ;;  %v3963_v9 = vld [vmem:[%s8591_s10] sm:$0x1] }
 0x46b   : > { %6808 = vmatprep.subr.bf16.mxu0 %v8605_v22 }
 0x46e   : > { %6810 = vmatpush3.bf16.msra.mxu0 %v6809_v50 }
 0x46f   : > { %6811 = vmatprep.subr.bf16.mxu0 %v8605_v22 }
 0x471   : > { %6640 = vmatmul.mubr.msk.f32.vlgmr.msra.gmra.mrb[162].mxu0 %vm3968_vm8, %v4522_v11 }
 0x472   : > { %6813 = vmatpush3.bf16.msra.mxu0 %v6812_v23  ;;  %6650 = vmatprep.mubr.msk.f32.mxu0 %vm6912_vm5, %v8603_v10 }
 0x473   : > { %6814 = vmatprep.subr.bf16.mxu0 %v8605_v22 }
 0x476   : > { %6816 = vmatpush3.bf16.msra.mxu0 %v6815_v38 }
 0x477   : > { %6817 = vmatprep.subr.bf16.mxu0 %v8605_v22 }
 0x479   : > { %6651 = vmatmul.mubr.msk.f32.vlgmr.msra.gmra.mrb[162].mxu0 %vm3968_vm8, %v3961_v55 }
 0x47a   : > { %6819 = vmatpush3.bf16.msra.mxu0 %v6818_v3  ;;  %6661 = vmatprep.mubr.msk.f32.mxu0 %vm6912_vm5, %v8603_v10 }
 0x47b   : > { %6820 = vmatprep.subr.bf16.mxu0 %v8605_v22 }
 0x47e   : > { %6822 = vmatpush3.bf16.msra.mxu0 %v6821_v47 }
 0x47f   : > { %6823 = vmatprep.subr.bf16.mxu0 %v8605_v22 }
 0x481   : > { %6662 = vmatmul.mubr.msk.f32.vlgmr.msra.gmra.mrb[162].mxu0 %vm3968_vm8, %v4680_v20 }
 0x482   : > { %6825 = vmatpush3.bf16.msra.mxu0 %v6824_v16  ;;  %6672 = vmatprep.mubr.msk.f32.mxu0 %vm6912_vm5, %v8603_v10 }
 0x483   : > { %6826 = vmatprep.subr.bf16.mxu0 %v8605_v22 }
 0x486   : > { %6828 = vmatpush3.bf16.msra.mxu0 %v6827_v28 }
 0x487   : > { %6829 = vmatprep.subr.bf16.mxu0 %v8605_v22 }
 0x489   : > { %6673 = vmatmul.mubr.msk.f32.vlgmr.msra.gmra.mrb[162].mxu0 %vm3968_vm8, %v4759_v8 }
 0x48a   : > { %6831 = vmatpush3.bf16.msra.mxu0 %v6830_v1  ;;  %6683 = vmatprep.mubr.msk.f32.mxu0 %vm6912_vm5, %v8603_v10 }
 0x48b   : > { %6832 = vmatprep.subr.bf16.mxu0 %v8605_v22 }
 0x48e   : > { %6834 = vmatpush3.bf16.msra.mxu0 %v6833_v43 }
 0x48f   : > { %6835 = vmatprep.subr.bf16.mxu0 %v8605_v22 }
 0x491   : > { %6684 = vmatmul.mubr.msk.f32.vlgmr.msra.gmra.mrb[162].mxu0 %vm3968_vm8, %v4838_v37 }
 0x492   : > { %6837 = vmatpush3.bf16.msra.mxu0 %v6836_v25  ;;  %6694 = vmatprep.mubr.msk.f32.mxu0 %vm6912_vm5, %v8603_v10 }
 0x493   : > { %6838 = vmatprep.subr.bf16.mxu0 %v8605_v22 }
 0x496   : > { %6840 = vmatpush3.bf16.msra.mxu0 %v6839_v26 }
 0x497   : > { %6841 = vmatprep.subr.bf16.mxu0 %v8605_v22 }
 0x499   : > { %6695 = vmatmul.mubr.msk.f32.vlgmr.msra.gmra.mrb[162].mxu0 %vm3968_vm8, %v3962_v49 }
 0x49a   : > { %6843 = vmatpush3.bf16.msra.mxu0 %v6842_v39  ;;  %6705 = vmatprep.mubr.msk.f32.mxu0 %vm6912_vm5, %v8603_v10 }
 0x49b   : > { %6844 = vmatprep.subr.bf16.mxu0 %v8605_v22 }
 0x49e   : > { %6846 = vmatpush3.bf16.msra.mxu0 %v6845_v53 }
 0x49f   : > { %6847 = vmatprep.subr.bf16.mxu0 %v8605_v22 }
 0x4a1   : > { %6706 = vmatmul.mubr.msk.f32.vlgmr.msra.gmra.mrb[162].mxu0 %vm3968_vm8, %v4996_v7 }
 0x4a2   : > { %6849 = vmatpush3.bf16.msra.mxu0 %v6848_v13  ;;  %6716 = vmatprep.mubr.msk.f32.mxu0 %vm6912_vm5, %v8603_v10 }
 0x4a3   : > { %6850 = vmatprep.subr.bf16.mxu0 %v8605_v22 }
 0x4a6   : > { %6852 = vmatpush3.bf16.msra.mxu0 %v6851_v52 }
 0x4a7   : > { %6853 = vmatprep.subr.bf16.mxu0 %v8605_v22 }
 0x4a9   : > { %6717 = vmatmul.mubr.msk.f32.vlgmr.msra.gmra.mrb[162].mxu0 %vm3968_vm8, %v5075_v31 }
 0x4aa   : > { %6855 = vmatpush3.bf16.msra.mxu0 %v6854_v56  ;;  %6727 = vmatprep.mubr.msk.f32.mxu0 %vm6912_vm5, %v8603_v10 }
 0x4ab   : > { %6856 = vmatprep.subr.bf16.mxu0 %v8605_v22 }
 0x4ae   : > { %6858 = vmatpush3.bf16.msra.mxu0 %v6857_v63 }
 0x4b1   : > { %6728 = vmatmul.mubr.msk.f32.vlgmr.msra.gmra.mrb[162].mxu0 %vm3968_vm8, %v5154_v51 }
 0x584   : > { %v5223_v6 = vpop.f32.mrb[162].mxu0 }
 0x585   : > { %v6859_v0 = vadd.f32 %v5223_v6, %v3963_v9  ;;  %v6729_v10 = vpop.f32.mrb[163].mxu0 }
 0x587   : > { %5229 = vst.msk [vmem:[%s384_s12] sm:$0x1] %vm5228_vm9, %v6859_v0 }
 0x588 PF: > { %s21_s17 = sadd.s32 1, %s6908_s17  }
 0x589   : > { %p18_p5 = scmp.ge.s32.totalorder %s21_s17, 4  }
 0x58b   :  { %20 = sbr.rel (!%p18_p5) target bundleno = 1 (0x1), region = 195 }

</bundles_post_ra>
